<compile_context>
chip_gen: v7x
topology: tpu7x:2x2x1
jax: 0.10.0
libtpu: 0.0.40
codegen_flags: <defaults>
</compile_context>

<pallas_src>
import functools

import jax
import jax.numpy as jnp
from jax.experimental import pallas as pl
from jax.experimental.pallas import tpu as pltpu

WENLAN_DIM = 2048   # nn.Linear(2048, 512) input
HID_DIM = 512       # projector hidden
GPT_DIM = 768       # nn.Linear(512, 768) output (GPT-2 hidden size)


def _round_up(x, m):
    return ((x + m - 1) // m) * m


def _device_kind():
    try:
        return jax.devices()[0].device_kind.lower()
    except Exception:
        return ""


def _pick_tile_m(R):
    """tile_m per review: 512 on 1-TC chips (v5e/v6e), 256 on v7x (2 TCs);
    only force a multi-step split on v7x and only when each half keeps M>=128."""
    is_v7 = "v7" in _device_kind()
    ncores = 2 if is_v7 else 1
    base = 256 if is_v7 else 512
    if R >= base * ncores:
        return base
    per_core = pl.cdiv(R, ncores)
    if ncores > 1 and per_core >= 128:
        return _round_up(per_core, 128)
    return max(8, _round_up(R, 8))


@functools.lru_cache(maxsize=None)
def _single_buffer_supported():
    """Probe whether pipeline_mode=pl.Buffered(1) (no double-buffering for
    fetched-once resident inputs) lowers on this jax/libtpu.  Falls back to
    plain constant-index_map BlockSpecs if not."""
    if not hasattr(pl, "Buffered"):
        return False
    try:
        def _k(x_ref, o_ref):
            o_ref[...] = x_ref[...] + 1.0
        spec = pl.BlockSpec((8, 128), lambda i: (0, 0),
                            pipeline_mode=pl.Buffered(1))
        out = pl.pallas_call(
            _k,
            out_shape=jax.ShapeDtypeStruct((16, 128), jnp.float32),
            grid=(2,),
            in_specs=[spec],
            out_specs=pl.BlockSpec((8, 128), lambda i: (i, 0)),
        )(jnp.zeros((8, 128), jnp.float32))
        jax.block_until_ready(out)
        return True
    except Exception:
        return False


# ---------------------------------------------------------------------------
# Pallas kernel: x @ W1 + (concat_output @ W1)[row] + b1 -> tanh -> @ W2 + b2
# ---------------------------------------------------------------------------
def _projector_kernel(x_ref, lo_ref, hi_ref, ct_ref, w1_ref, b1_ref, w2_ref,
                      b2_ref, o_ref):
    tile_m = x_ref.shape[0]
    k2 = ct_ref.shape[0]          # 2 * c_pad (bf16 hi rows, then lo rows)

    # Fused concat_output add (already folded through W1).  Concat row c is
    # added to the contiguous flattened-row range [row_lo[c], row_hi[c]); the
    # 0/1 membership matrix is built straight from the absolute row id, so no
    # per-row index input and no in-kernel integer division is needed.
    row = (jax.lax.broadcasted_iota(jnp.int32, (tile_m, k2), 0)
           + pl.program_id(0) * tile_m)
    hit = (row >= lo_ref[...]) & (row < hi_ref[...])            # [tile_m, k2]
    onehot = jnp.where(hit, 1.0, 0.0).astype(jnp.bfloat16)
    # ct_ref packs bf16 hi/lo halves of (concat_output @ W1); with a 0/1
    # one-hot the two stacked bf16 MXU passes reproduce the f32 table to
    # ~16 mantissa bits (fixes the default-precision f32-dot concern).
    add_h = jnp.dot(onehot, ct_ref[...],
                    preferred_element_type=jnp.float32)          # [tile_m, 512]

    # projector_layer1 -> tanh -> projector_layer2 (bf16 MXU, f32 accum/EUP).
    h = jnp.dot(x_ref[...], w1_ref[...], preferred_element_type=jnp.float32)
    h = jnp.tanh(h + add_h + b1_ref[...])
    o = jnp.dot(h.astype(jnp.bfloat16), w2_ref[...],
                preferred_element_type=jnp.float32)
    o_ref[...] = (o + b2_ref[...]).astype(o_ref.dtype)


def projector_pallas(x, row_lo, row_hi, ct_packed, w1, b1, w2, b2,
                     *, out_dtype=jnp.float32):
    """x: [R, 2048] bf16 wenlan embs; row_lo/row_hi: [1, 2*c_pad] i32 flattened
    row ranges per concat row; ct_packed: [2*c_pad, 512] bf16 hi/lo split of
    (concat_output @ W1)  ->  [R, 768] projector output."""
    R = x.shape[0]
    k2 = ct_packed.shape[0]
    tile_m = _pick_tile_m(R)
    R_pad = _round_up(R, tile_m)
    if R_pad != R:
        x = jnp.pad(x, ((0, R_pad - R), (0, 0)))
    grid = (R_pad // tile_m,)

    if _single_buffer_supported():
        def resident(shape):
            return pl.BlockSpec(shape, lambda i: (0, 0),
                                pipeline_mode=pl.Buffered(1))
    else:
        def resident(shape):
            return pl.BlockSpec(shape, lambda i: (0, 0))

    flops = 2 * R_pad * (WENLAN_DIM * HID_DIM + HID_DIM * GPT_DIM
                         + k2 * HID_DIM)
    bytes_accessed = (x.size * x.dtype.itemsize
                      + ct_packed.size * 2
                      + (row_lo.size + row_hi.size) * 4
                      + w1.size * 2 + b1.size * 4 + w2.size * 2 + b2.size * 4
                      + R_pad * GPT_DIM * jnp.dtype(out_dtype).itemsize)

    is_v7 = "v7" in _device_kind()
    out = pl.pallas_call(
        _projector_kernel,
        out_shape=jax.ShapeDtypeStruct((R_pad, GPT_DIM), out_dtype),
        grid_spec=pltpu.PrefetchScalarGridSpec(
            num_scalar_prefetch=0,
            grid=grid,
            in_specs=[
                pl.BlockSpec((tile_m, WENLAN_DIM), lambda i: (i, 0)),  # x rows
                resident((1, k2)),                                     # row_lo
                resident((1, k2)),                                     # row_hi
                resident((k2, HID_DIM)),                               # ct_w1 (hi/lo)
                resident((WENLAN_DIM, HID_DIM)),                       # w1
                resident((1, HID_DIM)),                                # b1
                resident((HID_DIM, GPT_DIM)),                          # w2
                resident((1, GPT_DIM)),                                # b2
            ],
            out_specs=pl.BlockSpec((tile_m, GPT_DIM), lambda i: (i, 0)),
        ),
        compiler_params=pltpu.CompilerParams(
            dimension_semantics=("parallel",),
            vmem_limit_bytes=None if is_v7 else 64 * 1024 * 1024),
        cost_estimate=pl.CostEstimate(
            flops=flops,
            transcendentals=R_pad * HID_DIM,
            bytes_accessed=bytes_accessed),
    )(x, row_lo, row_hi, ct_packed, w1, b1, w2, b2)
    return out[:R]


# ---------------------------------------------------------------------------
# GPT2_Decoder.forward (up to the gpt2(...) call)
# ---------------------------------------------------------------------------
def gpt2_decoder_forward(params, data_config, concat_output, input_ids,
                         topic_ids, tpw_att_mask, tpw_type_ids,
                         attention_mask=None, type_ids=None, is_train=False):
    emb_table = params["token_id2emb"]          # [VOCAB, 2048]  bf16
    w1, b1 = params["w1"], params["b1"]         # [2048,512] bf16, [1,512] f32
    w2, b2 = params["w2"], params["b2"]         # [512,768]  bf16, [1,768] f32

    B, seq_len, _ = concat_output.shape
    P = topic_ids.shape[1]
    L = input_ids.shape[1]
    sent_len = data_config["max_sent_length"] + 2
    two_sents_length = sent_len * 2
    T = P + L

    # labels (train branch) ---------------------------------------------------
    labels_train = jnp.concatenate([topic_ids, input_ids], axis=1)

    # wenlan embedding gather (bf16 table -> half the f32 HBM traffic) --------
    # TODO(synk): fuse this gather into the Pallas kernel (scalar-prefetched ids
    # + per-row DMA from the HBM table); cross-grid-step manual prefetch is not
    # megacore-safe with "parallel" semantics, so it stays in XLA for now.
    topic_wenlan = jnp.take(emb_table, topic_ids, axis=0)    # [B, P, 2048] bf16
    input_wenlan = jnp.take(emb_table, input_ids, axis=0)    # [B, L, 2048] bf16
    input_embs = jnp.concatenate([topic_wenlan, input_wenlan], axis=1)

    # concat_output folded through projector_layer1 ONCE (tiny [C, 512] table,
    # padded + split into bf16 hi/lo halves stacked along K).
    C = B * seq_len
    c_pad = max(8, _round_up(C, 8))
    ct_w1 = jnp.dot(concat_output.reshape(C, WENLAN_DIM), w1.astype(jnp.float32),
                    precision=jax.lax.Precision.HIGHEST)          # [C, 512] f32
    ct_w1 = jnp.pad(ct_w1, ((0, c_pad - C), (0, 0)))
    ct_hi = ct_w1.astype(jnp.bfloat16)
    ct_lo = (ct_w1 - ct_hi.astype(jnp.float32)).astype(jnp.bfloat16)
    ct_packed = jnp.concatenate([ct_hi, ct_lo], axis=0)           # [2*c_pad, 512]

    # Per concat row: the [start, end) range of flattened B*(P+L) rows it is
    # added to (topic rows / rows past seq_len*two_sents_length get no add;
    # padded concat rows get the empty range [0, 0)).  The vectors are
    # duplicated to match the hi/lo packing along K.
    # TODO(synk): for very large B*seq_len, window ct_packed per grid step via
    # scalar prefetch instead of keeping the whole table resident.
    b_idx = jnp.repeat(jnp.arange(B, dtype=jnp.int32), seq_len)
    r_idx = jnp.tile(jnp.arange(seq_len, dtype=jnp.int32), B)
    row_lo = b_idx * T + P + r_idx * two_sents_length
    row_hi = jnp.minimum(row_lo + two_sents_length, b_idx * T + P + L)
    row_lo = jnp.pad(row_lo, (0, c_pad - C))
    row_hi = jnp.pad(row_hi, (0, c_pad - C))
    row_lo = jnp.concatenate([row_lo, row_lo]).reshape(1, 2 * c_pad)
    row_hi = jnp.concatenate([row_hi, row_hi]).reshape(1, 2 * c_pad)

    # fused projector (Pallas hot path) ---------------------------------------
    gpt_input_embs = projector_pallas(
        input_embs.reshape(B * T, WENLAN_DIM),
        row_lo, row_hi, ct_packed, w1, b1, w2, b2,
    ).reshape(B, T, GPT_DIM)

    if is_train:
        out_type_ids = jnp.concatenate([tpw_type_ids, type_ids], axis=1)
        out_att_mask = jnp.concatenate([tpw_att_mask, attention_mask], axis=1)
        out_labels = labels_train
    else:
        # inference-branch type-id / attention-mask construction (vectorized
        # form of the python loops; depends only on row 0 of input_ids, as in
        # the original module).
        max_sent_num = data_config["max_seq_length"] // sent_len + 1
        type_ids_list = jnp.array(list(range(1, max_sent_num)) + [1], jnp.int32)
        pos = jnp.arange(L)
        is_boundary = ((pos + 1) % sent_len == 0) | ((pos + 1) % sent_len == 1)
        row0_zero = (input_ids[0] == 0)
        per_pos_type = jnp.where(
            is_boundary, 0,
            jnp.where(row0_zero, 0, type_ids_list[pos // sent_len])).astype(jnp.int32)
        out_type_ids = jnp.concatenate(
            [tpw_type_ids, jnp.broadcast_to(per_pos_type[None, :], (B, L))], axis=1)
        per_pos_att = jnp.where(row0_zero, 0, 1).astype(jnp.int32)
        out_att_mask = jnp.concatenate(
            [tpw_att_mask, jnp.broadcast_to(per_pos_att[None, :], (B, L))], axis=1)
        out_labels = jnp.zeros((B, T), jnp.int32)

    # TODO(synk): res = self.gpt2(inputs_embeds=gpt_input_embs, ...) — pretrained
    # GPT2LMHeadModel not reproducible in-script; return its would-be inputs.
    return {
        "gpt_input_embs": gpt_input_embs,
        "type_ids": out_type_ids,
        "attention_mask": out_att_mask,
        "labels": out_labels,
    }


# ---------------------------------------------------------------------------
# Deterministic parameter init (shapes from __init__); weights stored bf16.
# ---------------------------------------------------------------------------
def init_params(key, vocab_size):
    k0, k1, k2, k3, k4 = jax.random.split(key, 5)
    scale1 = 1.0 / jnp.sqrt(WENLAN_DIM)
    scale2 = 1.0 / jnp.sqrt(HID_DIM)
    return {
        # stand-in for token_id2emb_dict.pkl (bf16 to halve gather bandwidth)
        "token_id2emb": (jax.random.normal(k0, (vocab_size, WENLAN_DIM), jnp.float32)
                         * 0.02).astype(jnp.bfloat16),
        # nn.Linear(2048, 512): weight [512,2048] -> stored transposed [2048,512]
        "w1": jax.random.uniform(k1, (WENLAN_DIM, HID_DIM), jnp.float32,
                                 -scale1, scale1).astype(jnp.bfloat16),
        "b1": jax.random.uniform(k2, (1, HID_DIM), jnp.float32, -scale1, scale1),
        # nn.Linear(512, 768): stored transposed [512,768]
        "w2": jax.random.uniform(k3, (HID_DIM, GPT_DIM), jnp.float32,
                                 -scale2, scale2).astype(jnp.bfloat16),
        "b2": jax.random.uniform(k4, (1, GPT_DIM), jnp.float32, -scale2, scale2),
    }


if __name__ == "__main__":
    key = jax.random.PRNGKey(0)

    data_config = {
        "max_sent_length": 6,      # -> sent_len = 8, two_sents_length = 16
        "max_seq_length": 24,      # -> max_sent_num = 4
        "wenlan_emb_size": WENLAN_DIM,
    }

    B = 2
    seq_len = 2
    P = 4                                   # topic_prompt_length
    two_sents_length = (data_config["max_sent_length"] + 2) * 2
    L = seq_len * two_sents_length          # = seq_len * _sent_length * 2 = 32
    VOCAB = 32

    kp, kc, kt, ki = jax.random.split(key, 4)
    params = init_params(kp, VOCAB)

    concat_output = jax.random.normal(kc, (B, seq_len, WENLAN_DIM), jnp.float32)
    topic_ids = jax.random.randint(kt, (B, P), 1, VOCAB, jnp.int32)
    input_ids = jax.random.randint(ki, (B, L), 0, VOCAB, jnp.int32)
    tpw_att_mask = jnp.ones((B, P), jnp.int32)
    tpw_type_ids = jnp.zeros((B, P), jnp.int32)
    attention_mask = jnp.ones((B, L), jnp.int32)
    type_ids = jnp.ones((B, L), jnp.int32)

    fwd = jax.jit(functools.partial(gpt2_decoder_forward, params, data_config,
                                    is_train=False))
    res = fwd(concat_output, input_ids, topic_ids, tpw_att_mask, tpw_type_ids,
              attention_mask, type_ids)
    jax.block_until_ready(res)

    # reference projector in plain JAX (bf16-valued x / weights, f32 math,
    # mirroring the kernel's bf16 rounding of the hidden activations).
    emb_f32 = params["token_id2emb"].astype(jnp.float32)
    w1f = params["w1"].astype(jnp.float32)
    w2f = params["w2"].astype(jnp.float32)
    topic_w = jnp.take(emb_f32, topic_ids, axis=0)
    input_w = jnp.take(emb_f32, input_ids, axis=0) + \
        jnp.repeat(concat_output, two_sents_length, axis=1)
    x_tot = jnp.concatenate([topic_w, input_w], axis=1)
    h = jnp.tanh(jnp.einsum("btd,dh->bth", x_tot, w1f,
                            precision=jax.lax.Precision.HIGHEST) + params["b1"][0])
    h_b = h.astype(jnp.bfloat16).astype(jnp.float32)
    ref = jnp.einsum("bth,hg->btg", h_b, w2f,
                     precision=jax.lax.Precision.HIGHEST) + params["b2"][0]

    assert res["gpt_input_embs"].shape == (B, P + L, GPT_DIM)
    assert res["type_ids"].shape == (B, P + L)
    assert res["attention_mask"].shape == (B, P + L)
    assert bool(jnp.allclose(res["gpt_input_embs"], ref, atol=2e-2, rtol=2e-2))

    print("KERNEL_OK")
</pallas_src>

<mosaic_0001>
module attributes {stable_mosaic.version = 11 : i64} {
  func.func @_projector_kernel(%arg0: i32, %arg1: memref<72x2048xbf16, #tpu.memory_space<vmem>>, %arg2: memref<1x16xi32, #tpu.memory_space<vmem>>, %arg3: memref<1x16xi32, #tpu.memory_space<vmem>>, %arg4: memref<16x512xbf16, #tpu.memory_space<vmem>>, %arg5: memref<2048x512xbf16, #tpu.memory_space<vmem>>, %arg6: memref<1x512xf32, #tpu.memory_space<vmem>>, %arg7: memref<512x768xbf16, #tpu.memory_space<vmem>>, %arg8: memref<1x768xf32, #tpu.memory_space<vmem>>, %arg9: memref<72x768xf32, #tpu.memory_space<vmem>>) attributes {dimension_semantics = [#tpu.dimension_semantics<parallel>], iteration_bounds = array<i64: 1>, scalar_prefetch = 0 : i64, scratch_operands = 0 : i64, tpu.core_type = #tpu.core_type<tc>, window_params = [{transform_indices = @transform_0, window_bounds = array<i64: 72, 2048>}, {pipeline_mode = #tpu.pipeline_mode<synchronous>, transform_indices = @transform_1, window_bounds = array<i64: 1, 16>}, {pipeline_mode = #tpu.pipeline_mode<synchronous>, transform_indices = @transform_2, window_bounds = array<i64: 1, 16>}, {pipeline_mode = #tpu.pipeline_mode<synchronous>, transform_indices = @transform_3, window_bounds = array<i64: 16, 512>}, {pipeline_mode = #tpu.pipeline_mode<synchronous>, transform_indices = @transform_4, window_bounds = array<i64: 2048, 512>}, {pipeline_mode = #tpu.pipeline_mode<synchronous>, transform_indices = @transform_5, window_bounds = array<i64: 1, 512>}, {pipeline_mode = #tpu.pipeline_mode<synchronous>, transform_indices = @transform_6, window_bounds = array<i64: 512, 768>}, {pipeline_mode = #tpu.pipeline_mode<synchronous>, transform_indices = @transform_7, window_bounds = array<i64: 1, 768>}, {transform_indices = @transform_8, window_bounds = array<i64: 72, 768>}]} {
    %0 = tpu.iota {dimensions = array<i32: 0>} : vector<72x16xi32>
    %c72_i32 = arith.constant 72 : i32
    %1 = arith.muli %arg0, %c72_i32 : i32
    %2 = vector.broadcast %1 : i32 to vector<72x16xi32>
    %3 = arith.addi %0, %2 : vector<72x16xi32>
    %c0 = arith.constant 0 : index
    %c0_0 = arith.constant 0 : index
    %4 = vector.load %arg2[%c0, %c0_0] : memref<1x16xi32, #tpu.memory_space<vmem>>, vector<1x16xi32>
    %5 = vector.broadcast %4 : vector<1x16xi32> to vector<72x16xi32>
    %6 = arith.cmpi sge, %3, %5 : vector<72x16xi32>
    %c0_1 = arith.constant 0 : index
    %c0_2 = arith.constant 0 : index
    %7 = vector.load %arg3[%c0_1, %c0_2] : memref<1x16xi32, #tpu.memory_space<vmem>>, vector<1x16xi32>
    %8 = vector.broadcast %7 : vector<1x16xi32> to vector<72x16xi32>
    %9 = arith.cmpi slt, %3, %8 : vector<72x16xi32>
    %10 = arith.andi %6, %9 : vector<72x16xi1>
    %cst = arith.constant 1.000000e+00 : f32
    %cst_3 = arith.constant 0.000000e+00 : f32
    %11 = vector.broadcast %cst : f32 to vector<72x16xf32>
    %12 = vector.broadcast %cst_3 : f32 to vector<72x16xf32>
    %13 = arith.select %10, %11, %12 : vector<72x16xi1>, vector<72x16xf32>
    %14 = arith.truncf %13 : vector<72x16xf32> to vector<72x16xbf16>
    %c0_4 = arith.constant 0 : index
    %c0_5 = arith.constant 0 : index
    %15 = vector.load %arg4[%c0_4, %c0_5] : memref<16x512xbf16, #tpu.memory_space<vmem>>, vector<16x512xbf16>
    %cst_6 = arith.constant dense<0.000000e+00> : vector<72x512xf32>
    %16 = tpu.matmul %14, %15, %cst_6 {dimension_numbers = #tpu.dot_dimension_numbers<[1], [0], [0], [1], [0, 0, 1, 1], [], []>} : vector<72x16xbf16>, vector<16x512xbf16>, vector<72x512xf32> -> vector<72x512xf32>
    %c0_7 = arith.constant 0 : index
    %c0_8 = arith.constant 0 : index
    %17 = vector.load %arg1[%c0_7, %c0_8] : memref<72x2048xbf16, #tpu.memory_space<vmem>>, vector<72x2048xbf16>
    %c0_9 = arith.constant 0 : index
    %c0_10 = arith.constant 0 : index
    %18 = vector.load %arg5[%c0_9, %c0_10] : memref<2048x512xbf16, #tpu.memory_space<vmem>>, vector<2048x512xbf16>
    %cst_11 = arith.constant dense<0.000000e+00> : vector<72x512xf32>
    %19 = tpu.matmul %17, %18, %cst_11 {dimension_numbers = #tpu.dot_dimension_numbers<[1], [0], [0], [1], [0, 0, 1, 1], [], []>} : vector<72x2048xbf16>, vector<2048x512xbf16>, vector<72x512xf32> -> vector<72x512xf32>
    %20 = arith.addf %19, %16 : vector<72x512xf32>
    %c0_12 = arith.constant 0 : index
    %c0_13 = arith.constant 0 : index
    %21 = vector.load %arg6[%c0_12, %c0_13] : memref<1x512xf32, #tpu.memory_space<vmem>>, vector<1x512xf32>
    %22 = vector.broadcast %21 : vector<1x512xf32> to vector<72x512xf32>
    %23 = arith.addf %20, %22 : vector<72x512xf32>
    %24 = math.tanh %23 : vector<72x512xf32>
    %25 = arith.truncf %24 : vector<72x512xf32> to vector<72x512xbf16>
    %c0_14 = arith.constant 0 : index
    %c0_15 = arith.constant 0 : index
    %26 = vector.load %arg7[%c0_14, %c0_15] : memref<512x768xbf16, #tpu.memory_space<vmem>>, vector<512x768xbf16>
    %cst_16 = arith.constant dense<0.000000e+00> : vector<72x768xf32>
    %27 = tpu.matmul %25, %26, %cst_16 {dimension_numbers = #tpu.dot_dimension_numbers<[1], [0], [0], [1], [0, 0, 1, 1], [], []>} : vector<72x512xbf16>, vector<512x768xbf16>, vector<72x768xf32> -> vector<72x768xf32>
    %c0_17 = arith.constant 0 : index
    %c0_18 = arith.constant 0 : index
    %28 = vector.load %arg8[%c0_17, %c0_18] : memref<1x768xf32, #tpu.memory_space<vmem>>, vector<1x768xf32>
    %29 = vector.broadcast %28 : vector<1x768xf32> to vector<72x768xf32>
    %30 = arith.addf %27, %29 : vector<72x768xf32>
    %c0_19 = arith.constant 0 : index
    %c0_20 = arith.constant 0 : index
    %31 = vector.load %arg9[%c0_19, %c0_20] : memref<72x768xf32, #tpu.memory_space<vmem>>, vector<72x768xf32>
    tpu.vector_store %arg9[%c0_19, %c0_20], %30 {strides = array<i32>} : memref<72x768xf32, #tpu.memory_space<vmem>>, vector<72x768xf32>,
    return
  }
  func.func @transform_0(%arg0: i32) -> (i32, i32) {
    %c0_i32 = arith.constant 0 : i32
    %c0_i32_0 = arith.constant 0 : i32
    return %arg0, %c0_i32 : i32, i32
  }
  func.func @transform_1(%arg0: i32) -> (i32, i32) {
    %c0_i32 = arith.constant 0 : i32
    %c0_i32_0 = arith.constant 0 : i32
    %c0_i32_1 = arith.constant 0 : i32
    return %c0_i32, %c0_i32_0 : i32, i32
  }
  func.func @transform_2(%arg0: i32) -> (i32, i32) {
    %c0_i32 = arith.constant 0 : i32
    %c0_i32_0 = arith.constant 0 : i32
    %c0_i32_1 = arith.constant 0 : i32
    return %c0_i32, %c0_i32_0 : i32, i32
  }
  func.func @transform_3(%arg0: i32) -> (i32, i32) {
    %c0_i32 = arith.constant 0 : i32
    %c0_i32_0 = arith.constant 0 : i32
    %c0_i32_1 = arith.constant 0 : i32
    return %c0_i32, %c0_i32_0 : i32, i32
  }
  func.func @transform_4(%arg0: i32) -> (i32, i32) {
    %c0_i32 = arith.constant 0 : i32
    %c0_i32_0 = arith.constant 0 : i32
    %c0_i32_1 = arith.constant 0 : i32
    return %c0_i32, %c0_i32_0 : i32, i32
  }
  func.func @transform_5(%arg0: i32) -> (i32, i32) {
    %c0_i32 = arith.constant 0 : i32
    %c0_i32_0 = arith.constant 0 : i32
    %c0_i32_1 = arith.constant 0 : i32
    return %c0_i32, %c0_i32_0 : i32, i32
  }
  func.func @transform_6(%arg0: i32) -> (i32, i32) {
    %c0_i32 = arith.constant 0 : i32
    %c0_i32_0 = arith.constant 0 : i32
    %c0_i32_1 = arith.constant 0 : i32
    return %c0_i32, %c0_i32_0 : i32, i32
  }
  func.func @transform_7(%arg0: i32) -> (i32, i32) {
    %c0_i32 = arith.constant 0 : i32
    %c0_i32_0 = arith.constant 0 : i32
    %c0_i32_1 = arith.constant 0 : i32
    return %c0_i32, %c0_i32_0 : i32, i32
  }
  func.func @transform_8(%arg0: i32) -> (i32, i32) {
    %c0_i32 = arith.constant 0 : i32
    %c0_i32_0 = arith.constant 0 : i32
    return %arg0, %c0_i32 : i32, i32
  }
}

</mosaic_0001>

<bundles_post_ra>
// kernel: gpt2_decoder_forward.1
= control target key start
LH: loop header
LB: loop body
LE: loop exit
PB: predicated region body
PF: predicated region fallthrough
CT: control target
= control target key end

     0   :  { %13 = vsyncpa [#allocation3], 0  ;;  %s10670_s0 = inlined_call_operand.hbm [shape: bf16[72,2048], index: 0, kind: input, shape index: {}]   ;;  %s10671_s1 = inlined_call_operand.hbm [shape: s32[1,16], index: 1, kind: input, shape index: {}]   ;;  %s10672_s2 = inlined_call_operand.hbm [shape: s32[1,16], index: 2, kind: input, shape index: {}]   ;;  %s10673_s3 = inlined_call_operand.hbm [shape: bf16[16,512], index: 3, kind: input, shape index: {}]   ;;  %s10674_s4 = inlined_call_operand.hbm [shape: bf16[2048,512], index: 4, kind: input, shape index: {}]   ;;  %s10675_s5 = inlined_call_operand.hbm [shape: f32[1,512], index: 5, kind: input, shape index: {}]   ;;  %s10676_s6 = inlined_call_operand.hbm [shape: bf16[512,768], index: 6, kind: input, shape index: {}]   ;;  %s10677_s7 = inlined_call_operand.hbm [shape: f32[1,768], index: 7, kind: input, shape index: {}]   ;;  %s10678_s8 = inlined_call_operand.hbm [shape: f32[72,768], index: 8, kind: output, shape index: {}]  }
   0x1   :  { %14 = vsyncpa [#allocation6], 0 }
   0x2   :  { %15 = vsyncpa [#allocation9], 0 }
   0x3   :  { %16 = vsyncpa [#allocation12], 0 }
   0x4   :  { %17 = vsyncpa [#allocation15], 0 }
   0x5   :  { %18 = vsyncpa [#allocation4], 0  ;;  %s9630_s27 = smov [#allocation5]   ;;  %s9631_s29 = smov [#allocation8]  }
   0x6   :  { %s37_s28 = sshll.u32 %s9630_s27, 4  ;;  %s56_s30 = sshll.u32 %s9631_s29, 4  ;;  %s38_s28 = int_to_ptr.vmem [resolvable:$true] %s37_s28  ;;  %s9694_s30 = int_to_ptr.vmem [resolvable:$true] %s56_s30 }
   0x7   :  { %s9420_s11 = scalar_lea.hbm %s10671_s1, 16 }
   0x8   :  { %p9421_p0 = scmp.ne.s32.totalorder %s10671_s1, %s9420_s11  ;;  %p9424_p1 = scmp.lt.u32.totalorder %s9420_s11, %s10671_s1 }
   0xa   :  { %p9426_p2 = pnand %p9424_p1, %p9421_p0 }
   0xc   :  { %9429 = shalt.err (!%p9426_p2)
}
   0xd   :  { %s9430_s16 = scalar_lea.vmem %s38_s28, 16  ;;  %s9434_s17 = scalar_lea.vmem %s38_s28, 32 }
   0xe   :  { %p9431_p3 = scmp.ne.s32.totalorder %s38_s28, %s9430_s16  ;;  %p9435_p4 = scmp.lt.s32.totalorder %s38_s28, %s38_s28 }
   0xf   :  { %p9436_p5 = scmp.lt.s32.totalorder %s9434_s17, %s9430_s16 }
  0x11   :  { %p9437_p6 = por %p9436_p5, %p9435_p4 }
  0x13   :  { %p9438_p7 = pnand %p9437_p6, %p9431_p3 }
  0x15   :  { %9441 = shalt.err (!%p9438_p7)
}
  0x16   :  { %40 = dma.hbm_to_vmem [thread:$0]  %s10671_s1, 16, %s38_s28, [#allocation6]  }
  0x17   :  { %s9442_s22 = scalar_lea.hbm %s10673_s3, 512 }
  0x18   :  { %p9443_p8 = scmp.ne.s32.totalorder %s10673_s3, %s9442_s22  ;;  %p9446_p9 = scmp.lt.u32.totalorder %s9442_s22, %s10673_s3 }
  0x1a   :  { %p9448_p10 = pnand %p9446_p9, %p9443_p8 }
  0x1c   :  { %9451 = shalt.err (!%p9448_p10)
}
  0x1d   :  { %s9452_s27 = scalar_lea.vmem %s9694_s30, 512  ;;  %p9457_p12 = scmp.lt.s32.totalorder %s9694_s30, %s9694_s30 }
  0x1e   :  { %p9453_p11 = scmp.ne.s32.totalorder %s9694_s30, %s9452_s27  ;;  %p9458_p13 = scmp.lt.s32.totalorder %s9452_s27, %s9452_s27 }
  0x20   :  { %p9459_p0 = por %p9458_p13, %p9457_p12 }
  0x22   :  { %p9460_p1 = pnand %p9459_p0, %p9453_p11 }
  0x24   :  { %9463 = shalt.err (!%p9460_p1)
}
  0x25   :  { %s9632_s1 = smov 256   ;;  %s9633_s28 = smov 16  }
  0x26   :  { %62 = dma.hbm_to_vmem [thread:$0]  %s10673_s3, 512, %s9694_s30, [#allocation9], %s9632_s1, %s9632_s1, %s9633_s28  }
  0x27   :  { %s9634_s10 = smov [#allocation11]   ;;  %s9635_s12 = smov [#allocation2]  }
  0x28   :  { %s81_s11 = sshll.u32 %s9634_s10, 4  ;;  %s24_s13 = sshll.u32 %s9635_s12, 4  ;;  %s82_s11 = int_to_ptr.vmem [resolvable:$true] %s81_s11  ;;  %s9728_s13 = int_to_ptr.vmem [resolvable:$true] %s24_s13 }
  0x29   :  { %s9464_s16 = scalar_lea.hbm %s10675_s5, 64 }
  0x2a   :  { %p9465_p2 = scmp.ne.s32.totalorder %s10675_s5, %s9464_s16  ;;  %p9468_p3 = scmp.lt.u32.totalorder %s9464_s16, %s10675_s5 }
  0x2c   :  { %p9470_p4 = pnand %p9468_p3, %p9465_p2 }
  0x2e   :  { %9473 = shalt.err (!%p9470_p4)
}
  0x2f   :  { %s9474_s3 = scalar_lea.vmem %s82_s11, 64  ;;  %p9479_p6 = scmp.lt.s32.totalorder %s82_s11, %s82_s11 }
  0x30   :  { %p9475_p5 = scmp.ne.s32.totalorder %s82_s11, %s9474_s3  ;;  %p9480_p7 = scmp.lt.s32.totalorder %s9474_s3, %s9474_s3 }
  0x32   :  { %p9481_p8 = por %p9480_p7, %p9479_p6 }
  0x34   :  { %p9482_p9 = pnand %p9481_p8, %p9475_p5 }
  0x36   :  { %9485 = shalt.err (!%p9482_p9)
}
  0x37   :  { %84 = dma.hbm_to_vmem [thread:$0]  %s10675_s5, 64, %s82_s11, [#allocation12]  }
  0x38   :  { %s9486_s24 = scalar_lea.hbm %s10670_s0, 9216 }
  0x39   :  { %p9487_p10 = scmp.ne.s32.totalorder %s10670_s0, %s9486_s24  ;;  %p9490_p11 = scmp.lt.u32.totalorder %s9486_s24, %s10670_s0 }
  0x3b   :  { %p9492_p12 = pnand %p9490_p11, %p9487_p10 }
  0x3d   :  { %9495 = shalt.err (!%p9492_p12)
}
  0x3e   :  { %s9496_s9 = scalar_lea.vmem %s9728_s13, 9216  ;;  %p9501_p0 = scmp.lt.s32.totalorder %s9728_s13, %s9728_s13 }
  0x3f   :  { %p9497_p13 = scmp.ne.s32.totalorder %s9728_s13, %s9496_s9  ;;  %p9502_p1 = scmp.lt.s32.totalorder %s9496_s9, %s9496_s9 }
  0x41   :  { %p9503_p2 = por %p9502_p1, %p9501_p0 }
  0x43   :  { %p9504_p3 = pnand %p9503_p2, %p9497_p13 }
  0x45   :  { %9507 = shalt.err (!%p9504_p3)
}
  0x46   :  { %s9636_s5 = smov 1024   ;;  %s9637_s10 = smov 64  }
  0x47   :  { %30 = dma.hbm_to_vmem [thread:$0]  %s10670_s0, 9216, %s9728_s13, [#allocation3], %s9636_s5, %s9636_s5, %s9637_s10  }
  0x48   :  { %s9638_s14 = smov [#allocation7]   ;;  %s9639_s16 = smov [#allocation10]  }
  0x49   :  { %s47_s15 = sshll.u32 %s9638_s14, 4  ;;  %s68_s17 = sshll.u32 %s9639_s16, 4  ;;  %s48_s15 = int_to_ptr.vmem [resolvable:$true] %s47_s15  ;;  %s9759_s17 = int_to_ptr.vmem [resolvable:$true] %s68_s17 }
  0x4a   :  { %s9508_s20 = scalar_lea.hbm %s10672_s2, 16 }
  0x4b   :  { %p9509_p4 = scmp.ne.s32.totalorder %s10672_s2, %s9508_s20  ;;  %p9512_p5 = scmp.lt.u32.totalorder %s9508_s20, %s10672_s2 }
  0x4d   :  { %p9514_p6 = pnand %p9512_p5, %p9509_p4 }
  0x4f   :  { %9517 = shalt.err (!%p9514_p6)
}
  0x50   :  { %s9518_s0 = scalar_lea.vmem %s48_s15, 16  ;;  %s9522_s13 = scalar_lea.vmem %s48_s15, 32 }
  0x51   :  { %p9519_p7 = scmp.ne.s32.totalorder %s48_s15, %s9518_s0  ;;  %p9523_p8 = scmp.lt.s32.totalorder %s48_s15, %s48_s15 }
  0x52   :  { %p9524_p9 = scmp.lt.s32.totalorder %s9522_s13, %s9518_s0 }
  0x54   :  { %p9525_p10 = por %p9524_p9, %p9523_p8 }
  0x56   :  { %p9526_p11 = pnand %p9525_p10, %p9519_p7 }
  0x58   :  { %9529 = shalt.err (!%p9526_p11)
}
  0x59   :  { %50 = dma.hbm_to_vmem [thread:$0]  %s10672_s2, 16, %s48_s15, [#allocation6]  }
  0x5a   :  { %s9530_s27 = scalar_lea.hbm %s10674_s4, 65536 }
  0x5b   :  { %p9531_p12 = scmp.ne.s32.totalorder %s10674_s4, %s9530_s27  ;;  %p9534_p13 = scmp.lt.u32.totalorder %s9530_s27, %s10674_s4 }
  0x5d   :  { %p9536_p0 = pnand %p9534_p13, %p9531_p12 }
  0x5f   :  { %9539 = shalt.err (!%p9536_p0)
}
  0x60   :  { %s9540_s11 = scalar_lea.vmem %s9759_s17, 65536  ;;  %p9545_p2 = scmp.lt.s32.totalorder %s9759_s17, %s9759_s17 }
  0x61   :  { %p9541_p1 = scmp.ne.s32.totalorder %s9759_s17, %s9540_s11  ;;  %p9546_p3 = scmp.lt.s32.totalorder %s9540_s11, %s9540_s11 }
  0x63   :  { %p9547_p4 = por %p9546_p3, %p9545_p2 }
  0x65   :  { %p9548_p5 = pnand %p9547_p4, %p9541_p1 }
  0x67   :  { %9551 = shalt.err (!%p9548_p5)
}
  0x68   :  { %74 = dma.hbm_to_vmem [thread:$0]  %s10674_s4, 65536, %s9759_s17, [#allocation9], %s9632_s1, %s9632_s1, %s9633_s28  }
  0x69   :  { %s9640_s14 = smov [#allocation13]   ;;  %s9552_s19 = scalar_lea.hbm %s10676_s6, 24576 }
  0x6a   :  { %s90_s15 = sshll.u32 %s9640_s14, 4  ;;  %p9553_p6 = scmp.ne.s32.totalorder %s10676_s6, %s9552_s19  ;;  %s91_s15 = int_to_ptr.vmem [resolvable:$true] %s90_s15 }
  0x6b   :  { %p9556_p7 = scmp.lt.u32.totalorder %s9552_s19, %s10676_s6 }
  0x6d   :  { %p9558_p8 = pnand %p9556_p7, %p9553_p6 }
  0x6f   :  { %9561 = shalt.err (!%p9558_p8)
}
  0x70   :  { %s9562_s22 = scalar_lea.vmem %s91_s15, 24576  ;;  %p9567_p10 = scmp.lt.s32.totalorder %s91_s15, %s91_s15 }
  0x71   :  { %p9563_p9 = scmp.ne.s32.totalorder %s91_s15, %s9562_s22  ;;  %p9568_p11 = scmp.lt.s32.totalorder %s9562_s22, %s9562_s22 }
  0x73   :  { %p9569_p12 = por %p9568_p11, %p9567_p10 }
  0x75   :  { %p9570_p13 = pnand %p9569_p12, %p9563_p9 }
  0x77   :  { %9573 = shalt.err (!%p9570_p13)
}
  0x78   :  { %s9641_s4 = smov 384   ;;  %s9642_s1 = smov 24  }
  0x79   :  { %96 = dma.hbm_to_vmem [thread:$0]  %s10676_s6, 24576, %s91_s15, [#allocation12], %s9641_s4, %s9641_s4, %s9642_s1  }
  0x7a   :  { %s9643_s0 = smov [#allocation14]   ;;  %s9574_s25 = scalar_lea.hbm %s10677_s7, 96 }
  0x7b   :  { %s103_s13 = sshll.u32 %s9643_s0, 4  ;;  %p9575_p0 = scmp.ne.s32.totalorder %s10677_s7, %s9574_s25  ;;  %s104_s13 = int_to_ptr.vmem [resolvable:$true] %s103_s13 }
  0x7c   :  { %p9578_p1 = scmp.lt.u32.totalorder %s9574_s25, %s10677_s7 }
  0x7e   :  { %p9580_p2 = pnand %p9578_p1, %p9575_p0 }
  0x80   :  { %9583 = shalt.err (!%p9580_p2)
}
  0x81   :  { %s9584_s5 = scalar_lea.vmem %s104_s13, 96  ;;  %p9589_p4 = scmp.lt.s32.totalorder %s104_s13, %s104_s13 }
  0x82   :  { %p9585_p3 = scmp.ne.s32.totalorder %s104_s13, %s9584_s5  ;;  %p9590_p5 = scmp.lt.s32.totalorder %s9584_s5, %s9584_s5 }
  0x84   :  { %p9591_p6 = por %p9590_p5, %p9589_p4 }
  0x86   :  { %p9592_p7 = pnand %p9591_p6, %p9585_p3 }
  0x88   :  { %9595 = shalt.err (!%p9592_p7)
}
  0x89   :  { %106 = dma.hbm_to_vmem [thread:$0]  %s10677_s7, 96, %s104_s13, [#allocation15]  }
  0x8a   :  { %9618 = dma.done.wait [#allocation3], 9216  }
  0x8b   :  { %9619 = vsyncadd [#allocation3], 4294958080 }
  0x8c   :  { %9620 = dma.done.wait [#allocation6], 32  }
  0x8d   :  { %9621 = vsyncadd [#allocation6], 4294967264 }
  0x8e   :  { %9622 = dma.done.wait [#allocation9], 66048  }
  0x8f   :  { %9623 = vsyncadd [#allocation9], 4294901248 }
  0x90   :  { %9624 = dma.done.wait [#allocation12], 24640  }
  0x91   :  { %9625 = vsyncadd [#allocation12], 4294942656 }
  0x92   :  { %9626 = dma.done.wait [#allocation15], 96  }
  0x93   :  { %9627 = vsyncadd [#allocation15], 4294967200  ;;  %v9644_v0 = vmov 0   ;;  %v132_v1 = vlaneseq  ;;  %v8270_v3 = vld [vmem:[#allocation8 + $0x4] ss:$16 sps:$4 sm:$0xff]   ;;  %v9645_v13 = vmov 0.0  }
  0x94   :  { %276 = vmatprep.mubr.bf16.mxu0 %v9644_v0  ;;  %357 = vmatprep.mubr.bf16.mxu1 %v9644_v0  ;;  %v8272_v4 = vld [vmem:[#allocation8 + $0xc] ss:$16 sps:$4 sm:$0xff]   ;;  %v8274_v5 = vld [vmem:[#allocation8] ss:$16 sps:$4 sm:$0xff]   ;;  %v8275_v6 = vld [vmem:[#allocation8 + $0x8] ss:$16 sps:$4 sm:$0xff]  }
  0x95   :  { %v9819_v2 = vshrl.u32 %v132_v1, 7  ;;  %244 = vmatprep.subr.bf16.mxu0 %v8270_v3  ;;  %325 = vmatprep.subr.bf16.mxu1 %v8272_v4  ;;  %v8278_v8 = vld [vmem:[#allocation10 + $0x4] ss:$16 sps:$4 sm:$0xff]   ;;  %v9822_v10 = vld [vmem:[#allocation5] ss:$0 sm:$0xff]  ;;  %vm228_vm6 = vcmask 130048  }
  0x96   :  { %245 = vmatpush1.bf16.msra.mxu0 %v8274_v5  ;;  %326 = vmatpush1.bf16.msra.mxu1 %v8275_v6  ;;  %v8281_v9 = vld [vmem:[#allocation10 + $0x204] ss:$16 sps:$4 sm:$0xff]   ;;  %v9824_v11 = vld [vmem:[#allocation7] ss:$0 sm:$0xff]  ;;  %v8276_v12 = vld [vmem:[#allocation10] ss:$16 sps:$4 sm:$0xff]  }
  0x97   :  { %v134_v7 = vadd.s32 8, %v9819_v2  ;;  %3926 = vmatprep.subr.bf16.mxu1 %v8278_v8  ;;  %vm158_vm0 = vcmp.ge.s32.totalorder %v9819_v2, %v9822_v10  ;;  %vm172_vm2 = vcmp.lt.s32.totalorder %v9819_v2, %v9824_v11  ;;  %4007 = vmatprep.subr.bf16.mxu0 %v8281_v9  ;;  %v8279_v15 = vld [vmem:[#allocation10 + $0x200] ss:$16 sps:$4 sm:$0xff]   ;;  %v8284_v18 = vld [vmem:[#allocation10 + $0x24] ss:$16 sps:$4 sm:$0xff]   ;;  %v135_v28 = vadd.s32 16, %v9819_v2 }
  0x98   :  { %vm181_vm4 = vmand %vm158_vm0, %vm172_vm2  ;;  %v8287_v19 = vld [vmem:[#allocation10 + $0x224] ss:$16 sps:$4 sm:$0xff]   ;;  %v8282_v20 = vld [vmem:[#allocation10 + $0x20] ss:$16 sps:$4 sm:$0xff]   ;;  %v136_v29 = vadd.s32 24, %v9819_v2  ;;  %v137_v36 = vadd.s32 32, %v9819_v2 }
  0x99   :  { %vm159_vm1 = vcmp.ge.s32.totalorder %v134_v7, %v9822_v10  ;;  %vm173_vm3 = vcmp.lt.s32.totalorder %v134_v7, %v9824_v11  ;;  %v190_v14 = vsel %vm181_vm4, 1.0, %v9645_v13  ;;  %v8285_v21 = vld [vmem:[#allocation10 + $0x220] ss:$16 sps:$4 sm:$0xff]   ;;  %v8290_v22 = vld [vmem:[#allocation10 + $0x44] ss:$16 sps:$4 sm:$0xff]   ;;  %vm160_vm7 = vcmp.ge.s32.totalorder %v135_v28, %v9822_v10  ;;  %s9646_s7 = smov [#allocation16]  }
  0x9a   :  { %vm182_vm5 = vmand %vm159_vm1, %vm173_vm3  ;;  %v8293_v23 = vld [vmem:[#allocation10 + $0x244] ss:$16 sps:$4 sm:$0xff]   ;;  %v8288_v24 = vld [vmem:[#allocation10 + $0x40] ss:$16 sps:$4 sm:$0xff]   ;;  %vm174_vm8 = vcmp.lt.s32.totalorder %v135_v28, %v9824_v11  ;;  %vm161_vm9 = vcmp.ge.s32.totalorder %v136_v29, %v9822_v10  ;;  %vm175_vm10 = vcmp.lt.s32.totalorder %v136_v29, %v9824_v11  ;;  %v138_v38 = vadd.s32 40, %v9819_v2  ;;  %s7065_s11 = sshll.u32 %s9646_s7, 4  ;;  %s7066_s11 = int_to_ptr.vmem [resolvable:$true] %s7065_s11 }
  0x9b   :  { %v191_v16 = vsel %vm182_vm5, 1.0, %v9645_v13  ;;  %v8291_v25 = vld [vmem:[#allocation10 + $0x240] ss:$16 sps:$4 sm:$0xff]   ;;  %v8296_v26 = vld [vmem:[#allocation10 + $0x64] ss:$16 sps:$4 sm:$0xff]   ;;  %vm183_vm11 = vmand %vm160_vm7, %vm174_vm8  ;;  %vm162_vm13 = vcmp.ge.s32.totalorder %v137_v36, %v9822_v10  ;;  %vm176_vm14 = vcmp.lt.s32.totalorder %v137_v36, %v9824_v11  ;;  %v139_v47 = vadd.s32 48, %v9819_v2  ;;  %p9601_p9 = scmp.lt.s32.totalorder %s7066_s11, %s7066_s11 }
  0x9c   :  { %v199_v17 = vpack.c.bf16 %v191_v16, %v190_v14  ;;  %v8299_v27 = vld [vmem:[#allocation10 + $0x264] ss:$16 sps:$4 sm:$0xff]   ;;  %v8294_v30 = vld [vmem:[#allocation10 + $0x60] ss:$16 sps:$4 sm:$0xff]   ;;  %vm184_vm12 = vmand %vm161_vm9, %vm175_vm10  ;;  %v192_v40 = vsel %vm183_vm11, 1.0, %v9645_v13  ;;  %vm163_vm15 = vcmp.ge.s32.totalorder %v138_v38, %v9822_v10  ;;  %vm177_vm0 = vcmp.lt.s32.totalorder %v138_v38, %v9824_v11  ;;  %s9596_s2 = scalar_lea.vmem %s7066_s11, 6912 }
  0x9d   :  { %v8297_v31 = vld [vmem:[#allocation10 + $0x260] ss:$16 sps:$4 sm:$0xff]   ;;  %v8302_v32 = vld [vmem:[#allocation10 + $0x84] ss:$16 sps:$4 sm:$0xff]   ;;  %v193_v41 = vsel %vm184_vm12, 1.0, %v9645_v13  ;;  %vm185_vm1 = vmand %vm162_vm13, %vm176_vm14  ;;  %v140_v48 = vadd.s32 56, %v9819_v2  ;;  %vm164_vm3 = vcmp.ge.s32.totalorder %v139_v47, %v9822_v10  ;;  %vm178_vm4 = vcmp.lt.s32.totalorder %v139_v47, %v9824_v11  ;;  %p9597_p8 = scmp.ne.s32.totalorder %s7066_s11, %s9596_s2  ;;  %p9602_p10 = scmp.lt.s32.totalorder %s9596_s2, %s9596_s2 }
  0x9e   :  { %7087 = vmatmul.mubr.msk.bf16.vlgmr.msra.gmra.mrb[0].mxu0 %vm228_vm6, %v199_v17  ;;  %7092 = vmatmul.mubr.msk.bf16.vlgmr.msra.gmra.mrb[0].mxu1 %vm228_vm6, %v199_v17  ;;  %v8305_v33 = vld [vmem:[#allocation10 + $0x284] ss:$16 sps:$4 sm:$0xff]   ;;  %v8300_v34 = vld [vmem:[#allocation10 + $0x80] ss:$16 sps:$4 sm:$0xff]   ;;  %v200_v43 = vpack.c.bf16 %v193_v41, %v192_v40  ;;  %vm186_vm2 = vmand %vm163_vm15, %vm177_vm0  ;;  %v194_v50 = vsel %vm185_vm1, 1.0, %v9645_v13  ;;  %v141_v60 = vadd.s32 64, %v9819_v2 }
  0x9f   :  { %3927 = vmatpush1.bf16.msra.mxu1 %v8276_v12  ;;  %4008 = vmatpush1.bf16.msra.mxu0 %v8279_v15  ;;  %v8303_v35 = vld [vmem:[#allocation10 + $0x280] ss:$16 sps:$4 sm:$0xff]   ;;  %v8308_v37 = vld [vmem:[#allocation10 + $0xa4] ss:$16 sps:$4 sm:$0xff]   ;;  %v195_v52 = vsel %vm186_vm2, 1.0, %v9645_v13  ;;  %vm165_vm5 = vcmp.ge.s32.totalorder %v140_v48, %v9822_v10  ;;  %vm179_vm7 = vcmp.lt.s32.totalorder %v140_v48, %v9824_v11  ;;  %vm187_vm8 = vmand %vm164_vm3, %vm178_vm4  ;;  %p9603_p11 = por %p9602_p10, %p9601_p9 }
  0xa0   :  { %3928 = vmatprep.subr.bf16.mxu1 %v8284_v18  ;;  %4009 = vmatprep.subr.bf16.mxu0 %v8287_v19  ;;  %v8311_v39 = vld [vmem:[#allocation10 + $0x2a4] ss:$16 sps:$4 sm:$0xff]   ;;  %v8306_v42 = vld [vmem:[#allocation10 + $0xa0] ss:$16 sps:$4 sm:$0xff]   ;;  %v201_v56 = vpack.c.bf16 %v195_v52, %v194_v50  ;;  %vm188_vm9 = vmand %vm165_vm5, %vm179_vm7  ;;  %v196_v62 = vsel %vm187_vm8, 1.0, %v9645_v13  ;;  %vm166_vm10 = vcmp.ge.s32.totalorder %v141_v60, %v9822_v10  ;;  %vm180_vm11 = vcmp.lt.s32.totalorder %v141_v60, %v9824_v11 }
  0xa1   :  { %367 = vmatprep.mubr.bf16.mxu1 %v9644_v0  ;;  %286 = vmatprep.mubr.bf16.mxu0 %v9644_v0  ;;  %v8309_v44 = vld [vmem:[#allocation10 + $0x2a0] ss:$16 sps:$4 sm:$0xff]   ;;  %v8314_v45 = vld [vmem:[#allocation10 + $0xc4] ss:$16 sps:$4 sm:$0xff]   ;;  %v197_v63 = vsel %vm188_vm9, 1.0, %v9645_v13  ;;  %vm189_vm12 = vmand %vm166_vm10, %vm180_vm11  ;;  %p9604_p12 = pnand %p9603_p11, %p9597_p8 }
  0xa2   :  { %v8317_v46 = vld [vmem:[#allocation10 + $0x2c4] ss:$16 sps:$4 sm:$0xff]   ;;  %v8312_v49 = vld [vmem:[#allocation10 + $0xc0] ss:$16 sps:$4 sm:$0xff]   ;;  %v202_v6 = vpack.c.bf16 %v197_v63, %v196_v62  ;;  %v198_v11 = vsel %vm189_vm12, 1.0, %v9645_v13 }
  0xa3   :  { %3929 = vmatpush1.bf16.msra.mxu1 %v8282_v20  ;;  %4010 = vmatpush1.bf16.msra.mxu0 %v8285_v21  ;;  %v8315_v51 = vld [vmem:[#allocation10 + $0x2c0] ss:$16 sps:$4 sm:$0xff]   ;;  %v8320_v53 = vld [vmem:[#allocation10 + $0xe4] ss:$16 sps:$4 sm:$0xff]   ;;  %v203_v20 = vpack.c.bf16 %v198_v11, %v198_v11  ;;  %v8377_v40 = vld [vmem:[#allocation10 + $0xc] ss:$16 sps:$4 sm:$0xff]  }
  0xa4   :  { %3930 = vmatprep.subr.bf16.mxu1 %v8290_v22  ;;  %4011 = vmatprep.subr.bf16.mxu0 %v8293_v23  ;;  %v8323_v54 = vld [vmem:[#allocation10 + $0x2e4] ss:$16 sps:$4 sm:$0xff]   ;;  %v8318_v55 = vld [vmem:[#allocation10 + $0xe0] ss:$16 sps:$4 sm:$0xff]   ;;  %v8383_v50 = vld [vmem:[#allocation10 + $0x2c] ss:$16 sps:$4 sm:$0xff]  }
  0xa5   :  { %v8321_v57 = vld [vmem:[#allocation10 + $0x2e0] ss:$16 sps:$4 sm:$0xff]   ;;  %v8326_v58 = vld [vmem:[#allocation10 + $0x104] ss:$16 sps:$4 sm:$0xff]  }
  0xa6   :  { %7093 = vmatmul.mubr.msk.bf16.gmra.mrb[4].mxu1 %vm228_vm6, %v200_v43  ;;  %7088 = vmatmul.mubr.msk.bf16.gmra.mrb[4].mxu0 %vm228_vm6, %v200_v43  ;;  %v8329_v59 = vld [vmem:[#allocation10 + $0x304] ss:$16 sps:$4 sm:$0xff]   ;;  %v8324_v61 = vld [vmem:[#allocation10 + $0x100] ss:$16 sps:$4 sm:$0xff]  }
  0xa7   :  { %3931 = vmatpush1.bf16.msra.mxu1 %v8288_v24  ;;  %4012 = vmatpush1.bf16.msra.mxu0 %v8291_v25  ;;  %v8327_v1 = vld [vmem:[#allocation10 + $0x300] ss:$16 sps:$4 sm:$0xff]   ;;  %v8332_v3 = vld [vmem:[#allocation10 + $0x124] ss:$16 sps:$4 sm:$0xff]  }
  0xa8   :  { %3932 = vmatprep.subr.bf16.mxu1 %v8296_v26  ;;  %4013 = vmatprep.subr.bf16.mxu0 %v8299_v27  ;;  %v8335_v4 = vld [vmem:[#allocation10 + $0x324] ss:$16 sps:$4 sm:$0xff]   ;;  %v8330_v5 = vld [vmem:[#allocation10 + $0x120] ss:$16 sps:$4 sm:$0xff]  }
  0xa9   :  { %377 = vmatprep.mubr.bf16.mxu1 %v9644_v0  ;;  %296 = vmatprep.mubr.bf16.mxu0 %v9644_v0  ;;  %v8333_v7 = vld [vmem:[#allocation10 + $0x320] ss:$16 sps:$4 sm:$0xff]   ;;  %v8338_v8 = vld [vmem:[#allocation10 + $0x144] ss:$16 sps:$4 sm:$0xff]  }
  0xaa   :  { %v8341_v9 = vld [vmem:[#allocation10 + $0x344] ss:$16 sps:$4 sm:$0xff]   ;;  %v8336_v12 = vld [vmem:[#allocation10 + $0x140] ss:$16 sps:$4 sm:$0xff]  }
  0xab   :  { %3933 = vmatpush1.bf16.msra.mxu1 %v8294_v30  ;;  %4014 = vmatpush1.bf16.msra.mxu0 %v8297_v31  ;;  %v8339_v14 = vld [vmem:[#allocation10 + $0x340] ss:$16 sps:$4 sm:$0xff]   ;;  %v8344_v15 = vld [vmem:[#allocation10 + $0x164] ss:$16 sps:$4 sm:$0xff]  }
  0xac   :  { %3934 = vmatprep.subr.bf16.mxu1 %v8302_v32  ;;  %4015 = vmatprep.subr.bf16.mxu0 %v8305_v33  ;;  %v8347_v10 = vld [vmem:[#allocation10 + $0x364] ss:$16 sps:$4 sm:$0xff]   ;;  %v406_v16 = vld [vmem:[#allocation2] sm:$0xff] }
  0xad   :  { %v414_v17 = vld [vmem:[#allocation2 + $0x40] sm:$0xff]  ;;  %v407_v18 = vld [vmem:[#allocation2 + $0x8] sm:$0xff] }
  0xae   :  { %7094 = vmatmul.mubr.msk.bf16.gmra.mrb[8].mxu1 %vm228_vm6, %v201_v56  ;;  %7089 = vmatmul.mubr.msk.bf16.gmra.mrb[8].mxu0 %vm228_vm6, %v201_v56  ;;  %v415_v19 = vld [vmem:[#allocation2 + $0x48] sm:$0xff]  ;;  %v8342_v21 = vld [vmem:[#allocation10 + $0x160] ss:$16 sps:$4 sm:$0xff]   ;;  %v9878_v23 = vcombine.high %v406_v16, %v414_v17  ;;  %v8389_v56 = vld [vmem:[#allocation10 + $0x4c] ss:$16 sps:$4 sm:$0xff]  }
  0xaf   :  { %3935 = vmatpush1.bf16.msra.mxu1 %v8300_v34  ;;  %4016 = vmatpush1.bf16.msra.mxu0 %v8303_v35  ;;  %v8345_v22 = vld [vmem:[#allocation10 + $0x360] ss:$16 sps:$4 sm:$0xff]   ;;  %v9880_v24 = vcombine.high %v407_v18, %v415_v19  ;;  %v8350_v13 = vld [vmem:[#allocation10 + $0x184] ss:$16 sps:$4 sm:$0xff]  }
  0xb0   :  { %3936 = vmatprep.subr.bf16.mxu1 %v8308_v37  ;;  %4017 = vmatprep.subr.bf16.mxu0 %v8311_v39  ;;  %v8348_v25 = vld [vmem:[#allocation10 + $0x180] ss:$16 sps:$4 sm:$0xff]   ;;  %v8356_v27 = vld [vmem:[#allocation10 + $0x1a4] ss:$16 sps:$4 sm:$0xff]  }
  0xb1   :  { %387 = vmatprep.mubr.bf16.mxu1 %v9644_v0  ;;  %306 = vmatprep.mubr.bf16.mxu0 %v9644_v0  ;;  %v8351_v26 = vld [vmem:[#allocation10 + $0x380] ss:$16 sps:$4 sm:$0xff]   ;;  %v8359_v28 = vld [vmem:[#allocation10 + $0x3a4] ss:$16 sps:$4 sm:$0xff]  }
  0xb2   :  { %v8354_v29 = vld [vmem:[#allocation10 + $0x1a0] ss:$16 sps:$4 sm:$0xff]   ;;  %v8362_v31 = vld [vmem:[#allocation10 + $0x1c4] ss:$16 sps:$4 sm:$0xff]  }
  0xb3   :  { %3937 = vmatpush1.bf16.msra.mxu1 %v8306_v42  ;;  %4018 = vmatpush1.bf16.msra.mxu0 %v8309_v44  ;;  %v8357_v30 = vld [vmem:[#allocation10 + $0x3a0] ss:$16 sps:$4 sm:$0xff]   ;;  %v8365_v32 = vld [vmem:[#allocation10 + $0x3c4] ss:$16 sps:$4 sm:$0xff]   ;;  %v8375_v42 = vld [vmem:[#allocation10 + $0x8] ss:$16 sps:$4 sm:$0xff]   ;;  %v9886_v44 = vcombine.low %v406_v16, %v414_v17 }
  0xb4   :  { %3938 = vmatprep.subr.bf16.mxu1 %v8314_v45  ;;  %4019 = vmatprep.subr.bf16.mxu0 %v8317_v46  ;;  %v8360_v33 = vld [vmem:[#allocation10 + $0x1c0] ss:$16 sps:$4 sm:$0xff]   ;;  %v8368_v35 = vld [vmem:[#allocation10 + $0x1e4] ss:$16 sps:$4 sm:$0xff]   ;;  %v9888_v45 = vcombine.low %v407_v18, %v415_v19 }
  0xb5   :  { %v8363_v34 = vld [vmem:[#allocation10 + $0x3c0] ss:$16 sps:$4 sm:$0xff]   ;;  %v8371_v36 = vld [vmem:[#allocation10 + $0x3e4] ss:$16 sps:$4 sm:$0xff]  }
  0xb6   :  { %7095 = vmatmul.mubr.msk.bf16.gmra.mrb[12].mxu1 %vm228_vm6, %v202_v6  ;;  %7090 = vmatmul.mubr.msk.bf16.gmra.mrb[12].mxu0 %vm228_vm6, %v202_v6  ;;  %v8366_v37 = vld [vmem:[#allocation10 + $0x1e0] ss:$16 sps:$4 sm:$0xff]   ;;  %v8374_v39 = vld [vmem:[#allocation10 + $0x404] ss:$16 sps:$4 sm:$0xff]  }
  0xb7   :  { %3939 = vmatpush1.bf16.msra.mxu1 %v8312_v49  ;;  %4020 = vmatpush1.bf16.msra.mxu0 %v8315_v51  ;;  %v8369_v38 = vld [vmem:[#allocation10 + $0x3e0] ss:$16 sps:$4 sm:$0xff]   ;;  %v423_v47 = vld [vmem:[#allocation2 + $0x88] sm:$0xff] }
  0xb8   :  { %3940 = vmatprep.subr.bf16.mxu1 %v8320_v53  ;;  %4021 = vmatprep.subr.bf16.mxu0 %v8323_v54  ;;  %v8372_v41 = vld [vmem:[#allocation10 + $0x400] ss:$16 sps:$4 sm:$0xff]   ;;  %v431_v48 = vld [vmem:[#allocation2 + $0xc8] sm:$0xff] }
  0xb9   :  { %397 = vmatprep.mubr.bf16.mxu1 %v9644_v0  ;;  %316 = vmatprep.mubr.bf16.mxu0 %v9644_v0  ;;  %v8353_v0 = vld [vmem:[#allocation10 + $0x384] ss:$16 sps:$4 sm:$0xff]   ;;  %v422_v43 = vld [vmem:[#allocation2 + $0x80] sm:$0xff]  ;;  %v9892_v52 = vcombine.high %v423_v47, %v431_v48  ;;  %v8381_v54 = vld [vmem:[#allocation10 + $0x28] ss:$16 sps:$4 sm:$0xff]  }
  0xba   :  { %v430_v46 = vld [vmem:[#allocation2 + $0xc0] sm:$0xff]  ;;  %v8380_v49 = vld [vmem:[#allocation10 + $0x424] ss:$16 sps:$4 sm:$0xff]  }
  0xbb   :  { %3941 = vmatpush1.bf16.msra.mxu1 %v8318_v55  ;;  %4022 = vmatpush1.bf16.msra.mxu0 %v8321_v57  ;;  %v9890_v51 = vcombine.high %v422_v43, %v430_v46  ;;  %v8378_v53 = vld [vmem:[#allocation10 + $0x420] ss:$16 sps:$4 sm:$0xff]   ;;  %v8386_v55 = vld [vmem:[#allocation10 + $0x444] ss:$16 sps:$4 sm:$0xff]   ;;  %v9898_v60 = vcombine.low %v422_v43, %v430_v46 }
  0xbc   :  { %3942 = vmatprep.subr.bf16.mxu1 %v8326_v58  ;;  %4023 = vmatprep.subr.bf16.mxu0 %v8329_v59  ;;  %v8384_v57 = vld [vmem:[#allocation10 + $0x440] ss:$16 sps:$4 sm:$0xff]   ;;  %v439_v62 = vld [vmem:[#allocation2 + $0x108] sm:$0xff] }
  0xbd   :  { %v438_v58 = vld [vmem:[#allocation2 + $0x100] sm:$0xff]  ;;  %v447_v63 = vld [vmem:[#allocation2 + $0x148] sm:$0xff] }
  0xbe   :  { %7096 = vmatmul.mubr.msk.bf16.gmra.mrb[16].mxu1 %vm228_vm6, %v203_v20  ;;  %7091 = vmatmul.mubr.msk.bf16.gmra.mrb[16].mxu0 %vm228_vm6, %v203_v20  ;;  %v446_v59 = vld [vmem:[#allocation2 + $0x140] sm:$0xff]  ;;  %v9904_v6 = vcombine.high %v439_v62, %v447_v63  ;;  %v9912_v17 = vcombine.low %v439_v62, %v447_v63  ;;  %v455_v18 = vld [vmem:[#allocation2 + $0x188] sm:$0xff] }
  0xbf   :  { %3943 = vmatpush1.bf16.msra.mxu1 %v8324_v61  ;;  %4024 = vmatpush1.bf16.msra.mxu0 %v8327_v1  ;;  %v9900_v61 = vcombine.low %v423_v47, %v431_v48  ;;  %v8387_v1 = vld [vmem:[#allocation10 + $0x48] ss:$16 sps:$4 sm:$0xff]   ;;  %v462_v11 = vld [vmem:[#allocation2 + $0x1c0] sm:$0xff]  ;;  %v9910_v16 = vcombine.low %v438_v58, %v446_v59  ;;  %v8404_v20 = vld [vmem:[#allocation10 + $0x4a4] ss:$16 sps:$4 sm:$0xff]  }
  0xc0   :  { %3944 = vmatprep.subr.bf16.mxu1 %v8332_v3  ;;  %4025 = vmatprep.subr.bf16.mxu0 %v8335_v4  ;;  %v8392_v3 = vld [vmem:[#allocation10 + $0x464] ss:$16 sps:$4 sm:$0xff]   ;;  %v8395_v4 = vld [vmem:[#allocation10 + $0x6c] ss:$16 sps:$4 sm:$0xff]   ;;  %v8420_v48 = vld [vmem:[#allocation10 + $0x500] ss:$16 sps:$4 sm:$0xff]  }
  0xc1   :  { %3958 = vmatprep.mubr.bf16.mxu1 %v9878_v23  ;;  %4039 = vmatprep.mubr.bf16.mxu0 %v9880_v24  ;;  %v463_v19 = vld [vmem:[#allocation2 + $0x1c8] sm:$0xff]  ;;  %v9940_v47 = vld [vmem:[#allocation2 + $0x50] sm:$0xff] }
  0xc2   :  { %v8435_v62 = vld [vmem:[#allocation10 + $0x148] ss:$16 sps:$4 sm:$0xff]   ;;  %v8440_v63 = vld [vmem:[#allocation10 + $0x564] ss:$16 sps:$4 sm:$0xff]  }
  0xc3   :  { %3945 = vmatpush1.bf16.msra.mxu1 %v8330_v5  ;;  %4026 = vmatpush1.bf16.msra.mxu0 %v8333_v7  ;;  %v9902_v5 = vcombine.high %v438_v58, %v446_v59  ;;  %v8390_v7 = vld [vmem:[#allocation10 + $0x460] ss:$16 sps:$4 sm:$0xff]   ;;  %v8437_v58 = vld [vmem:[#allocation10 + $0x14c] ss:$16 sps:$4 sm:$0xff]  }
  0xc4   :  { %3946 = vmatprep.subr.bf16.mxu1 %v8338_v8  ;;  %4027 = vmatprep.subr.bf16.mxu0 %v8341_v9  ;;  %v8393_v8 = vld [vmem:[#allocation10 + $0x68] ss:$16 sps:$4 sm:$0xff]   ;;  %v8398_v9 = vld [vmem:[#allocation10 + $0x484] ss:$16 sps:$4 sm:$0xff]   ;;  %v8432_v59 = vld [vmem:[#allocation10 + $0x540] ss:$16 sps:$4 sm:$0xff]  }
  0xc7   :  { %3947 = vmatpush1.bf16.msra.mxu1 %v8336_v12  ;;  %4028 = vmatpush1.bf16.msra.mxu0 %v8339_v14  ;;  %v8401_v12 = vld [vmem:[#allocation10 + $0x8c] ss:$16 sps:$4 sm:$0xff]   ;;  %v8396_v14 = vld [vmem:[#allocation10 + $0x480] ss:$16 sps:$4 sm:$0xff]  }
  0xc8   :  { %3948 = vmatprep.subr.bf16.mxu1 %v8344_v15  ;;  %4029 = vmatprep.subr.bf16.mxu0 %v8347_v10  ;;  %v8399_v15 = vld [vmem:[#allocation10 + $0x88] ss:$16 sps:$4 sm:$0xff]   ;;  %v454_v10 = vld [vmem:[#allocation2 + $0x180] sm:$0xff] }
  0xcb   :  { %3949 = vmatpush1.bf16.msra.mxu1 %v8342_v21  ;;  %4030 = vmatpush1.bf16.msra.mxu0 %v8345_v22  ;;  %v8407_v21 = vld [vmem:[#allocation10 + $0xac] ss:$16 sps:$4 sm:$0xff]   ;;  %v9914_v22 = vcombine.high %v454_v10, %v462_v11 }
  0xcc   :  { %3950 = vmatprep.subr.bf16.mxu1 %v8350_v13  ;;  %4031 = vmatprep.subr.bf16.mxu0 %v8353_v0  ;;  %v9916_v13 = vcombine.high %v455_v18, %v463_v19  ;;  %v8402_v0 = vld [vmem:[#allocation10 + $0x4a0] ss:$16 sps:$4 sm:$0xff]  }
  0xcf   :  { %3951 = vmatpush1.bf16.msra.mxu1 %v8348_v25  ;;  %4032 = vmatpush1.bf16.msra.mxu0 %v8351_v26  ;;  %v8405_v25 = vld [vmem:[#allocation10 + $0xa8] ss:$16 sps:$4 sm:$0xff]   ;;  %v8410_v26 = vld [vmem:[#allocation10 + $0x4c4] ss:$16 sps:$4 sm:$0xff]  }
  0xd0   :  { %3952 = vmatprep.subr.bf16.mxu1 %v8356_v27  ;;  %4033 = vmatprep.subr.bf16.mxu0 %v8359_v28  ;;  %v8413_v27 = vld [vmem:[#allocation10 + $0xcc] ss:$16 sps:$4 sm:$0xff]  }
  0xd1   :  { %v470_v28 = vld [vmem:[#allocation2 + $0x200] sm:$0xff] }
  0xd2   :  { %v9936_v43 = vcombine.low %v470_v28, %v470_v28 }
  0xd3   :  { %3953 = vmatpush1.bf16.msra.mxu1 %v8354_v29  ;;  %4034 = vmatpush1.bf16.msra.mxu0 %v8357_v30  ;;  %v9922_v29 = vcombine.low %v454_v10, %v462_v11  ;;  %v9924_v30 = vcombine.low %v455_v18, %v463_v19  ;;  %v8453_v10 = vld [vmem:[#allocation10 + $0x1a8] ss:$16 sps:$4 sm:$0xff]   ;;  %v8462_v11 = vld [vmem:[#allocation10 + $0x5c4] ss:$16 sps:$4 sm:$0xff]   ;;  %v8465_v18 = vld [vmem:[#allocation10 + $0x1cc] ss:$16 sps:$4 sm:$0xff]  }
  0xd4   :  { %3954 = vmatprep.subr.bf16.mxu1 %v8362_v31  ;;  %4035 = vmatprep.subr.bf16.mxu0 %v8365_v32  ;;  %v471_v31 = vld [vmem:[#allocation2 + $0x208] sm:$0xff]  ;;  %v8408_v32 = vld [vmem:[#allocation10 + $0x4c0] ss:$16 sps:$4 sm:$0xff]  }
  0xd5   :  { %v9938_v46 = vcombine.low %v471_v31, %v471_v31  ;;  %v8460_v19 = vld [vmem:[#allocation10 + $0x5c0] ss:$16 sps:$4 sm:$0xff]  }
  0xd7   :  { %3955 = vmatpush1.bf16.msra.mxu1 %v8360_v33  ;;  %4036 = vmatpush1.bf16.msra.mxu0 %v8363_v34  ;;  %v8411_v33 = vld [vmem:[#allocation10 + $0xc8] ss:$16 sps:$4 sm:$0xff]   ;;  %v8416_v34 = vld [vmem:[#allocation10 + $0x4e4] ss:$16 sps:$4 sm:$0xff]  }
  0xd8   :  { %3956 = vmatprep.subr.bf16.mxu1 %v8368_v35  ;;  %4037 = vmatprep.subr.bf16.mxu0 %v8371_v36  ;;  %v8419_v35 = vld [vmem:[#allocation10 + $0xec] ss:$16 sps:$4 sm:$0xff]   ;;  %v9926_v36 = vcombine.high %v470_v28, %v470_v28 }
  0xd9   :  { %v8477_v28 = vld [vmem:[#allocation10 + $0x20c] ss:$16 sps:$4 sm:$0xff]  }
  0xdb   :  { %3957 = vmatpush1.bf16.msra.mxu1 %v8366_v37  ;;  %4038 = vmatpush1.bf16.msra.mxu0 %v8369_v38  ;;  %v9928_v37 = vcombine.high %v471_v31, %v471_v31  ;;  %v8414_v38 = vld [vmem:[#allocation10 + $0x4e0] ss:$16 sps:$4 sm:$0xff]  }
  0xdc   :  { %4088 = vmatprep.subr.bf16.mxu0 %v8374_v39  ;;  %4574 = vmatprep.subr.bf16.mxu1 %v8377_v40  ;;  %v8417_v39 = vld [vmem:[#allocation10 + $0xe8] ss:$16 sps:$4 sm:$0xff]   ;;  %v8422_v40 = vld [vmem:[#allocation10 + $0x504] ss:$16 sps:$4 sm:$0xff]   ;;  %v8472_v31 = vld [vmem:[#allocation10 + $0x600] ss:$16 sps:$4 sm:$0xff]  }
  0xde   :  { %3959 = vmatmul.mubr.bf16.vlgmr.msra.gmra.mrb[20].mxu1 %v9886_v44  ;;  %4040 = vmatmul.mubr.bf16.vlgmr.msra.gmra.mrb[20].mxu0 %v9888_v45 }
  0xdf   :  { %4089 = vmatpush1.bf16.msra.mxu0 %v8372_v41  ;;  %4575 = vmatpush1.bf16.msra.mxu1 %v8375_v42  ;;  %v8425_v41 = vld [vmem:[#allocation10 + $0x10c] ss:$16 sps:$4 sm:$0xff]  }
  0xe0   :  { %4090 = vmatprep.subr.bf16.mxu0 %v8380_v49  ;;  %4576 = vmatprep.subr.bf16.mxu1 %v8383_v50  ;;  %v9934_v42 = vld [vmem:[#allocation2 + $0x10] sm:$0xff]  ;;  %v8423_v49 = vld [vmem:[#allocation10 + $0x108] ss:$16 sps:$4 sm:$0xff]   ;;  %v8428_v50 = vld [vmem:[#allocation10 + $0x524] ss:$16 sps:$4 sm:$0xff]  }
  0xe1   :  { %3968 = vmatprep.mubr.bf16.mxu1 %v9890_v51  ;;  %4049 = vmatprep.mubr.bf16.mxu0 %v9892_v52 }
  0xe3   :  { %4091 = vmatpush1.bf16.msra.mxu0 %v8378_v53  ;;  %4577 = vmatpush1.bf16.msra.mxu1 %v8381_v54  ;;  %v8431_v53 = vld [vmem:[#allocation10 + $0x12c] ss:$16 sps:$4 sm:$0xff]   ;;  %v9944_v54 = vcombine.high %v9934_v42, %v9940_v47 }
  0xe4   :  { %4092 = vmatprep.subr.bf16.mxu0 %v8386_v55  ;;  %4578 = vmatprep.subr.bf16.mxu1 %v8389_v56  ;;  %v8426_v55 = vld [vmem:[#allocation10 + $0x520] ss:$16 sps:$4 sm:$0xff]   ;;  %v8429_v56 = vld [vmem:[#allocation10 + $0x128] ss:$16 sps:$4 sm:$0xff]  }
  0xe6   :  { %3969 = vmatmul.mubr.bf16.gmra.mrb[24].mxu1 %v9898_v60  ;;  %4050 = vmatmul.mubr.bf16.gmra.mrb[24].mxu0 %v9900_v61 }
  0xe7   :  { %4093 = vmatpush1.bf16.msra.mxu0 %v8384_v57  ;;  %4579 = vmatpush1.bf16.msra.mxu1 %v8387_v1  ;;  %v8434_v57 = vld [vmem:[#allocation10 + $0x544] ss:$16 sps:$4 sm:$0xff]   ;;  %v8443_v1 = vld [vmem:[#allocation10 + $0x16c] ss:$16 sps:$4 sm:$0xff]  }
  0xe8   :  { %4094 = vmatprep.subr.bf16.mxu0 %v8392_v3  ;;  %4580 = vmatprep.subr.bf16.mxu1 %v8395_v4  ;;  %v8438_v3 = vld [vmem:[#allocation10 + $0x560] ss:$16 sps:$4 sm:$0xff]   ;;  %v8441_v4 = vld [vmem:[#allocation10 + $0x168] ss:$16 sps:$4 sm:$0xff]  }
  0xe9   :  { %3978 = vmatprep.mubr.bf16.mxu1 %v9902_v5  ;;  %4059 = vmatprep.mubr.bf16.mxu0 %v9904_v6 }
  0xeb   :  { %4095 = vmatpush1.bf16.msra.mxu0 %v8390_v7  ;;  %4581 = vmatpush1.bf16.msra.mxu1 %v8393_v8  ;;  %v8446_v7 = vld [vmem:[#allocation10 + $0x584] ss:$16 sps:$4 sm:$0xff]   ;;  %v8449_v8 = vld [vmem:[#allocation10 + $0x18c] ss:$16 sps:$4 sm:$0xff]  }
  0xec   :  { %4096 = vmatprep.subr.bf16.mxu0 %v8398_v9  ;;  %4582 = vmatprep.subr.bf16.mxu1 %v8401_v12  ;;  %v8444_v9 = vld [vmem:[#allocation10 + $0x580] ss:$16 sps:$4 sm:$0xff]   ;;  %v8452_v12 = vld [vmem:[#allocation10 + $0x5a4] ss:$16 sps:$4 sm:$0xff]  }
  0xee   :  { %3979 = vmatmul.mubr.bf16.gmra.mrb[28].mxu1 %v9910_v16  ;;  %4060 = vmatmul.mubr.bf16.gmra.mrb[28].mxu0 %v9912_v17 }
  0xef   :  { %4097 = vmatpush1.bf16.msra.mxu0 %v8396_v14  ;;  %4583 = vmatpush1.bf16.msra.mxu1 %v8399_v15  ;;  %v8455_v14 = vld [vmem:[#allocation10 + $0x1ac] ss:$16 sps:$4 sm:$0xff]   ;;  %v8450_v15 = vld [vmem:[#allocation10 + $0x5a0] ss:$16 sps:$4 sm:$0xff]  }
  0xf0   :  { %4098 = vmatprep.subr.bf16.mxu0 %v8404_v20  ;;  %4584 = vmatprep.subr.bf16.mxu1 %v8407_v21  ;;  %v8463_v20 = vld [vmem:[#allocation10 + $0x1c8] ss:$16 sps:$4 sm:$0xff]   ;;  %v8468_v21 = vld [vmem:[#allocation10 + $0x5e4] ss:$16 sps:$4 sm:$0xff]  }
  0xf1   :  { %3988 = vmatprep.mubr.bf16.mxu1 %v9914_v22  ;;  %4069 = vmatprep.mubr.bf16.mxu0 %v9916_v13 }
  0xf3   :  { %4099 = vmatpush1.bf16.msra.mxu0 %v8402_v0  ;;  %4585 = vmatpush1.bf16.msra.mxu1 %v8405_v25  ;;  %v8471_v0 = vld [vmem:[#allocation10 + $0x1ec] ss:$16 sps:$4 sm:$0xff]   ;;  %v8466_v25 = vld [vmem:[#allocation10 + $0x5e0] ss:$16 sps:$4 sm:$0xff]  }
  0xf4   :  { %4100 = vmatprep.subr.bf16.mxu0 %v8410_v26  ;;  %4586 = vmatprep.subr.bf16.mxu1 %v8413_v27  ;;  %v8469_v26 = vld [vmem:[#allocation10 + $0x1e8] ss:$16 sps:$4 sm:$0xff]   ;;  %v8474_v27 = vld [vmem:[#allocation10 + $0x604] ss:$16 sps:$4 sm:$0xff]  }
  0xf6   :  { %3989 = vmatmul.mubr.bf16.gmra.mrb[32].mxu1 %v9922_v29  ;;  %4070 = vmatmul.mubr.bf16.gmra.mrb[32].mxu0 %v9924_v30 }
  0xf7   :  { %4101 = vmatpush1.bf16.msra.mxu0 %v8408_v32  ;;  %4587 = vmatpush1.bf16.msra.mxu1 %v8411_v33  ;;  %v9952_v32 = vcombine.low %v9934_v42, %v9940_v47  ;;  %v424_v33 = vld [vmem:[#allocation2 + $0x90] sm:$0xff]  ;;  %v8481_v42 = vld [vmem:[#allocation10 + $0x228] ss:$16 sps:$4 sm:$0xff]   ;;  %v8486_v47 = vld [vmem:[#allocation10 + $0x644] ss:$16 sps:$4 sm:$0xff]  }
  0xf8   :  { %4102 = vmatprep.subr.bf16.mxu0 %v8416_v34  ;;  %4588 = vmatprep.subr.bf16.mxu1 %v8419_v35  ;;  %v432_v34 = vld [vmem:[#allocation2 + $0xd0] sm:$0xff]  ;;  %v8475_v35 = vld [vmem:[#allocation10 + $0x208] ss:$16 sps:$4 sm:$0xff]  }
  0xf9   :  { %3998 = vmatprep.mubr.bf16.mxu1 %v9926_v36  ;;  %4079 = vmatprep.mubr.bf16.mxu0 %v9928_v37 }
  0xfb   :  { %4103 = vmatpush1.bf16.msra.mxu0 %v8414_v38  ;;  %4589 = vmatpush1.bf16.msra.mxu1 %v8417_v39  ;;  %v8480_v38 = vld [vmem:[#allocation10 + $0x624] ss:$16 sps:$4 sm:$0xff]   ;;  %v8483_v39 = vld [vmem:[#allocation10 + $0x22c] ss:$16 sps:$4 sm:$0xff]  }
  0xfc   :  { %4104 = vmatprep.subr.bf16.mxu0 %v8422_v40  ;;  %4590 = vmatprep.subr.bf16.mxu1 %v8425_v41  ;;  %v9954_v40 = vcombine.high %v424_v33, %v432_v34  ;;  %v8478_v41 = vld [vmem:[#allocation10 + $0x620] ss:$16 sps:$4 sm:$0xff]  }
  0xfe   :  { %3999 = vmatmul.mubr.bf16.gmra.mrb[36].mxu1 %v9936_v43  ;;  %4080 = vmatmul.mubr.bf16.gmra.mrb[36].mxu0 %v9938_v46 }
  0xff   :  { %4105 = vmatpush1.bf16.msra.mxu0 %v8420_v48  ;;  %4591 = vmatpush1.bf16.msra.mxu1 %v8423_v49  ;;  %v8489_v48 = vld [vmem:[#allocation10 + $0x24c] ss:$16 sps:$4 sm:$0xff]   ;;  %v8484_v49 = vld [vmem:[#allocation10 + $0x640] ss:$16 sps:$4 sm:$0xff]  }
 0x100   :  { %4106 = vmatprep.subr.bf16.mxu0 %v8428_v50  ;;  %4592 = vmatprep.subr.bf16.mxu1 %v8431_v53  ;;  %v440_v50 = vld [vmem:[#allocation2 + $0x110] sm:$0xff]  ;;  %v9960_v53 = vcombine.low %v424_v33, %v432_v34  ;;  %v9986_v33 = vld [vmem:[#allocation2 + $0x18] sm:$0xff] }
 0x101   :  { %4120 = vmatprep.mubr.bf16.mxu0 %v9944_v54  ;;  %4606 = vmatprep.mubr.bf16.mxu1 %v9878_v23  ;;  %v8447_v23 = vld [vmem:[#allocation10 + $0x188] ss:$16 sps:$4 sm:$0xff]  }
 0x102   :  { %v9988_v34 = vld [vmem:[#allocation2 + $0x58] sm:$0xff] }
 0x103   :  { %4107 = vmatpush1.bf16.msra.mxu0 %v8426_v55  ;;  %4593 = vmatpush1.bf16.msra.mxu1 %v8429_v56  ;;  %v448_v55 = vld [vmem:[#allocation2 + $0x150] sm:$0xff]  ;;  %v8492_v56 = vld [vmem:[#allocation10 + $0x664] ss:$16 sps:$4 sm:$0xff]  }
 0x104   :  { %4108 = vmatprep.subr.bf16.mxu0 %v8434_v57  ;;  %4594 = vmatprep.subr.bf16.mxu1 %v8437_v58  ;;  %v8495_v57 = vld [vmem:[#allocation10 + $0x26c] ss:$16 sps:$4 sm:$0xff]   ;;  %v9962_v58 = vcombine.high %v440_v50, %v448_v55 }
 0x107   :  { %4109 = vmatpush1.bf16.msra.mxu0 %v8432_v59  ;;  %4595 = vmatpush1.bf16.msra.mxu1 %v8435_v62  ;;  %v8493_v59 = vld [vmem:[#allocation10 + $0x268] ss:$16 sps:$4 sm:$0xff]   ;;  %v8498_v62 = vld [vmem:[#allocation10 + $0x684] ss:$16 sps:$4 sm:$0xff]  }
 0x108   :  { %4110 = vmatprep.subr.bf16.mxu0 %v8440_v63  ;;  %4596 = vmatprep.subr.bf16.mxu1 %v8443_v1  ;;  %v8501_v63 = vld [vmem:[#allocation10 + $0x28c] ss:$16 sps:$4 sm:$0xff]   ;;  %v8496_v1 = vld [vmem:[#allocation10 + $0x680] ss:$16 sps:$4 sm:$0xff]  }
 0x10b   :  { %4111 = vmatpush1.bf16.msra.mxu0 %v8438_v3  ;;  %4597 = vmatpush1.bf16.msra.mxu1 %v8441_v4  ;;  %v9968_v3 = vcombine.low %v440_v50, %v448_v55  ;;  %v456_v4 = vld [vmem:[#allocation2 + $0x190] sm:$0xff]  ;;  %v8543_v55 = vld [vmem:[#allocation10 + $0x368] ss:$16 sps:$4 sm:$0xff]  }
 0x10c   :  { %4112 = vmatprep.subr.bf16.mxu0 %v8446_v7  ;;  %4598 = vmatprep.subr.bf16.mxu1 %v8449_v8  ;;  %v464_v7 = vld [vmem:[#allocation2 + $0x1d0] sm:$0xff]  ;;  %v8504_v8 = vld [vmem:[#allocation10 + $0x6a4] ss:$16 sps:$4 sm:$0xff]  }
 0x10d   :  { %v8540_v50 = vld [vmem:[#allocation10 + $0x760] ss:$16 sps:$4 sm:$0xff]  }
 0x10f   :  { %4113 = vmatpush1.bf16.msra.mxu0 %v8444_v9  ;;  %4599 = vmatpush1.bf16.msra.mxu1 %v8447_v23  ;;  %v8507_v9 = vld [vmem:[#allocation10 + $0x2ac] ss:$16 sps:$4 sm:$0xff]   ;;  %v9970_v23 = vcombine.high %v456_v4, %v464_v7 }
 0x110   :  { %4114 = vmatprep.subr.bf16.mxu0 %v8452_v12  ;;  %4600 = vmatprep.subr.bf16.mxu1 %v8455_v14  ;;  %v8502_v12 = vld [vmem:[#allocation10 + $0x6a0] ss:$16 sps:$4 sm:$0xff]   ;;  %v8510_v14 = vld [vmem:[#allocation10 + $0x6c4] ss:$16 sps:$4 sm:$0xff]  }
 0x113   :  { %4115 = vmatpush1.bf16.msra.mxu0 %v8450_v15  ;;  %4601 = vmatpush1.bf16.msra.mxu1 %v8453_v10  ;;  %v8513_v15 = vld [vmem:[#allocation10 + $0x2cc] ss:$16 sps:$4 sm:$0xff]   ;;  %v9976_v10 = vcombine.low %v456_v4, %v464_v7  ;;  %v8558_v7 = vld [vmem:[#allocation10 + $0x7c0] ss:$16 sps:$4 sm:$0xff]  }
 0x114   :  { %4116 = vmatprep.subr.bf16.mxu0 %v8462_v11  ;;  %4602 = vmatprep.subr.bf16.mxu1 %v8465_v18  ;;  %v472_v11 = vld [vmem:[#allocation2 + $0x210] sm:$0xff] }
 0x115   :  { %v8508_v18 = vld [vmem:[#allocation10 + $0x6c0] ss:$16 sps:$4 sm:$0xff]   ;;  %v8563_v4 = vld [vmem:[#allocation10 + $0x3cc] ss:$16 sps:$4 sm:$0xff]  }
 0x117   :  { %4117 = vmatpush1.bf16.msra.mxu0 %v8460_v19  ;;  %4603 = vmatpush1.bf16.msra.mxu1 %v8463_v20  ;;  %v8511_v19 = vld [vmem:[#allocation10 + $0x2c8] ss:$16 sps:$4 sm:$0xff]   ;;  %v8519_v20 = vld [vmem:[#allocation10 + $0x2ec] ss:$16 sps:$4 sm:$0xff]  }
 0x118   :  { %4118 = vmatprep.subr.bf16.mxu0 %v8468_v21  ;;  %4604 = vmatprep.subr.bf16.mxu1 %v8471_v0  ;;  %v9978_v21 = vcombine.high %v472_v11, %v472_v11  ;;  %v8514_v0 = vld [vmem:[#allocation10 + $0x6e0] ss:$16 sps:$4 sm:$0xff]  }
 0x11b   :  { %4119 = vmatpush1.bf16.msra.mxu0 %v8466_v25  ;;  %4605 = vmatpush1.bf16.msra.mxu1 %v8469_v26  ;;  %v8524_v25 = vld [vmem:[#allocation10 + $0x704] ss:$16 sps:$4 sm:$0xff]   ;;  %v8527_v26 = vld [vmem:[#allocation10 + $0x30c] ss:$16 sps:$4 sm:$0xff]  }
 0x11c   :  { %4169 = vmatprep.subr.bf16.mxu0 %v8474_v27  ;;  %4655 = vmatprep.subr.bf16.mxu1 %v8477_v28  ;;  %v8522_v27 = vld [vmem:[#allocation10 + $0x700] ss:$16 sps:$4 sm:$0xff]   ;;  %v8525_v28 = vld [vmem:[#allocation10 + $0x308] ss:$16 sps:$4 sm:$0xff]  }
 0x11e   :  { %4121 = vmatmul.mubr.bf16.vlgmr.msra.gmra.mrb[20].mxu0 %v9952_v32  ;;  %4607 = vmatmul.mubr.bf16.vlgmr.msra.gmra.mrb[0].mxu1 %v9886_v44  ;;  %v8487_v44 = vld [vmem:[#allocation10 + $0x248] ss:$16 sps:$4 sm:$0xff]  }
 0x11f   :  { %4170 = vmatpush1.bf16.msra.mxu0 %v8472_v31  ;;  %4656 = vmatpush1.bf16.msra.mxu1 %v8475_v35  ;;  %v9984_v31 = vcombine.low %v472_v11, %v472_v11  ;;  %v8533_v35 = vld [vmem:[#allocation10 + $0x32c] ss:$16 sps:$4 sm:$0xff]   ;;  %v10000_v11 = vcombine.low %v9986_v33, %v9988_v34 }
 0x120   :  { %4171 = vmatprep.subr.bf16.mxu0 %v8480_v38  ;;  %4657 = vmatprep.subr.bf16.mxu1 %v8483_v39  ;;  %v9992_v38 = vcombine.high %v9986_v33, %v9988_v34  ;;  %v8531_v39 = vld [vmem:[#allocation10 + $0x328] ss:$16 sps:$4 sm:$0xff]   ;;  %v8587_v33 = vld [vmem:[#allocation10 + $0x44c] ss:$16 sps:$4 sm:$0xff]   ;;  %v8582_v34 = vld [vmem:[#allocation10 + $0x840] ss:$16 sps:$4 sm:$0xff]  }
 0x121   :  { %4130 = vmatprep.mubr.bf16.mxu0 %v9954_v40  ;;  %4616 = vmatprep.mubr.bf16.mxu1 %v9890_v51  ;;  %v8490_v51 = vld [vmem:[#allocation10 + $0x660] ss:$16 sps:$4 sm:$0xff]  }
 0x123   :  { %4172 = vmatpush1.bf16.msra.mxu0 %v8478_v41  ;;  %4658 = vmatpush1.bf16.msra.mxu1 %v8481_v42  ;;  %v8536_v41 = vld [vmem:[#allocation10 + $0x744] ss:$16 sps:$4 sm:$0xff]   ;;  %v8539_v42 = vld [vmem:[#allocation10 + $0x34c] ss:$16 sps:$4 sm:$0xff]  }
 0x124   :  { %4173 = vmatprep.subr.bf16.mxu0 %v8486_v47  ;;  %4659 = vmatprep.subr.bf16.mxu1 %v8489_v48  ;;  %v8534_v47 = vld [vmem:[#allocation10 + $0x740] ss:$16 sps:$4 sm:$0xff]   ;;  %v8537_v48 = vld [vmem:[#allocation10 + $0x348] ss:$16 sps:$4 sm:$0xff]  }
 0x126   :  { %4131 = vmatmul.mubr.bf16.gmra.mrb[24].mxu0 %v9960_v53  ;;  %4617 = vmatmul.mubr.bf16.gmra.mrb[4].mxu1 %v9898_v60  ;;  %v8499_v60 = vld [vmem:[#allocation10 + $0x288] ss:$16 sps:$4 sm:$0xff]  }
 0x127   :  { %4174 = vmatpush1.bf16.msra.mxu0 %v8484_v49  ;;  %4660 = vmatpush1.bf16.msra.mxu1 %v8487_v44  ;;  %v8542_v49 = vld [vmem:[#allocation10 + $0x764] ss:$16 sps:$4 sm:$0xff]  }
 0x128   :  { %4175 = vmatprep.subr.bf16.mxu0 %v8492_v56  ;;  %4661 = vmatprep.subr.bf16.mxu1 %v8495_v57  ;;  %v8548_v44 = vld [vmem:[#allocation10 + $0x784] ss:$16 sps:$4 sm:$0xff]   ;;  %v8551_v56 = vld [vmem:[#allocation10 + $0x38c] ss:$16 sps:$4 sm:$0xff]   ;;  %v8546_v57 = vld [vmem:[#allocation10 + $0x780] ss:$16 sps:$4 sm:$0xff]  }
 0x129   :  { %4140 = vmatprep.mubr.bf16.mxu0 %v9962_v58  ;;  %4626 = vmatprep.mubr.bf16.mxu1 %v9902_v5  ;;  %v8505_v5 = vld [vmem:[#allocation10 + $0x2a8] ss:$16 sps:$4 sm:$0xff]  }
 0x12b   :  { %4176 = vmatpush1.bf16.msra.mxu0 %v8490_v51  ;;  %4662 = vmatpush1.bf16.msra.mxu1 %v8493_v59  ;;  %v8549_v51 = vld [vmem:[#allocation10 + $0x388] ss:$16 sps:$4 sm:$0xff]   ;;  %v8557_v59 = vld [vmem:[#allocation10 + $0x3ac] ss:$16 sps:$4 sm:$0xff]  }
 0x12c   :  { %4177 = vmatprep.subr.bf16.mxu0 %v8498_v62  ;;  %4663 = vmatprep.subr.bf16.mxu1 %v8501_v63  ;;  %v8552_v62 = vld [vmem:[#allocation10 + $0x7a0] ss:$16 sps:$4 sm:$0xff]   ;;  %v8555_v63 = vld [vmem:[#allocation10 + $0x3a8] ss:$16 sps:$4 sm:$0xff]  }
 0x12e   :  { %4141 = vmatmul.mubr.bf16.gmra.mrb[28].mxu0 %v9968_v3  ;;  %4627 = vmatmul.mubr.bf16.gmra.mrb[8].mxu1 %v9910_v16  ;;  %v8516_v16 = vld [vmem:[#allocation10 + $0x6e4] ss:$16 sps:$4 sm:$0xff]  }
 0x12f   :  { %4178 = vmatpush1.bf16.msra.mxu0 %v8496_v1  ;;  %4664 = vmatpush1.bf16.msra.mxu1 %v8499_v60  ;;  %v8560_v1 = vld [vmem:[#allocation10 + $0x7c4] ss:$16 sps:$4 sm:$0xff]   ;;  %v8561_v60 = vld [vmem:[#allocation10 + $0x3c8] ss:$16 sps:$4 sm:$0xff]  }
 0x130   :  { %4179 = vmatprep.subr.bf16.mxu0 %v8504_v8  ;;  %4665 = vmatprep.subr.bf16.mxu1 %v8507_v9  ;;  %v8566_v8 = vld [vmem:[#allocation10 + $0x7e4] ss:$16 sps:$4 sm:$0xff]   ;;  %v8569_v9 = vld [vmem:[#allocation10 + $0x3ec] ss:$16 sps:$4 sm:$0xff]  }
 0x131   :  { %4150 = vmatprep.mubr.bf16.mxu0 %v9970_v23  ;;  %4636 = vmatprep.mubr.bf16.mxu1 %v9914_v22  ;;  %v8517_v22 = vld [vmem:[#allocation10 + $0x2e8] ss:$16 sps:$4 sm:$0xff]  }
 0x133   :  { %4180 = vmatpush1.bf16.msra.mxu0 %v8502_v12  ;;  %4666 = vmatpush1.bf16.msra.mxu1 %v8505_v5  ;;  %v8564_v12 = vld [vmem:[#allocation10 + $0x7e0] ss:$16 sps:$4 sm:$0xff]   ;;  %v8567_v5 = vld [vmem:[#allocation10 + $0x3e8] ss:$16 sps:$4 sm:$0xff]  }
 0x134   :  { %4181 = vmatprep.subr.bf16.mxu0 %v8510_v14  ;;  %4667 = vmatprep.subr.bf16.mxu1 %v8513_v15  ;;  %v8572_v14 = vld [vmem:[#allocation10 + $0x804] ss:$16 sps:$4 sm:$0xff]   ;;  %v8575_v15 = vld [vmem:[#allocation10 + $0x40c] ss:$16 sps:$4 sm:$0xff]  }
 0x136   :  { %4151 = vmatmul.mubr.bf16.gmra.mrb[32].mxu0 %v9976_v10  ;;  %4637 = vmatmul.mubr.bf16.gmra.mrb[12].mxu1 %v9922_v29  ;;  %v8530_v29 = vld [vmem:[#allocation10 + $0x724] ss:$16 sps:$4 sm:$0xff]  }
 0x137   :  { %4182 = vmatpush1.bf16.msra.mxu0 %v8508_v18  ;;  %4668 = vmatpush1.bf16.msra.mxu1 %v8511_v19  ;;  %v425_v18 = vld [vmem:[#allocation2 + $0x98] sm:$0xff] }
 0x138   :  { %4183 = vmatprep.subr.bf16.mxu0 %v8516_v16  ;;  %4669 = vmatprep.subr.bf16.mxu1 %v8519_v20  ;;  %v433_v19 = vld [vmem:[#allocation2 + $0xd8] sm:$0xff]  ;;  %v8570_v16 = vld [vmem:[#allocation10 + $0x800] ss:$16 sps:$4 sm:$0xff]  }
 0x139   :  { %4160 = vmatprep.mubr.bf16.mxu0 %v9978_v21  ;;  %4646 = vmatprep.mubr.bf16.mxu1 %v9926_v36  ;;  %v8528_v36 = vld [vmem:[#allocation10 + $0x720] ss:$16 sps:$4 sm:$0xff]   ;;  %v8573_v20 = vld [vmem:[#allocation10 + $0x408] ss:$16 sps:$4 sm:$0xff]  }
 0x13b   :  { %4184 = vmatpush1.bf16.msra.mxu0 %v8514_v0  ;;  %4670 = vmatpush1.bf16.msra.mxu1 %v8517_v22  ;;  %v8578_v0 = vld [vmem:[#allocation10 + $0x824] ss:$16 sps:$4 sm:$0xff]   ;;  %v8581_v22 = vld [vmem:[#allocation10 + $0x42c] ss:$16 sps:$4 sm:$0xff]  }
 0x13c   :  { %4185 = vmatprep.subr.bf16.mxu0 %v8524_v25  ;;  %4671 = vmatprep.subr.bf16.mxu1 %v8527_v26  ;;  %v10002_v25 = vcombine.high %v425_v18, %v433_v19  ;;  %v8576_v26 = vld [vmem:[#allocation10 + $0x820] ss:$16 sps:$4 sm:$0xff]  }
 0x13e   :  { %4161 = vmatmul.mubr.bf16.gmra.mrb[40].mxu0 %v9984_v31  ;;  %4647 = vmatmul.mubr.bf16.gmra.mrb[40].mxu1 %v9936_v43  ;;  %v8545_v43 = vld [vmem:[#allocation10 + $0x36c] ss:$16 sps:$4 sm:$0xff]  }
 0x13f   :  { %4186 = vmatpush1.bf16.msra.mxu0 %v8522_v27  ;;  %4672 = vmatpush1.bf16.msra.mxu1 %v8525_v28  ;;  %v8579_v27 = vld [vmem:[#allocation10 + $0x428] ss:$16 sps:$4 sm:$0xff]   ;;  %v8584_v28 = vld [vmem:[#allocation10 + $0x844] ss:$16 sps:$4 sm:$0xff]  }
 0x140   :  { %4187 = vmatprep.subr.bf16.mxu0 %v8530_v29  ;;  %4673 = vmatprep.subr.bf16.mxu1 %v8533_v35  ;;  %v8585_v29 = vld [vmem:[#allocation10 + $0x448] ss:$16 sps:$4 sm:$0xff]   ;;  %v10008_v35 = vcombine.low %v425_v18, %v433_v19  ;;  %v8622_v18 = vld [vmem:[#allocation10 + $0x904] ss:$16 sps:$4 sm:$0xff]   ;;  %v8625_v19 = vld [vmem:[#allocation10 + $0x50c] ss:$16 sps:$4 sm:$0xff]  }
 0x141   :  { %4201 = vmatprep.mubr.bf16.mxu0 %v9992_v38  ;;  %4687 = vmatprep.mubr.bf16.mxu1 %v9880_v24  ;;  %v8554_v24 = vld [vmem:[#allocation10 + $0x7a4] ss:$16 sps:$4 sm:$0xff]  }
 0x143   :  { %4188 = vmatpush1.bf16.msra.mxu0 %v8528_v36  ;;  %4674 = vmatpush1.bf16.msra.mxu1 %v8531_v39  ;;  %v441_v36 = vld [vmem:[#allocation2 + $0x118] sm:$0xff] }
 0x144   :  { %4189 = vmatprep.subr.bf16.mxu0 %v8536_v41  ;;  %4675 = vmatprep.subr.bf16.mxu1 %v8539_v42  ;;  %v449_v39 = vld [vmem:[#allocation2 + $0x158] sm:$0xff]  ;;  %v8593_v41 = vld [vmem:[#allocation10 + $0x46c] ss:$16 sps:$4 sm:$0xff]  }
 0x145   :  { %v10010_v42 = vcombine.high %v441_v36, %v449_v39 }
 0x147   :  { %4190 = vmatpush1.bf16.msra.mxu0 %v8534_v47  ;;  %4676 = vmatpush1.bf16.msra.mxu1 %v8537_v48  ;;  %v8588_v47 = vld [vmem:[#allocation10 + $0x860] ss:$16 sps:$4 sm:$0xff]   ;;  %v8596_v48 = vld [vmem:[#allocation10 + $0x884] ss:$16 sps:$4 sm:$0xff]  }
 0x148   :  { %4191 = vmatprep.subr.bf16.mxu0 %v8542_v49  ;;  %4677 = vmatprep.subr.bf16.mxu1 %v8545_v43  ;;  %v8599_v49 = vld [vmem:[#allocation10 + $0x48c] ss:$16 sps:$4 sm:$0xff]   ;;  %v8594_v43 = vld [vmem:[#allocation10 + $0x880] ss:$16 sps:$4 sm:$0xff]  }
 0x14b   :  { %4192 = vmatpush1.bf16.msra.mxu0 %v8540_v50  ;;  %4678 = vmatpush1.bf16.msra.mxu1 %v8543_v55  ;;  %v457_v50 = vld [vmem:[#allocation2 + $0x198] sm:$0xff]  ;;  %v10016_v55 = vcombine.low %v441_v36, %v449_v39  ;;  %v8632_v36 = vld [vmem:[#allocation10 + $0x940] ss:$16 sps:$4 sm:$0xff]  }
 0x14c   :  { %4193 = vmatprep.subr.bf16.mxu0 %v8548_v44  ;;  %4679 = vmatprep.subr.bf16.mxu1 %v8551_v56  ;;  %v465_v44 = vld [vmem:[#allocation2 + $0x1d8] sm:$0xff] }
 0x14d   :  { %v8602_v56 = vld [vmem:[#allocation10 + $0x8a4] ss:$16 sps:$4 sm:$0xff]   ;;  %v8635_v39 = vld [vmem:[#allocation10 + $0x548] ss:$16 sps:$4 sm:$0xff]  }
 0x14f   :  { %4194 = vmatpush1.bf16.msra.mxu0 %v8546_v57  ;;  %4680 = vmatpush1.bf16.msra.mxu1 %v8549_v51  ;;  %v8605_v57 = vld [vmem:[#allocation10 + $0x4ac] ss:$16 sps:$4 sm:$0xff]   ;;  %v10018_v51 = vcombine.high %v457_v50, %v465_v44 }
 0x150   :  { %4195 = vmatprep.subr.bf16.mxu0 %v8554_v24  ;;  %4681 = vmatprep.subr.bf16.mxu1 %v8557_v59  ;;  %v8600_v24 = vld [vmem:[#allocation10 + $0x8a0] ss:$16 sps:$4 sm:$0xff]   ;;  %v8608_v59 = vld [vmem:[#allocation10 + $0x8c4] ss:$16 sps:$4 sm:$0xff]  }
 0x153   :  { %4196 = vmatpush1.bf16.msra.mxu0 %v8552_v62  ;;  %4682 = vmatpush1.bf16.msra.mxu1 %v8555_v63  ;;  %v8611_v62 = vld [vmem:[#allocation10 + $0x4cc] ss:$16 sps:$4 sm:$0xff]   ;;  %v8606_v63 = vld [vmem:[#allocation10 + $0x8c0] ss:$16 sps:$4 sm:$0xff]  }
 0x154   :  { %4197 = vmatprep.subr.bf16.mxu0 %v8560_v1  ;;  %4683 = vmatprep.subr.bf16.mxu1 %v8563_v4  ;;  %v10026_v4 = vcombine.low %v457_v50, %v465_v44  ;;  %v8649_v50 = vld [vmem:[#allocation10 + $0x58c] ss:$16 sps:$4 sm:$0xff]   ;;  %v8644_v44 = vld [vmem:[#allocation10 + $0x980] ss:$16 sps:$4 sm:$0xff]  }
 0x157   :  { %4198 = vmatpush1.bf16.msra.mxu0 %v8558_v7  ;;  %4684 = vmatpush1.bf16.msra.mxu1 %v8561_v60  ;;  %v473_v7 = vld [vmem:[#allocation2 + $0x218] sm:$0xff] }
 0x158   :  { %4199 = vmatprep.subr.bf16.mxu0 %v8566_v8  ;;  %4685 = vmatprep.subr.bf16.mxu1 %v8569_v9  ;;  %v8614_v9 = vld [vmem:[#allocation10 + $0x8e4] ss:$16 sps:$4 sm:$0xff]  }
 0x15b   :  { %4200 = vmatpush1.bf16.msra.mxu0 %v8564_v12  ;;  %4686 = vmatpush1.bf16.msra.mxu1 %v8567_v5  ;;  %v8617_v12 = vld [vmem:[#allocation10 + $0x4ec] ss:$16 sps:$4 sm:$0xff]  }
 0x15c   :  { %4250 = vmatprep.subr.bf16.mxu0 %v8572_v14  ;;  %4736 = vmatprep.subr.bf16.mxu1 %v8575_v15  ;;  %v8612_v14 = vld [vmem:[#allocation10 + $0x8e0] ss:$16 sps:$4 sm:$0xff]   ;;  %v8615_v15 = vld [vmem:[#allocation10 + $0x4e8] ss:$16 sps:$4 sm:$0xff]  }
 0x15e   :  { %4202 = vmatmul.mubr.bf16.vlgmr.msra.gmra.mrb[20].mxu0 %v10000_v11  ;;  %4688 = vmatmul.mubr.bf16.vlgmr.msra.gmra.mrb[0].mxu1 %v9888_v45  ;;  %v8590_v45 = vld [vmem:[#allocation10 + $0x864] ss:$16 sps:$4 sm:$0xff]  }
 0x15f   :  { %4251 = vmatpush1.bf16.msra.mxu0 %v8570_v16  ;;  %4737 = vmatpush1.bf16.msra.mxu1 %v8573_v20  ;;  %v8620_v16 = vld [vmem:[#allocation10 + $0x900] ss:$16 sps:$4 sm:$0xff]  }
 0x160   :  { %4252 = vmatprep.subr.bf16.mxu0 %v8578_v0  ;;  %4738 = vmatprep.subr.bf16.mxu1 %v8581_v22  ;;  %v10040_v20 = vld [vmem:[#allocation2 + $0x20] sm:$0xff]  ;;  %v10042_v0 = vcombine.low %v473_v7, %v473_v7 }
 0x161   :  { %4211 = vmatprep.mubr.bf16.mxu0 %v10002_v25  ;;  %4697 = vmatprep.mubr.bf16.mxu1 %v9892_v52  ;;  %v8591_v52 = vld [vmem:[#allocation10 + $0x468] ss:$16 sps:$4 sm:$0xff]   ;;  %v10044_v22 = vld [vmem:[#allocation2 + $0x60] sm:$0xff] }
 0x163   :  { %4253 = vmatpush1.bf16.msra.mxu0 %v8576_v26  ;;  %4739 = vmatpush1.bf16.msra.mxu1 %v8579_v27  ;;  %v8628_v26 = vld [vmem:[#allocation10 + $0x924] ss:$16 sps:$4 sm:$0xff]   ;;  %v8631_v27 = vld [vmem:[#allocation10 + $0x52c] ss:$16 sps:$4 sm:$0xff]  }
 0x164   :  { %4254 = vmatprep.subr.bf16.mxu0 %v8584_v28  ;;  %4740 = vmatprep.subr.bf16.mxu1 %v8587_v33  ;;  %v10048_v28 = vcombine.high %v10040_v20, %v10044_v22  ;;  %v8629_v33 = vld [vmem:[#allocation10 + $0x528] ss:$16 sps:$4 sm:$0xff]  }
 0x166   :  { %4212 = vmatmul.mubr.bf16.gmra.mrb[24].mxu0 %v10008_v35  ;;  %4698 = vmatmul.mubr.bf16.gmra.mrb[4].mxu1 %v9900_v61  ;;  %v8597_v61 = vld [vmem:[#allocation10 + $0x488] ss:$16 sps:$4 sm:$0xff]  }
 0x167   :  { %4255 = vmatpush1.bf16.msra.mxu0 %v8582_v34  ;;  %4741 = vmatpush1.bf16.msra.mxu1 %v8585_v29  ;;  %v8634_v34 = vld [vmem:[#allocation10 + $0x944] ss:$16 sps:$4 sm:$0xff]   ;;  %v8637_v29 = vld [vmem:[#allocation10 + $0x54c] ss:$16 sps:$4 sm:$0xff]  }
 0x168   :  { %4256 = vmatprep.subr.bf16.mxu0 %v8590_v45  ;;  %4742 = vmatprep.subr.bf16.mxu1 %v8593_v41  ;;  %v8640_v45 = vld [vmem:[#allocation10 + $0x964] ss:$16 sps:$4 sm:$0xff]  }
 0x169   :  { %4221 = vmatprep.mubr.bf16.mxu0 %v10010_v42  ;;  %4707 = vmatprep.mubr.bf16.mxu1 %v9904_v6  ;;  %v8603_v6 = vld [vmem:[#allocation10 + $0x4a8] ss:$16 sps:$4 sm:$0xff]  }
 0x16b   :  { %4257 = vmatpush1.bf16.msra.mxu0 %v8588_v47  ;;  %4743 = vmatpush1.bf16.msra.mxu1 %v8591_v52  ;;  %v8638_v52 = vld [vmem:[#allocation10 + $0x960] ss:$16 sps:$4 sm:$0xff]  }
 0x16c   :  { %4258 = vmatprep.subr.bf16.mxu0 %v8596_v48  ;;  %4744 = vmatprep.subr.bf16.mxu1 %v8599_v49  ;;  %v8641_v49 = vld [vmem:[#allocation10 + $0x568] ss:$16 sps:$4 sm:$0xff]  }
 0x16e   :  { %4222 = vmatmul.mubr.bf16.gmra.mrb[28].mxu0 %v10016_v55  ;;  %4708 = vmatmul.mubr.bf16.gmra.mrb[8].mxu1 %v9912_v17  ;;  %v8609_v17 = vld [vmem:[#allocation10 + $0x4c8] ss:$16 sps:$4 sm:$0xff]  }
 0x16f   :  { %4259 = vmatpush1.bf16.msra.mxu0 %v8594_v43  ;;  %4745 = vmatpush1.bf16.msra.mxu1 %v8597_v61  ;;  %v8647_v61 = vld [vmem:[#allocation10 + $0x588] ss:$16 sps:$4 sm:$0xff]  }
 0x170   :  { %4260 = vmatprep.subr.bf16.mxu0 %v8602_v56  ;;  %4746 = vmatprep.subr.bf16.mxu1 %v8605_v57  ;;  %v8652_v56 = vld [vmem:[#allocation10 + $0x9a4] ss:$16 sps:$4 sm:$0xff]   ;;  %v8655_v57 = vld [vmem:[#allocation10 + $0x5ac] ss:$16 sps:$4 sm:$0xff]  }
 0x171   :  { %4231 = vmatprep.mubr.bf16.mxu0 %v10018_v51  ;;  %4717 = vmatprep.mubr.bf16.mxu1 %v9916_v13  ;;  %v10024_v1 = vpop.f32.mrb[0].mxu0  ;;  %v10034_v13 = vcombine.high %v473_v7, %v473_v7 }
 0x172   :  { %v10028_v60 = vpop.f32.mrb[1].mxu0 }
 0x173   :  { %4261 = vmatpush1.bf16.msra.mxu0 %v8600_v24  ;;  %4747 = vmatpush1.bf16.msra.mxu1 %v8603_v6  ;;  %v10030_v8 = vpop.f32.mrb[2].mxu0 }
 0x174   :  { %4262 = vmatprep.subr.bf16.mxu0 %v8608_v59  ;;  %4748 = vmatprep.subr.bf16.mxu1 %v8611_v62  ;;  %v10032_v5 = vpop.f32.mrb[3].mxu0  ;;  %v8650_v59 = vld [vmem:[#allocation10 + $0x9a0] ss:$16 sps:$4 sm:$0xff]  }
 0x176   :  { %4232 = vmatmul.mubr.bf16.gmra.mrb[32].mxu0 %v10026_v4  ;;  %4718 = vmatmul.mubr.bf16.gmra.mrb[12].mxu1 %v9924_v30  ;;  %v8623_v30 = vld [vmem:[#allocation10 + $0x508] ss:$16 sps:$4 sm:$0xff]  }
 0x177   :  { %4263 = vmatpush1.bf16.msra.mxu0 %v8606_v63  ;;  %4749 = vmatpush1.bf16.msra.mxu1 %v8609_v17  ;;  %v8653_v63 = vld [vmem:[#allocation10 + $0x5a8] ss:$16 sps:$4 sm:$0xff]   ;;  %v8658_v17 = vld [vmem:[#allocation10 + $0x9c4] ss:$16 sps:$4 sm:$0xff]  }
 0x178   :  { %4264 = vmatprep.subr.bf16.mxu0 %v8614_v9  ;;  %4750 = vmatprep.subr.bf16.mxu1 %v8617_v12  ;;  %v8661_v9 = vld [vmem:[#allocation10 + $0x5cc] ss:$16 sps:$4 sm:$0xff]   ;;  %v8656_v12 = vld [vmem:[#allocation10 + $0x9c0] ss:$16 sps:$4 sm:$0xff]  }
 0x179   :  { %4241 = vmatprep.mubr.bf16.mxu0 %v10034_v13  ;;  %4727 = vmatprep.mubr.bf16.mxu1 %v9928_v37  ;;  %v8626_v37 = vld [vmem:[#allocation10 + $0x920] ss:$16 sps:$4 sm:$0xff]   ;;  %v10054_v41 = vpop.f32.mrb[4].mxu0 }
 0x17a   :  { %v10056_v47 = vpop.f32.mrb[5].mxu0 }
 0x17b   :  { %4265 = vmatpush1.bf16.msra.mxu0 %v8612_v14  ;;  %4751 = vmatpush1.bf16.msra.mxu1 %v8615_v15  ;;  %v10058_v48 = vpop.f32.mrb[6].mxu0  ;;  %v8659_v14 = vld [vmem:[#allocation10 + $0x5c8] ss:$16 sps:$4 sm:$0xff]   ;;  %v8664_v15 = vld [vmem:[#allocation10 + $0x9e4] ss:$16 sps:$4 sm:$0xff]  }
 0x17c   :  { %4266 = vmatprep.subr.bf16.mxu0 %v8622_v18  ;;  %4752 = vmatprep.subr.bf16.mxu1 %v8625_v19  ;;  %v10060_v43 = vpop.f32.mrb[7].mxu0  ;;  %v8667_v18 = vld [vmem:[#allocation10 + $0x5ec] ss:$16 sps:$4 sm:$0xff]  }
 0x17e   :  { %4242 = vmatmul.mubr.bf16.gmra.mrb[44].mxu0 %v10042_v0  ;;  %4728 = vmatmul.mubr.bf16.gmra.mrb[44].mxu1 %v9938_v46  ;;  %v8643_v46 = vld [vmem:[#allocation10 + $0x56c] ss:$16 sps:$4 sm:$0xff]  }
 0x17f   :  { %4267 = vmatpush1.bf16.msra.mxu0 %v8620_v16  ;;  %4753 = vmatpush1.bf16.msra.mxu1 %v8623_v30 }
 0x180   :  { %4268 = vmatprep.subr.bf16.mxu0 %v8628_v26  ;;  %4754 = vmatprep.subr.bf16.mxu1 %v8631_v27  ;;  %v8662_v26 = vld [vmem:[#allocation10 + $0x9e0] ss:$16 sps:$4 sm:$0xff]   ;;  %v8665_v27 = vld [vmem:[#allocation10 + $0x5e8] ss:$16 sps:$4 sm:$0xff]  }
 0x181   :  { %4282 = vmatprep.mubr.bf16.mxu0 %v10048_v28  ;;  %4768 = vmatprep.mubr.bf16.mxu1 %v9944_v54  ;;  %v8646_v54 = vld [vmem:[#allocation10 + $0x984] ss:$16 sps:$4 sm:$0xff]   ;;  %v10062_v24 = vpop.f32.mrb[8].mxu0 }
 0x182   :  { %v10064_v6 = vpop.f32.mrb[9].mxu0 }
 0x183   :  { %4269 = vmatpush1.bf16.msra.mxu0 %v8626_v37  ;;  %4755 = vmatpush1.bf16.msra.mxu1 %v8629_v33  ;;  %v10066_v62 = vpop.f32.mrb[10].mxu0  ;;  %v8670_v33 = vld [vmem:[#allocation10 + $0xa04] ss:$16 sps:$4 sm:$0xff]  }
 0x184   :  { %4270 = vmatprep.subr.bf16.mxu0 %v8634_v34  ;;  %4756 = vmatprep.subr.bf16.mxu1 %v8637_v29  ;;  %v10068_v7 = vpop.f32.mrb[11].mxu0  ;;  %v8673_v34 = vld [vmem:[#allocation10 + $0x60c] ss:$16 sps:$4 sm:$0xff]   ;;  %v8668_v29 = vld [vmem:[#allocation10 + $0xa00] ss:$16 sps:$4 sm:$0xff]  }
 0x187   :  { %4271 = vmatpush1.bf16.msra.mxu0 %v8632_v36  ;;  %4757 = vmatpush1.bf16.msra.mxu1 %v8635_v39  ;;  %v426_v36 = vld [vmem:[#allocation2 + $0xa0] sm:$0xff]  ;;  %v10080_v39 = vcombine.low %v10040_v20, %v10044_v22 }
 0x188   :  { %4272 = vmatprep.subr.bf16.mxu0 %v8640_v45  ;;  %4758 = vmatprep.subr.bf16.mxu1 %v8643_v46  ;;  %v434_v45 = vld [vmem:[#allocation2 + $0xe0] sm:$0xff]  ;;  %v8671_v46 = vld [vmem:[#allocation10 + $0x608] ss:$16 sps:$4 sm:$0xff]  }
 0x189   :  { %v10070_v19 = vpop.f32.mrb[12].mxu0  ;;  %v8674_v20 = vld [vmem:[#allocation10 + $0xa20] ss:$16 sps:$4 sm:$0xff]  }
 0x18a   :  { %v10072_v16 = vpop.f32.mrb[13].mxu0 }
 0x18b   :  { %4273 = vmatpush1.bf16.msra.mxu0 %v8638_v52  ;;  %4759 = vmatpush1.bf16.msra.mxu1 %v8641_v49  ;;  %v10074_v30 = vpop.f32.mrb[14].mxu0  ;;  %v8676_v52 = vld [vmem:[#allocation10 + $0xa24] ss:$16 sps:$4 sm:$0xff]   ;;  %v8679_v49 = vld [vmem:[#allocation10 + $0x62c] ss:$16 sps:$4 sm:$0xff]  }
 0x18c   :  { %4274 = vmatprep.subr.bf16.mxu0 %v8646_v54  ;;  %4760 = vmatprep.subr.bf16.mxu1 %v8649_v50  ;;  %v10076_v37 = vpop.f32.mrb[15].mxu0 }
 0x18f   :  { %4275 = vmatpush1.bf16.msra.mxu0 %v8644_v44  ;;  %4761 = vmatpush1.bf16.msra.mxu1 %v8647_v61  ;;  %v10086_v44 = vcombine.high %v426_v36, %v434_v45 }
 0x190   :  { %4276 = vmatprep.subr.bf16.mxu0 %v8652_v56  ;;  %4762 = vmatprep.subr.bf16.mxu1 %v8655_v57 }
 0x191   :  { %v10082_v54 = vpop.f32.mrb[16].mxu1  ;;  %v10084_v50 = vpop.f32.mrb[16].mxu0 }
 0x192   :  { %v10088_v61 = vpop.f32.mrb[17].mxu1  ;;  %v10090_v56 = vpop.f32.mrb[17].mxu0 }
 0x193   :  { %4277 = vmatpush1.bf16.msra.mxu0 %v8650_v59  ;;  %4763 = vmatpush1.bf16.msra.mxu1 %v8653_v63  ;;  %v403_v22 = vpop.f32.mrb[18].mxu1  ;;  %v322_v57 = vpop.f32.mrb[18].mxu0  ;;  %v8677_v59 = vld [vmem:[#allocation10 + $0x628] ss:$16 sps:$4 sm:$0xff]  }
 0x194   :  { %4278 = vmatprep.subr.bf16.mxu0 %v8658_v17  ;;  %4764 = vmatprep.subr.bf16.mxu1 %v8661_v9  ;;  %v404_v63 = vpop.f32.mrb[19].mxu1  ;;  %v323_v17 = vpop.f32.mrb[19].mxu0  ;;  %v8682_v9 = vld [vmem:[#allocation10 + $0xa44] ss:$16 sps:$4 sm:$0xff]   ;;  %v8703_v57 = vld [vmem:[#allocation10 + $0x6ac] ss:$16 sps:$4 sm:$0xff]  }
 0x195   :  { %v8700_v22 = vld [vmem:[#allocation10 + $0xaa4] ss:$16 sps:$4 sm:$0xff]   ;;  %v8698_v63 = vld [vmem:[#allocation10 + $0xaa0] ss:$16 sps:$4 sm:$0xff]  }
 0x196   :  { %v8706_v17 = vld [vmem:[#allocation10 + $0xac4] ss:$16 sps:$4 sm:$0xff]  }
 0x197   :  { %4279 = vmatpush1.bf16.msra.mxu0 %v8656_v12  ;;  %4765 = vmatpush1.bf16.msra.mxu1 %v8659_v14  ;;  %v8685_v12 = vld [vmem:[#allocation10 + $0x64c] ss:$16 sps:$4 sm:$0xff]   ;;  %v8680_v14 = vld [vmem:[#allocation10 + $0xa40] ss:$16 sps:$4 sm:$0xff]  }
 0x198   :  { %4280 = vmatprep.subr.bf16.mxu0 %v8664_v15  ;;  %4766 = vmatprep.subr.bf16.mxu1 %v8667_v18  ;;  %v10096_v15 = vcombine.low %v426_v36, %v434_v45  ;;  %v450_v18 = vld [vmem:[#allocation2 + $0x160] sm:$0xff]  ;;  %v8694_v36 = vld [vmem:[#allocation10 + $0xa84] ss:$16 sps:$4 sm:$0xff]  }
 0x199   :  { %v8697_v45 = vld [vmem:[#allocation10 + $0x68c] ss:$16 sps:$4 sm:$0xff]  }
 0x19b   :  { %4281 = vmatpush1.bf16.msra.mxu0 %v8662_v26  ;;  %4767 = vmatpush1.bf16.msra.mxu1 %v8665_v27  ;;  %v8683_v26 = vld [vmem:[#allocation10 + $0x648] ss:$16 sps:$4 sm:$0xff]   ;;  %v8688_v27 = vld [vmem:[#allocation10 + $0xa64] ss:$16 sps:$4 sm:$0xff]  }
 0x19c   :  { %4331 = vmatprep.subr.bf16.mxu0 %v8670_v33  ;;  %4817 = vmatprep.subr.bf16.mxu1 %v8673_v34  ;;  %v8691_v33 = vld [vmem:[#allocation10 + $0x66c] ss:$16 sps:$4 sm:$0xff]  }
 0x19e   :  { %4283 = vmatmul.mubr.bf16.vlgmr.msra.gmra.mrb[20].mxu0 %v10080_v39  ;;  %4769 = vmatmul.mubr.bf16.vlgmr.msra.gmra.mrb[0].mxu1 %v9952_v32  ;;  %v442_v32 = vld [vmem:[#allocation2 + $0x120] sm:$0xff] }
 0x19f   :  { %4332 = vmatpush1.bf16.msra.mxu0 %v8668_v29  ;;  %4818 = vmatpush1.bf16.msra.mxu1 %v8671_v46  ;;  %v10098_v34 = vcombine.high %v442_v32, %v450_v18  ;;  %v8686_v29 = vld [vmem:[#allocation10 + $0xa60] ss:$16 sps:$4 sm:$0xff]   ;;  %v10104_v46 = vcombine.low %v442_v32, %v450_v18 }
 0x1a0   :  { %4333 = vmatprep.subr.bf16.mxu0 %v8676_v52  ;;  %4819 = vmatprep.subr.bf16.mxu1 %v8679_v49  ;;  %v8692_v52 = vld [vmem:[#allocation10 + $0xa80] ss:$16 sps:$4 sm:$0xff]  }
 0x1a1   :  { %4292 = vmatprep.mubr.bf16.mxu0 %v10086_v44  ;;  %4778 = vmatprep.mubr.bf16.mxu1 %v9954_v40  ;;  %v8689_v40 = vld [vmem:[#allocation10 + $0x668] ss:$16 sps:$4 sm:$0xff]   ;;  %v458_v49 = vld [vmem:[#allocation2 + $0x1a0] sm:$0xff] }
 0x1a3   :  { %4334 = vmatpush1.bf16.msra.mxu0 %v8674_v20  ;;  %4820 = vmatpush1.bf16.msra.mxu1 %v8677_v59  ;;  %v466_v20 = vld [vmem:[#allocation2 + $0x1e0] sm:$0xff] }
 0x1a4   :  { %4335 = vmatprep.subr.bf16.mxu0 %v8682_v9  ;;  %4821 = vmatprep.subr.bf16.mxu1 %v8685_v12  ;;  %v10106_v59 = vcombine.high %v458_v49, %v466_v20  ;;  %v8709_v9 = vld [vmem:[#allocation10 + $0x6cc] ss:$16 sps:$4 sm:$0xff]   ;;  %v10115_v18 = vcombine.low %v458_v49, %v466_v20  ;;  %v8713_v49 = vld [vmem:[#allocation10 + $0x6e8] ss:$16 sps:$4 sm:$0xff]  }
 0x1a5   :  { %v8723_v20 = vld [vmem:[#allocation10 + $0x70c] ss:$16 sps:$4 sm:$0xff]  }
 0x1a6   :  { %4293 = vmatmul.mubr.bf16.gmra.mrb[24].mxu0 %v10096_v15  ;;  %4779 = vmatmul.mubr.bf16.gmra.mrb[4].mxu1 %v9960_v53  ;;  %v8695_v53 = vld [vmem:[#allocation10 + $0x688] ss:$16 sps:$4 sm:$0xff]  }
 0x1a7   :  { %4336 = vmatpush1.bf16.msra.mxu0 %v8680_v14  ;;  %4822 = vmatpush1.bf16.msra.mxu1 %v8683_v26  ;;  %v474_v26 = vld [vmem:[#allocation2 + $0x220] sm:$0xff] }
 0x1a8   :  { %4337 = vmatprep.subr.bf16.mxu0 %v8688_v27  ;;  %4823 = vmatprep.subr.bf16.mxu1 %v8691_v33 }
 0x1a9   :  { %4302 = vmatprep.mubr.bf16.mxu0 %v10098_v34  ;;  %4788 = vmatprep.mubr.bf16.mxu1 %v9962_v58  ;;  %v8701_v58 = vld [vmem:[#allocation10 + $0x6a8] ss:$16 sps:$4 sm:$0xff]  }
 0x1ab   :  { %4338 = vmatpush1.bf16.msra.mxu0 %v8686_v29  ;;  %4824 = vmatpush1.bf16.msra.mxu1 %v8689_v40  ;;  %v8707_v29 = vld [vmem:[#allocation10 + $0x6c8] ss:$16 sps:$4 sm:$0xff]   ;;  %v8712_v40 = vld [vmem:[#allocation10 + $0xae4] ss:$16 sps:$4 sm:$0xff]  }
 0x1ac   :  { %4339 = vmatprep.subr.bf16.mxu0 %v8694_v36  ;;  %4825 = vmatprep.subr.bf16.mxu1 %v8697_v45 }
 0x1ae   :  { %4303 = vmatmul.mubr.bf16.gmra.mrb[28].mxu0 %v10104_v46  ;;  %4789 = vmatmul.mubr.bf16.gmra.mrb[8].mxu1 %v9968_v3  ;;  %v8704_v3 = vld [vmem:[#allocation10 + $0xac0] ss:$16 sps:$4 sm:$0xff]  }
 0x1af   :  { %4340 = vmatpush1.bf16.msra.mxu0 %v8692_v52  ;;  %4826 = vmatpush1.bf16.msra.mxu1 %v8695_v53  ;;  %v10126_v52 = vcombine.high %v474_v26, %v474_v26 }
 0x1b0   :  { %4341 = vmatprep.subr.bf16.mxu0 %v8700_v22  ;;  %4827 = vmatprep.subr.bf16.mxu1 %v8703_v57  ;;  %v10132_v22 = vld [vmem:[#allocation2 + $0x28] sm:$0xff]  ;;  %v10134_v57 = vcombine.low %v474_v26, %v474_v26 }
 0x1b1   :  { %v3960_v12 = vpop.f32.mrb[20].mxu1  ;;  %4312 = vmatprep.mubr.bf16.mxu0 %v10106_v59  ;;  %4798 = vmatprep.mubr.bf16.mxu1 %v9970_v23 }
 0x1b2   :  { %v10113_v14 = vadd.f32 %v3960_v12, %v10024_v1  ;;  %v3962_v32 = vpop.f32.mrb[21].mxu1  ;;  %v8715_v1 = vld [vmem:[#allocation10 + $0x6ec] ss:$16 sps:$4 sm:$0xff]  }
 0x1b3   :  { %v10118_v27 = vadd.f32 %v3962_v32, %v10028_v60  ;;  %v3964_v33 = vpop.f32.mrb[22].mxu1  ;;  %4342 = vmatpush1.bf16.msra.mxu0 %v8698_v63  ;;  %4828 = vmatpush1.bf16.msra.mxu1 %v8701_v58  ;;  %v8710_v60 = vld [vmem:[#allocation10 + $0xae0] ss:$16 sps:$4 sm:$0xff]   ;;  %v10139_v58 = vld [vmem:[#allocation2 + $0x68] sm:$0xff]  ;;  %v8729_v32 = vld [vmem:[#allocation10 + $0x72c] ss:$16 sps:$4 sm:$0xff]  }
 0x1b4   :  { %v10121_v36 = vadd.f32 %v3964_v33, %v10030_v8  ;;  %v3966_v23 = vpop.f32.mrb[23].mxu1  ;;  %4343 = vmatprep.subr.bf16.mxu0 %v8706_v17  ;;  %4829 = vmatprep.subr.bf16.mxu1 %v8709_v9  ;;  %v8720_v8 = vld [vmem:[#allocation10 + $0xb04] ss:$16 sps:$4 sm:$0xff]   ;;  %v8721_v17 = vld [vmem:[#allocation10 + $0x708] ss:$16 sps:$4 sm:$0xff]   ;;  %v10152_v33 = vcombine.high %v10132_v22, %v10139_v58 }
 0x1b5   :  { %v10124_v45 = vadd.f32 %v3966_v23, %v10032_v5  ;;  %v8718_v5 = vld [vmem:[#allocation10 + $0xb00] ss:$16 sps:$4 sm:$0xff]  }
 0x1b6   :  { %4313 = vmatmul.mubr.bf16.gmra.mrb[32].mxu0 %v10115_v18  ;;  %4799 = vmatmul.mubr.bf16.gmra.mrb[12].mxu1 %v9976_v10 }
 0x1b7   :  { %4344 = vmatpush1.bf16.msra.mxu0 %v8704_v3  ;;  %4830 = vmatpush1.bf16.msra.mxu1 %v8707_v29  ;;  %v8727_v29 = vld [vmem:[#allocation10 + $0x728] ss:$16 sps:$4 sm:$0xff]  }
 0x1b8   :  { %4345 = vmatprep.subr.bf16.mxu0 %v8712_v40  ;;  %4831 = vmatprep.subr.bf16.mxu1 %v8715_v1  ;;  %v8732_v40 = vld [vmem:[#allocation10 + $0xb44] ss:$16 sps:$4 sm:$0xff]   ;;  %v8733_v1 = vld [vmem:[#allocation10 + $0x748] ss:$16 sps:$4 sm:$0xff]  }
 0x1b9   :  { %4322 = vmatprep.mubr.bf16.mxu0 %v10126_v52  ;;  %4808 = vmatprep.mubr.bf16.mxu1 %v9978_v21  ;;  %v3970_v53 = vpop.f32.mrb[24].mxu1  ;;  %v8726_v21 = vld [vmem:[#allocation10 + $0xb24] ss:$16 sps:$4 sm:$0xff]  }
 0x1ba   :  { %v10137_v10 = vadd.f32 %v3970_v53, %v10054_v41  ;;  %v3972_v63 = vpop.f32.mrb[25].mxu1 }
 0x1bb   :  { %4346 = vmatpush1.bf16.msra.mxu0 %v8710_v60  ;;  %4832 = vmatpush1.bf16.msra.mxu1 %v8713_v49  ;;  %v10142_v9 = vadd.f32 %v3972_v63, %v10056_v47  ;;  %v3974_v12 = vpop.f32.mrb[26].mxu1  ;;  %v8724_v47 = vld [vmem:[#allocation10 + $0xb20] ss:$16 sps:$4 sm:$0xff]  }
 0x1bc   :  { %4347 = vmatprep.subr.bf16.mxu0 %v8720_v8  ;;  %4833 = vmatprep.subr.bf16.mxu1 %v8723_v20  ;;  %v10145_v3 = vadd.f32 %v3974_v12, %v10058_v48  ;;  %v3976_v26 = vpop.f32.mrb[27].mxu1  ;;  %v8735_v48 = vld [vmem:[#allocation10 + $0x74c] ss:$16 sps:$4 sm:$0xff]   ;;  %v8744_v12 = vld [vmem:[#allocation10 + $0xb84] ss:$16 sps:$4 sm:$0xff]  }
 0x1bd   :  { %v10148_v41 = vadd.f32 %v3976_v26, %v10060_v43  ;;  %v8730_v43 = vld [vmem:[#allocation10 + $0xb40] ss:$16 sps:$4 sm:$0xff]   ;;  %v8745_v26 = vld [vmem:[#allocation10 + $0x788] ss:$16 sps:$4 sm:$0xff]  }
 0x1be   :  { %4323 = vmatmul.mubr.bf16.gmra.mrb[48].mxu0 %v10134_v57  ;;  %4809 = vmatmul.mubr.bf16.gmra.mrb[48].mxu1 %v9984_v31  ;;  %v8738_v31 = vld [vmem:[#allocation10 + $0xb64] ss:$16 sps:$4 sm:$0xff]  }
 0x1bf   :  { %4348 = vmatpush1.bf16.msra.mxu0 %v8718_v5  ;;  %4834 = vmatpush1.bf16.msra.mxu1 %v8721_v17  ;;  %v8741_v5 = vld [vmem:[#allocation10 + $0x76c] ss:$16 sps:$4 sm:$0xff]   ;;  %v8739_v17 = vld [vmem:[#allocation10 + $0x768] ss:$16 sps:$4 sm:$0xff]  }
 0x1c0   :  { %4349 = vmatprep.subr.bf16.mxu0 %v8726_v21  ;;  %4835 = vmatprep.subr.bf16.mxu1 %v8729_v32  ;;  %v8742_v32 = vld [vmem:[#allocation10 + $0xb80] ss:$16 sps:$4 sm:$0xff]  }
 0x1c1   :  { %v3980_v23 = vpop.f32.mrb[28].mxu1  ;;  %4363 = vmatprep.mubr.bf16.mxu0 %v10152_v33  ;;  %4849 = vmatprep.mubr.bf16.mxu1 %v9992_v38 }
 0x1c2   :  { %v10159_v60 = vadd.f32 %v3980_v23, %v10062_v24  ;;  %v3982_v49 = vpop.f32.mrb[29].mxu1  ;;  %v8736_v24 = vld [vmem:[#allocation10 + $0xb60] ss:$16 sps:$4 sm:$0xff]  }
 0x1c3   :  { %4350 = vmatpush1.bf16.msra.mxu0 %v8724_v47  ;;  %4836 = vmatpush1.bf16.msra.mxu1 %v8727_v29  ;;  %v10162_v8 = vadd.f32 %v3982_v49, %v10064_v6  ;;  %v3984_v20 = vpop.f32.mrb[30].mxu1  ;;  %v8747_v6 = vld [vmem:[#allocation10 + $0x78c] ss:$16 sps:$4 sm:$0xff]   ;;  %v8750_v29 = vld [vmem:[#allocation10 + $0xba4] ss:$16 sps:$4 sm:$0xff]  }
 0x1c4   :  { %4351 = vmatprep.subr.bf16.mxu0 %v8732_v40  ;;  %4837 = vmatprep.subr.bf16.mxu1 %v8735_v48  ;;  %v10165_v53 = vadd.f32 %v3984_v20, %v10066_v62  ;;  %v3986_v38 = vpop.f32.mrb[31].mxu1  ;;  %v8753_v48 = vld [vmem:[#allocation10 + $0x7ac] ss:$16 sps:$4 sm:$0xff]   ;;  %v8751_v49 = vld [vmem:[#allocation10 + $0x7a8] ss:$16 sps:$4 sm:$0xff]  }
 0x1c5   :  { %v10168_v63 = vadd.f32 %v3986_v38, %v10068_v7  ;;  %v8754_v38 = vld [vmem:[#allocation10 + $0xbc0] ss:$16 sps:$4 sm:$0xff]  }
 0x1c7   :  { %4352 = vmatpush1.bf16.msra.mxu0 %v8730_v43  ;;  %4838 = vmatpush1.bf16.msra.mxu1 %v8733_v1 }
 0x1c8   :  { %4353 = vmatprep.subr.bf16.mxu0 %v8738_v31  ;;  %4839 = vmatprep.subr.bf16.mxu1 %v8741_v5  ;;  %v8756_v31 = vld [vmem:[#allocation10 + $0xbc4] ss:$16 sps:$4 sm:$0xff]  }
 0x1c9   :  { %v3990_v21 = vpop.f32.mrb[32].mxu1 }
 0x1ca   :  { %v10171_v47 = vadd.f32 %v3990_v21, %v10070_v19  ;;  %v3992_v62 = vpop.f32.mrb[33].mxu1  ;;  %v8748_v19 = vld [vmem:[#allocation10 + $0xba0] ss:$16 sps:$4 sm:$0xff]  }
 0x1cb   :  { %4354 = vmatpush1.bf16.msra.mxu0 %v8736_v24  ;;  %4840 = vmatpush1.bf16.msra.mxu1 %v8739_v17  ;;  %v10174_v7 = vadd.f32 %v3992_v62, %v10072_v16  ;;  %v3994_v40 = vpop.f32.mrb[34].mxu1  ;;  %v8759_v16 = vld [vmem:[#allocation10 + $0x7cc] ss:$16 sps:$4 sm:$0xff]  }
 0x1cc   :  { %4355 = vmatprep.subr.bf16.mxu0 %v8744_v12  ;;  %4841 = vmatprep.subr.bf16.mxu1 %v8747_v6  ;;  %v10177_v23 = vadd.f32 %v3994_v40, %v10074_v30  ;;  %v3996_v43 = vpop.f32.mrb[35].mxu1  ;;  %v8757_v12 = vld [vmem:[#allocation10 + $0x7c8] ss:$16 sps:$4 sm:$0xff]  }
 0x1cd   :  { %v10180_v1 = vadd.f32 %v3996_v43, %v10076_v37  ;;  %v8763_v43 = vld [vmem:[#allocation10 + $0x7e8] ss:$16 sps:$4 sm:$0xff]  }
 0x1cf   :  { %4356 = vmatpush1.bf16.msra.mxu0 %v8742_v32  ;;  %4842 = vmatpush1.bf16.msra.mxu1 %v8745_v26  ;;  %v8762_v32 = vld [vmem:[#allocation10 + $0xbe4] ss:$16 sps:$4 sm:$0xff]   ;;  %v8765_v26 = vld [vmem:[#allocation10 + $0x7ec] ss:$16 sps:$4 sm:$0xff]  }
 0x1d0   :  { %4357 = vmatprep.subr.bf16.mxu0 %v8750_v29  ;;  %4843 = vmatprep.subr.bf16.mxu1 %v8753_v48 }
 0x1d1   :  { %v4000_v20 = vpop.f32.mrb[36].mxu1  ;;  %v4081_v5 = vpop.f32.mrb[36].mxu0 }
 0x1d2   :  { %v4001_v24 = vadd.f32 %v4000_v20, %v10084_v50  ;;  %v4002_v17 = vpop.f32.mrb[37].mxu1  ;;  %v4083_v30 = vpop.f32.mrb[37].mxu0  ;;  %v8760_v50 = vld [vmem:[#allocation10 + $0xbe0] ss:$16 sps:$4 sm:$0xff]   ;;  %v8769_v20 = vld [vmem:[#allocation10 + $0x808] ss:$16 sps:$4 sm:$0xff]  }
 0x1d3   :  { %4358 = vmatpush1.bf16.msra.mxu0 %v8748_v19  ;;  %4844 = vmatpush1.bf16.msra.mxu1 %v8751_v49  ;;  %v4003_v37 = vadd.f32 %v4002_v17, %v10090_v56  ;;  %v4004_v6 = vpop.f32.mrb[38].mxu1  ;;  %v4085_v21 = vpop.f32.mrb[38].mxu0  ;;  %v8768_v19 = vld [vmem:[#allocation10 + $0xc04] ss:$16 sps:$4 sm:$0xff]   ;;  %v8771_v56 = vld [vmem:[#allocation10 + $0x80c] ss:$16 sps:$4 sm:$0xff]  }
 0x1d4   :  { %4359 = vmatprep.subr.bf16.mxu0 %v8756_v31  ;;  %4845 = vmatprep.subr.bf16.mxu1 %v8759_v16  ;;  %v10184_v62 = vadd.f32 %v4081_v5, %v4001_v24  ;;  %v4005_v29 = vpop.f32.mrb[39].mxu1  ;;  %v4086_v40 = vpop.f32.mrb[39].mxu0  ;;  %v8766_v49 = vld [vmem:[#allocation10 + $0xc00] ss:$16 sps:$4 sm:$0xff]   ;;  %v10190_v31 = vcombine.low %v10132_v22, %v10139_v58  ;;  %v8774_v16 = vld [vmem:[#allocation10 + $0xc24] ss:$16 sps:$4 sm:$0xff]  }
 0x1d5   :  { %v10186_v48 = vadd.f32 %v4083_v30, %v4003_v37  ;;  %v427_v5 = vld [vmem:[#allocation2 + $0xa8] sm:$0xff]  ;;  %v8772_v17 = vld [vmem:[#allocation10 + $0xc20] ss:$16 sps:$4 sm:$0xff]   ;;  %v8783_v58 = vld [vmem:[#allocation10 + $0x84c] ss:$16 sps:$4 sm:$0xff]  }
 0x1d6   :  { %v435_v24 = vld [vmem:[#allocation2 + $0xe8] sm:$0xff]  ;;  %v8778_v37 = vld [vmem:[#allocation10 + $0xc40] ss:$16 sps:$4 sm:$0xff]  }
 0x1d7   :  { %4360 = vmatpush1.bf16.msra.mxu0 %v8754_v38  ;;  %4846 = vmatpush1.bf16.msra.mxu1 %v8757_v12  ;;  %v8777_v38 = vld [vmem:[#allocation10 + $0x82c] ss:$16 sps:$4 sm:$0xff]   ;;  %v8775_v30 = vld [vmem:[#allocation10 + $0x828] ss:$16 sps:$4 sm:$0xff]   ;;  %v10192_v12 = vcombine.high %v427_v5, %v435_v24  ;;  %v8780_v22 = vld [vmem:[#allocation10 + $0xc44] ss:$16 sps:$4 sm:$0xff]   ;;  %v10198_v21 = vcombine.low %v427_v5, %v435_v24 }
 0x1d8   :  { %4361 = vmatprep.subr.bf16.mxu0 %v8762_v32  ;;  %4847 = vmatprep.subr.bf16.mxu1 %v8765_v26  ;;  %v8781_v6 = vld [vmem:[#allocation10 + $0x848] ss:$16 sps:$4 sm:$0xff]   ;;  %v8786_v32 = vld [vmem:[#allocation10 + $0xc64] ss:$16 sps:$4 sm:$0xff]   ;;  %v8784_v40 = vld [vmem:[#allocation10 + $0xc60] ss:$16 sps:$4 sm:$0xff]  }
 0x1d9   :  { %v443_v26 = vld [vmem:[#allocation2 + $0x128] sm:$0xff] }
 0x1da   :  { %v451_v29 = vld [vmem:[#allocation2 + $0x168] sm:$0xff] }
 0x1db   :  { %4362 = vmatpush1.bf16.msra.mxu0 %v8760_v50  ;;  %4848 = vmatpush1.bf16.msra.mxu1 %v8763_v43  ;;  %v8787_v50 = vld [vmem:[#allocation10 + $0x868] ss:$16 sps:$4 sm:$0xff]   ;;  %v10200_v43 = vcombine.high %v443_v26, %v451_v29 }
 0x1dc   :  { %4412 = vmatprep.subr.bf16.mxu0 %v8768_v19  ;;  %4898 = vmatprep.subr.bf16.mxu1 %v8771_v56  ;;  %v8795_v19 = vld [vmem:[#allocation10 + $0x88c] ss:$16 sps:$4 sm:$0xff]   ;;  %v8790_v56 = vld [vmem:[#allocation10 + $0xc80] ss:$16 sps:$4 sm:$0xff]   ;;  %v459_v5 = vld [vmem:[#allocation2 + $0x1a8] sm:$0xff] }
 0x1dd   :  { %v467_v24 = vld [vmem:[#allocation2 + $0x1e8] sm:$0xff] }
 0x1de   :  { %4364 = vmatmul.mubr.bf16.vlgmr.msra.gmra.mrb[20].mxu0 %v10190_v31  ;;  %4850 = vmatmul.mubr.bf16.vlgmr.msra.gmra.mrb[0].mxu1 %v10000_v11  ;;  %v8789_v11 = vld [vmem:[#allocation10 + $0x86c] ss:$16 sps:$4 sm:$0xff]  }
 0x1df   :  { %4413 = vmatpush1.bf16.msra.mxu0 %v8766_v49  ;;  %4899 = vmatpush1.bf16.msra.mxu1 %v8769_v20  ;;  %v8793_v49 = vld [vmem:[#allocation10 + $0x888] ss:$16 sps:$4 sm:$0xff]   ;;  %v10206_v20 = vcombine.low %v443_v26, %v451_v29  ;;  %v8808_v29 = vld [vmem:[#allocation10 + $0xce0] ss:$16 sps:$4 sm:$0xff]  }
 0x1e0   :  { %4414 = vmatprep.subr.bf16.mxu0 %v8774_v16  ;;  %4900 = vmatprep.subr.bf16.mxu1 %v8777_v38  ;;  %v8798_v16 = vld [vmem:[#allocation10 + $0xca4] ss:$16 sps:$4 sm:$0xff]   ;;  %v8796_v38 = vld [vmem:[#allocation10 + $0xca0] ss:$16 sps:$4 sm:$0xff]  }
 0x1e1   :  { %4373 = vmatprep.mubr.bf16.mxu0 %v10192_v12  ;;  %4859 = vmatprep.mubr.bf16.mxu1 %v10002_v25  ;;  %v8792_v25 = vld [vmem:[#allocation10 + $0xc84] ss:$16 sps:$4 sm:$0xff]  }
 0x1e2   :  { %v475_v26 = vld [vmem:[#allocation2 + $0x228] sm:$0xff] }
 0x1e3   :  { %4415 = vmatpush1.bf16.msra.mxu0 %v8772_v17  ;;  %4901 = vmatpush1.bf16.msra.mxu1 %v8775_v30  ;;  %v8799_v17 = vld [vmem:[#allocation10 + $0x8a8] ss:$16 sps:$4 sm:$0xff]   ;;  %v10208_v30 = vcombine.high %v459_v5, %v467_v24 }
 0x1e4   :  { %4416 = vmatprep.subr.bf16.mxu0 %v8780_v22  ;;  %4902 = vmatprep.subr.bf16.mxu1 %v8783_v58  ;;  %v8807_v22 = vld [vmem:[#allocation10 + $0x8cc] ss:$16 sps:$4 sm:$0xff]   ;;  %v8802_v58 = vld [vmem:[#allocation10 + $0xcc0] ss:$16 sps:$4 sm:$0xff]  }
 0x1e6   :  { %4374 = vmatmul.mubr.bf16.gmra.mrb[24].mxu0 %v10198_v21  ;;  %4860 = vmatmul.mubr.bf16.gmra.mrb[4].mxu1 %v10008_v35  ;;  %v8801_v35 = vld [vmem:[#allocation10 + $0x8ac] ss:$16 sps:$4 sm:$0xff]  }
 0x1e7   :  { %4417 = vmatpush1.bf16.msra.mxu0 %v8778_v37  ;;  %4903 = vmatpush1.bf16.msra.mxu1 %v8781_v6  ;;  %v8805_v37 = vld [vmem:[#allocation10 + $0x8c8] ss:$16 sps:$4 sm:$0xff]   ;;  %v10214_v6 = vcombine.low %v459_v5, %v467_v24  ;;  %v10226_v5 = vld [vmem:[#allocation2 + $0x70] sm:$0xff] }
 0x1e8   :  { %4418 = vmatprep.subr.bf16.mxu0 %v8786_v32  ;;  %4904 = vmatprep.subr.bf16.mxu1 %v8789_v11  ;;  %v8810_v32 = vld [vmem:[#allocation10 + $0xce4] ss:$16 sps:$4 sm:$0xff]   ;;  %v8811_v11 = vld [vmem:[#allocation10 + $0x8e8] ss:$16 sps:$4 sm:$0xff]   ;;  %v8822_v24 = vld [vmem:[#allocation10 + $0xd20] ss:$16 sps:$4 sm:$0xff]  }
 0x1e9   :  { %4383 = vmatprep.mubr.bf16.mxu0 %v10200_v43  ;;  %4869 = vmatprep.mubr.bf16.mxu1 %v10010_v42  ;;  %v8804_v42 = vld [vmem:[#allocation10 + $0xcc4] ss:$16 sps:$4 sm:$0xff]  }
 0x1eb   :  { %4419 = vmatpush1.bf16.msra.mxu0 %v8784_v40  ;;  %4905 = vmatpush1.bf16.msra.mxu1 %v8787_v50  ;;  %v10216_v40 = vcombine.high %v475_v26, %v475_v26  ;;  %v8821_v50 = vld [vmem:[#allocation10 + $0x90c] ss:$16 sps:$4 sm:$0xff]  }
 0x1ec   :  { %4420 = vmatprep.subr.bf16.mxu0 %v8792_v25  ;;  %4906 = vmatprep.subr.bf16.mxu1 %v8795_v19  ;;  %v10220_v25 = vld [vmem:[#allocation2 + $0x30] sm:$0xff] }
 0x1ed   :  { %v8816_v19 = vld [vmem:[#allocation10 + $0xd00] ss:$16 sps:$4 sm:$0xff]  }
 0x1ee   :  { %4384 = vmatmul.mubr.bf16.gmra.mrb[28].mxu0 %v10206_v20  ;;  %4870 = vmatmul.mubr.bf16.gmra.mrb[8].mxu1 %v10016_v55  ;;  %v8813_v55 = vld [vmem:[#allocation10 + $0x8ec] ss:$16 sps:$4 sm:$0xff]  }
 0x1ef   :  { %4421 = vmatpush1.bf16.msra.mxu0 %v8790_v56  ;;  %4907 = vmatpush1.bf16.msra.mxu1 %v8793_v49  ;;  %v8819_v56 = vld [vmem:[#allocation10 + $0x908] ss:$16 sps:$4 sm:$0xff]   ;;  %v10224_v49 = vcombine.low %v475_v26, %v475_v26  ;;  %v8842_v26 = vld [vmem:[#allocation10 + $0xd84] ss:$16 sps:$4 sm:$0xff]  }
 0x1f0   :  { %4422 = vmatprep.subr.bf16.mxu0 %v8798_v16  ;;  %4908 = vmatprep.subr.bf16.mxu1 %v8801_v35  ;;  %v8824_v16 = vld [vmem:[#allocation10 + $0xd24] ss:$16 sps:$4 sm:$0xff]   ;;  %v8825_v35 = vld [vmem:[#allocation10 + $0x928] ss:$16 sps:$4 sm:$0xff]  }
 0x1f1   :  { %4393 = vmatprep.mubr.bf16.mxu0 %v10208_v30  ;;  %4879 = vmatprep.mubr.bf16.mxu1 %v10018_v51  ;;  %v8818_v51 = vld [vmem:[#allocation10 + $0xd04] ss:$16 sps:$4 sm:$0xff]  }
 0x1f3   :  { %4423 = vmatpush1.bf16.msra.mxu0 %v8796_v38  ;;  %4909 = vmatpush1.bf16.msra.mxu1 %v8799_v17  ;;  %v10230_v38 = vcombine.high %v10220_v25, %v10226_v5  ;;  %v8833_v17 = vld [vmem:[#allocation10 + $0x94c] ss:$16 sps:$4 sm:$0xff]  }
 0x1f4   :  { %4424 = vmatprep.subr.bf16.mxu0 %v8804_v42  ;;  %4910 = vmatprep.subr.bf16.mxu1 %v8807_v22  ;;  %v8828_v42 = vld [vmem:[#allocation10 + $0xd40] ss:$16 sps:$4 sm:$0xff]   ;;  %v8831_v22 = vld [vmem:[#allocation10 + $0x948] ss:$16 sps:$4 sm:$0xff]  }
 0x1f6   :  { %4394 = vmatmul.mubr.bf16.gmra.mrb[32].mxu0 %v10214_v6  ;;  %4880 = vmatmul.mubr.bf16.gmra.mrb[12].mxu1 %v10026_v4  ;;  %v8827_v4 = vld [vmem:[#allocation10 + $0x92c] ss:$16 sps:$4 sm:$0xff]  }
 0x1f7   :  { %4425 = vmatpush1.bf16.msra.mxu0 %v8802_v58  ;;  %4911 = vmatpush1.bf16.msra.mxu1 %v8805_v37  ;;  %v8836_v58 = vld [vmem:[#allocation10 + $0xd64] ss:$16 sps:$4 sm:$0xff]   ;;  %v8839_v37 = vld [vmem:[#allocation10 + $0x96c] ss:$16 sps:$4 sm:$0xff]  }
 0x1f8   :  { %4426 = vmatprep.subr.bf16.mxu0 %v8810_v32  ;;  %4912 = vmatprep.subr.bf16.mxu1 %v8813_v55  ;;  %v8834_v32 = vld [vmem:[#allocation10 + $0xd60] ss:$16 sps:$4 sm:$0xff]   ;;  %v8845_v55 = vld [vmem:[#allocation10 + $0x98c] ss:$16 sps:$4 sm:$0xff]  }
 0x1f9   :  { %4403 = vmatprep.mubr.bf16.mxu0 %v10216_v40  ;;  %4889 = vmatprep.mubr.bf16.mxu1 %v10034_v13  ;;  %v8830_v13 = vld [vmem:[#allocation10 + $0xd44] ss:$16 sps:$4 sm:$0xff]  }
 0x1fb   :  { %4427 = vmatpush1.bf16.msra.mxu0 %v8808_v29  ;;  %4913 = vmatpush1.bf16.msra.mxu1 %v8811_v11  ;;  %v8840_v29 = vld [vmem:[#allocation10 + $0xd80] ss:$16 sps:$4 sm:$0xff]   ;;  %v8843_v11 = vld [vmem:[#allocation10 + $0x988] ss:$16 sps:$4 sm:$0xff]  }
 0x1fc   :  { %4428 = vmatprep.subr.bf16.mxu0 %v8818_v51  ;;  %4914 = vmatprep.subr.bf16.mxu1 %v8821_v50  ;;  %v8848_v51 = vld [vmem:[#allocation10 + $0xda4] ss:$16 sps:$4 sm:$0xff]   ;;  %v8846_v50 = vld [vmem:[#allocation10 + $0xda0] ss:$16 sps:$4 sm:$0xff]  }
 0x1fe   :  { %4404 = vmatmul.mubr.bf16.gmra.mrb[52].mxu0 %v10224_v49  ;;  %4890 = vmatmul.mubr.bf16.gmra.mrb[52].mxu1 %v10042_v0  ;;  %v8837_v0 = vld [vmem:[#allocation10 + $0x968] ss:$16 sps:$4 sm:$0xff]  }
 0x1ff   :  { %4429 = vmatpush1.bf16.msra.mxu0 %v8816_v19  ;;  %4915 = vmatpush1.bf16.msra.mxu1 %v8819_v56  ;;  %v8849_v19 = vld [vmem:[#allocation10 + $0x9a8] ss:$16 sps:$4 sm:$0xff]   ;;  %v8854_v56 = vld [vmem:[#allocation10 + $0xdc4] ss:$16 sps:$4 sm:$0xff]  }
 0x200   :  { %4430 = vmatprep.subr.bf16.mxu0 %v8824_v16  ;;  %4916 = vmatprep.subr.bf16.mxu1 %v8827_v4  ;;  %v8857_v16 = vld [vmem:[#allocation10 + $0x9cc] ss:$16 sps:$4 sm:$0xff]  }
 0x201   :  { %4444 = vmatprep.mubr.bf16.mxu0 %v10230_v38  ;;  %4930 = vmatprep.mubr.bf16.mxu1 %v10048_v28  ;;  %v8851_v28 = vld [vmem:[#allocation10 + $0x9ac] ss:$16 sps:$4 sm:$0xff]  }
 0x203   :  { %4431 = vmatpush1.bf16.msra.mxu0 %v8822_v24  ;;  %4917 = vmatpush1.bf16.msra.mxu1 %v8825_v35  ;;  %v8852_v35 = vld [vmem:[#allocation10 + $0xdc0] ss:$16 sps:$4 sm:$0xff]  }
 0x204   :  { %4432 = vmatprep.subr.bf16.mxu0 %v8830_v13  ;;  %4918 = vmatprep.subr.bf16.mxu1 %v8833_v17  ;;  %v8855_v13 = vld [vmem:[#allocation10 + $0x9c8] ss:$16 sps:$4 sm:$0xff]  }
 0x207   :  { %4433 = vmatpush1.bf16.msra.mxu0 %v8828_v42  ;;  %4919 = vmatpush1.bf16.msra.mxu1 %v8831_v22 }
 0x208   :  { %4434 = vmatprep.subr.bf16.mxu0 %v8836_v58  ;;  %4920 = vmatprep.subr.bf16.mxu1 %v8839_v37 }
 0x20b   :  { %4435 = vmatpush1.bf16.msra.mxu0 %v8834_v32  ;;  %4921 = vmatpush1.bf16.msra.mxu1 %v8837_v0  ;;  %v8860_v0 = vld [vmem:[#allocation10 + $0xde4] ss:$16 sps:$4 sm:$0xff]  }
 0x20c   :  { %4436 = vmatprep.subr.bf16.mxu0 %v8842_v26  ;;  %4922 = vmatprep.subr.bf16.mxu1 %v8845_v55  ;;  %v8863_v26 = vld [vmem:[#allocation10 + $0x9ec] ss:$16 sps:$4 sm:$0xff]  }
 0x20f   :  { %4437 = vmatpush1.bf16.msra.mxu0 %v8840_v29  ;;  %4923 = vmatpush1.bf16.msra.mxu1 %v8843_v11 }
 0x210   :  { %4438 = vmatprep.subr.bf16.mxu0 %v8848_v51  ;;  %4924 = vmatprep.subr.bf16.mxu1 %v8851_v28  ;;  %v8861_v51 = vld [vmem:[#allocation10 + $0x9e8] ss:$16 sps:$4 sm:$0xff]   ;;  %v8866_v28 = vld [vmem:[#allocation10 + $0xe04] ss:$16 sps:$4 sm:$0xff]  }
 0x211   :  { %v4162_v4 = vpop.f32.mrb[40].mxu0  ;;  %v4648_v24 = vpop.f32.mrb[40].mxu1 }
 0x212   :  { %v10237_v17 = vadd.f32 %v4162_v4, %v10184_v62  ;;  %v10240_v42 = vadd.f32 %v4648_v24, %v10082_v54  ;;  %v4164_v22 = vpop.f32.mrb[41].mxu0  ;;  %v4650_v58 = vpop.f32.mrb[41].mxu1  ;;  %v8858_v54 = vld [vmem:[#allocation10 + $0xde0] ss:$16 sps:$4 sm:$0xff]   ;;  %v10250_v24 = vcombine.low %v10220_v25, %v10226_v5 }
 0x213   :  { %v10243_v37 = vadd.f32 %v4164_v22, %v10186_v48  ;;  %v10246_v32 = vadd.f32 %v4650_v58, %v10088_v61  ;;  %4439 = vmatpush1.bf16.msra.mxu0 %v8846_v50  ;;  %4925 = vmatpush1.bf16.msra.mxu1 %v8849_v19  ;;  %v4652_v55 = vpop.f32.mrb[42].mxu1  ;;  %v4166_v29 = vpop.f32.mrb[42].mxu0  ;;  %v8869_v48 = vld [vmem:[#allocation10 + $0xa0c] ss:$16 sps:$4 sm:$0xff]   ;;  %v8864_v50 = vld [vmem:[#allocation10 + $0xe00] ss:$16 sps:$4 sm:$0xff]  }
 0x214   :  { %4440 = vmatprep.subr.bf16.mxu0 %v8854_v56  ;;  %4926 = vmatprep.subr.bf16.mxu1 %v8857_v16  ;;  %v4653_v62 = vpop.f32.mrb[43].mxu1  ;;  %v4167_v11 = vpop.f32.mrb[43].mxu0  ;;  %v428_v61 = vld [vmem:[#allocation2 + $0xb0] sm:$0xff]  ;;  %v8867_v19 = vld [vmem:[#allocation10 + $0xa08] ss:$16 sps:$4 sm:$0xff]  }
 0x215   :  { %v436_v4 = vld [vmem:[#allocation2 + $0xf0] sm:$0xff]  ;;  %v8872_v56 = vld [vmem:[#allocation10 + $0xe24] ss:$16 sps:$4 sm:$0xff]   ;;  %v8879_v55 = vld [vmem:[#allocation10 + $0xa48] ss:$16 sps:$4 sm:$0xff]  }
 0x216   :  { %v8875_v16 = vld [vmem:[#allocation10 + $0xa2c] ss:$16 sps:$4 sm:$0xff]   ;;  %v10252_v22 = vcombine.high %v428_v61, %v436_v4  ;;  %v8878_v58 = vld [vmem:[#allocation10 + $0xe44] ss:$16 sps:$4 sm:$0xff]   ;;  %v10258_v29 = vcombine.low %v428_v61, %v436_v4  ;;  %v8882_v11 = vld [vmem:[#allocation10 + $0xe60] ss:$16 sps:$4 sm:$0xff]  }
 0x217   :  { %4441 = vmatpush1.bf16.msra.mxu0 %v8852_v35  ;;  %4927 = vmatpush1.bf16.msra.mxu1 %v8855_v13  ;;  %v8870_v35 = vld [vmem:[#allocation10 + $0xe20] ss:$16 sps:$4 sm:$0xff]   ;;  %v8873_v13 = vld [vmem:[#allocation10 + $0xa28] ss:$16 sps:$4 sm:$0xff]   ;;  %v8884_v62 = vld [vmem:[#allocation10 + $0xe64] ss:$16 sps:$4 sm:$0xff]  }
 0x218   :  { %4442 = vmatprep.subr.bf16.mxu0 %v8860_v0  ;;  %4928 = vmatprep.subr.bf16.mxu1 %v8863_v26  ;;  %v8881_v0 = vld [vmem:[#allocation10 + $0xa4c] ss:$16 sps:$4 sm:$0xff]   ;;  %v8876_v26 = vld [vmem:[#allocation10 + $0xe40] ss:$16 sps:$4 sm:$0xff]  }
 0x219   :  { %v444_v25 = vld [vmem:[#allocation2 + $0x130] sm:$0xff] }
 0x21a   :  { %v452_v5 = vld [vmem:[#allocation2 + $0x170] sm:$0xff] }
 0x21b   :  { %4443 = vmatpush1.bf16.msra.mxu0 %v8858_v54  ;;  %4929 = vmatpush1.bf16.msra.mxu1 %v8861_v51  ;;  %v8885_v54 = vld [vmem:[#allocation10 + $0xa68] ss:$16 sps:$4 sm:$0xff]   ;;  %v10260_v51 = vcombine.high %v444_v25, %v452_v5  ;;  %v468_v61 = vld [vmem:[#allocation2 + $0x1f0] sm:$0xff] }
 0x21c   :  { %4493 = vmatprep.subr.bf16.mxu0 %v8866_v28  ;;  %4979 = vmatprep.subr.bf16.mxu1 %v8869_v48  ;;  %v8893_v28 = vld [vmem:[#allocation10 + $0xa8c] ss:$16 sps:$4 sm:$0xff]   ;;  %v8888_v4 = vld [vmem:[#allocation10 + $0xe80] ss:$16 sps:$4 sm:$0xff]  }
 0x21d   :  { %v460_v48 = vld [vmem:[#allocation2 + $0x1b0] sm:$0xff] }
 0x21e   :  { %4445 = vmatmul.mubr.bf16.vlgmr.msra.gmra.mrb[20].mxu0 %v10250_v24  ;;  %4931 = vmatmul.mubr.bf16.vlgmr.msra.gmra.mrb[0].mxu1 %v10080_v39  ;;  %v8887_v39 = vld [vmem:[#allocation10 + $0xa6c] ss:$16 sps:$4 sm:$0xff]  }
 0x21f   :  { %4494 = vmatpush1.bf16.msra.mxu0 %v8864_v50  ;;  %4980 = vmatpush1.bf16.msra.mxu1 %v8867_v19  ;;  %v8891_v50 = vld [vmem:[#allocation10 + $0xa88] ss:$16 sps:$4 sm:$0xff]   ;;  %v10266_v19 = vcombine.low %v444_v25, %v452_v5  ;;  %v8900_v25 = vld [vmem:[#allocation10 + $0xec0] ss:$16 sps:$4 sm:$0xff]  }
 0x220   :  { %4495 = vmatprep.subr.bf16.mxu0 %v8872_v56  ;;  %4981 = vmatprep.subr.bf16.mxu1 %v8875_v16  ;;  %v8896_v56 = vld [vmem:[#allocation10 + $0xea4] ss:$16 sps:$4 sm:$0xff]   ;;  %v8894_v16 = vld [vmem:[#allocation10 + $0xea0] ss:$16 sps:$4 sm:$0xff]   ;;  %v8903_v5 = vld [vmem:[#allocation10 + $0xac8] ss:$16 sps:$4 sm:$0xff]  }
 0x221   :  { %4454 = vmatprep.mubr.bf16.mxu0 %v10252_v22  ;;  %4940 = vmatprep.mubr.bf16.mxu1 %v10086_v44  ;;  %v8890_v44 = vld [vmem:[#allocation10 + $0xe84] ss:$16 sps:$4 sm:$0xff]  }
 0x223   :  { %4496 = vmatpush1.bf16.msra.mxu0 %v8870_v35  ;;  %4982 = vmatpush1.bf16.msra.mxu1 %v8873_v13  ;;  %v8897_v35 = vld [vmem:[#allocation10 + $0xaa8] ss:$16 sps:$4 sm:$0xff]   ;;  %v10268_v13 = vcombine.high %v460_v48, %v468_v61 }
 0x224   :  { %4497 = vmatprep.subr.bf16.mxu0 %v8878_v58  ;;  %4983 = vmatprep.subr.bf16.mxu1 %v8881_v0  ;;  %v8905_v58 = vld [vmem:[#allocation10 + $0xacc] ss:$16 sps:$4 sm:$0xff]  }
 0x225   :  { %v476_v0 = vld [vmem:[#allocation2 + $0x230] sm:$0xff] }
 0x226   :  { %4455 = vmatmul.mubr.bf16.gmra.mrb[24].mxu0 %v10258_v29  ;;  %4941 = vmatmul.mubr.bf16.gmra.mrb[4].mxu1 %v10096_v15  ;;  %v8899_v15 = vld [vmem:[#allocation10 + $0xaac] ss:$16 sps:$4 sm:$0xff]  }
 0x227   :  { %4498 = vmatpush1.bf16.msra.mxu0 %v8876_v26  ;;  %4984 = vmatpush1.bf16.msra.mxu1 %v8879_v55  ;;  %v10274_v26 = vcombine.low %v460_v48, %v468_v61  ;;  %v8908_v55 = vld [vmem:[#allocation10 + $0xee4] ss:$16 sps:$4 sm:$0xff]   ;;  %v8914_v48 = vld [vmem:[#allocation10 + $0xf00] ss:$16 sps:$4 sm:$0xff]   ;;  %v8917_v61 = vld [vmem:[#allocation10 + $0xb08] ss:$16 sps:$4 sm:$0xff]  }
 0x228   :  { %4499 = vmatprep.subr.bf16.mxu0 %v8884_v62  ;;  %4985 = vmatprep.subr.bf16.mxu1 %v8887_v39  ;;  %v8906_v62 = vld [vmem:[#allocation10 + $0xee0] ss:$16 sps:$4 sm:$0xff]   ;;  %v8909_v39 = vld [vmem:[#allocation10 + $0xae8] ss:$16 sps:$4 sm:$0xff]  }
 0x229   :  { %4464 = vmatprep.mubr.bf16.mxu0 %v10260_v51  ;;  %4950 = vmatprep.mubr.bf16.mxu1 %v10098_v34  ;;  %v8902_v34 = vld [vmem:[#allocation10 + $0xec4] ss:$16 sps:$4 sm:$0xff]  }
 0x22b   :  { %4500 = vmatpush1.bf16.msra.mxu0 %v8882_v11  ;;  %4986 = vmatpush1.bf16.msra.mxu1 %v8885_v54  ;;  %v10276_v11 = vcombine.high %v476_v0, %v476_v0  ;;  %v8919_v54 = vld [vmem:[#allocation10 + $0xb0c] ss:$16 sps:$4 sm:$0xff]  }
 0x22c   :  { %4501 = vmatprep.subr.bf16.mxu0 %v8890_v44  ;;  %4987 = vmatprep.subr.bf16.mxu1 %v8893_v28  ;;  %v10280_v44 = vld [vmem:[#allocation2 + $0x38] sm:$0xff] }
 0x22d   :  { %v10282_v28 = vld [vmem:[#allocation2 + $0x78] sm:$0xff] }
 0x22e   :  { %4465 = vmatmul.mubr.bf16.gmra.mrb[28].mxu0 %v10266_v19  ;;  %4951 = vmatmul.mubr.bf16.gmra.mrb[8].mxu1 %v10104_v46  ;;  %v8911_v46 = vld [vmem:[#allocation10 + $0xaec] ss:$16 sps:$4 sm:$0xff]  }
 0x22f   :  { %4502 = vmatpush1.bf16.msra.mxu0 %v8888_v4  ;;  %4988 = vmatpush1.bf16.msra.mxu1 %v8891_v50  ;;  %v10286_v4 = vcombine.low %v476_v0, %v476_v0  ;;  %v8922_v50 = vld [vmem:[#allocation10 + $0xf24] ss:$16 sps:$4 sm:$0xff]  }
 0x230   :  { %4503 = vmatprep.subr.bf16.mxu0 %v8896_v56  ;;  %4989 = vmatprep.subr.bf16.mxu1 %v8899_v15  ;;  %v8920_v56 = vld [vmem:[#allocation10 + $0xf20] ss:$16 sps:$4 sm:$0xff]   ;;  %v8923_v15 = vld [vmem:[#allocation10 + $0xb28] ss:$16 sps:$4 sm:$0xff]   ;;  %v8934_v0 = vld [vmem:[#allocation10 + $0xf64] ss:$16 sps:$4 sm:$0xff]  }
 0x231   :  { %4474 = vmatprep.mubr.bf16.mxu0 %v10268_v13  ;;  %4960 = vmatprep.mubr.bf16.mxu1 %v10106_v59  ;;  %v8916_v59 = vld [vmem:[#allocation10 + $0xf04] ss:$16 sps:$4 sm:$0xff]  }
 0x233   :  { %4504 = vmatpush1.bf16.msra.mxu0 %v8894_v16  ;;  %4990 = vmatpush1.bf16.msra.mxu1 %v8897_v35  ;;  %v10290_v16 = vcombine.high %v10280_v44, %v10282_v28  ;;  %v8931_v35 = vld [vmem:[#allocation10 + $0xb4c] ss:$16 sps:$4 sm:$0xff]  }
 0x234   :  { %4505 = vmatprep.subr.bf16.mxu0 %v8902_v34  ;;  %4991 = vmatprep.subr.bf16.mxu1 %v8905_v58  ;;  %v8926_v34 = vld [vmem:[#allocation10 + $0xf40] ss:$16 sps:$4 sm:$0xff]   ;;  %v8929_v58 = vld [vmem:[#allocation10 + $0xb48] ss:$16 sps:$4 sm:$0xff]  }
 0x236   :  { %4475 = vmatmul.mubr.bf16.gmra.mrb[32].mxu0 %v10274_v26  ;;  %4961 = vmatmul.mubr.bf16.gmra.mrb[12].mxu1 %v10115_v18  ;;  %v8925_v18 = vld [vmem:[#allocation10 + $0xb2c] ss:$16 sps:$4 sm:$0xff]  }
 0x237   :  { %4506 = vmatpush1.bf16.msra.mxu0 %v8900_v25  ;;  %4992 = vmatpush1.bf16.msra.mxu1 %v8903_v5  ;;  %v8937_v25 = vld [vmem:[#allocation10 + $0xb6c] ss:$16 sps:$4 sm:$0xff]   ;;  %v8935_v5 = vld [vmem:[#allocation10 + $0xb68] ss:$16 sps:$4 sm:$0xff]  }
 0x238   :  { %4507 = vmatprep.subr.bf16.mxu0 %v8908_v55  ;;  %4993 = vmatprep.subr.bf16.mxu1 %v8911_v46  ;;  %v8940_v55 = vld [vmem:[#allocation10 + $0xf84] ss:$16 sps:$4 sm:$0xff]   ;;  %v8943_v46 = vld [vmem:[#allocation10 + $0xb8c] ss:$16 sps:$4 sm:$0xff]  }
 0x239   :  { %4484 = vmatprep.mubr.bf16.mxu0 %v10276_v11  ;;  %4970 = vmatprep.mubr.bf16.mxu1 %v10126_v52  ;;  %v8928_v52 = vld [vmem:[#allocation10 + $0xf44] ss:$16 sps:$4 sm:$0xff]  }
 0x23b   :  { %4508 = vmatpush1.bf16.msra.mxu0 %v8906_v62  ;;  %4994 = vmatpush1.bf16.msra.mxu1 %v8909_v39  ;;  %v8938_v62 = vld [vmem:[#allocation10 + $0xf80] ss:$16 sps:$4 sm:$0xff]   ;;  %v8946_v39 = vld [vmem:[#allocation10 + $0xfa4] ss:$16 sps:$4 sm:$0xff]  }
 0x23c   :  { %4509 = vmatprep.subr.bf16.mxu0 %v8916_v59  ;;  %4995 = vmatprep.subr.bf16.mxu1 %v8919_v54  ;;  %v8949_v59 = vld [vmem:[#allocation10 + $0xbac] ss:$16 sps:$4 sm:$0xff]   ;;  %v8944_v54 = vld [vmem:[#allocation10 + $0xfa0] ss:$16 sps:$4 sm:$0xff]  }
 0x23e   :  { %4485 = vmatmul.mubr.bf16.gmra.mrb[56].mxu0 %v10286_v4  ;;  %4971 = vmatmul.mubr.bf16.gmra.mrb[56].mxu1 %v10134_v57  ;;  %v8932_v57 = vld [vmem:[#allocation10 + $0xf60] ss:$16 sps:$4 sm:$0xff]  }
 0x23f   :  { %4510 = vmatpush1.bf16.msra.mxu0 %v8914_v48  ;;  %4996 = vmatpush1.bf16.msra.mxu1 %v8917_v61  ;;  %v8947_v48 = vld [vmem:[#allocation10 + $0xba8] ss:$16 sps:$4 sm:$0xff]   ;;  %v8952_v61 = vld [vmem:[#allocation10 + $0xfc4] ss:$16 sps:$4 sm:$0xff]  }
 0x240   :  { %4511 = vmatprep.subr.bf16.mxu0 %v8922_v50  ;;  %4997 = vmatprep.subr.bf16.mxu1 %v8925_v18  ;;  %v8955_v50 = vld [vmem:[#allocation10 + $0xbcc] ss:$16 sps:$4 sm:$0xff]  }
 0x241   :  { %4525 = vmatprep.mubr.bf16.mxu0 %v10290_v16  ;;  %5011 = vmatprep.mubr.bf16.mxu1 %v10152_v33  ;;  %v8941_v33 = vld [vmem:[#allocation10 + $0xb88] ss:$16 sps:$4 sm:$0xff]  }
 0x243   :  { %4512 = vmatpush1.bf16.msra.mxu0 %v8920_v56  ;;  %4998 = vmatpush1.bf16.msra.mxu1 %v8923_v15 }
 0x244   :  { %4513 = vmatprep.subr.bf16.mxu0 %v8928_v52  ;;  %4999 = vmatprep.subr.bf16.mxu1 %v8931_v35 }
 0x247   :  { %4514 = vmatpush1.bf16.msra.mxu0 %v8926_v34  ;;  %5000 = vmatpush1.bf16.msra.mxu1 %v8929_v58 }
 0x248   :  { %4515 = vmatprep.subr.bf16.mxu0 %v8934_v0  ;;  %5001 = vmatprep.subr.bf16.mxu1 %v8937_v25  ;;  %v8950_v25 = vld [vmem:[#allocation10 + $0xfc0] ss:$16 sps:$4 sm:$0xff]  }
 0x24b   :  { %4516 = vmatpush1.bf16.msra.mxu0 %v8932_v57  ;;  %5002 = vmatpush1.bf16.msra.mxu1 %v8935_v5  ;;  %v8953_v57 = vld [vmem:[#allocation10 + $0xbc8] ss:$16 sps:$4 sm:$0xff]  }
 0x24c   :  { %4517 = vmatprep.subr.bf16.mxu0 %v8940_v55  ;;  %5003 = vmatprep.subr.bf16.mxu1 %v8943_v46  ;;  %v8961_v46 = vld [vmem:[#allocation10 + $0xbec] ss:$16 sps:$4 sm:$0xff]  }
 0x24f   :  { %4518 = vmatpush1.bf16.msra.mxu0 %v8938_v62  ;;  %5004 = vmatpush1.bf16.msra.mxu1 %v8941_v33  ;;  %v8956_v33 = vld [vmem:[#allocation10 + $0xfe0] ss:$16 sps:$4 sm:$0xff]  }
 0x250   :  { %4519 = vmatprep.subr.bf16.mxu0 %v8946_v39  ;;  %5005 = vmatprep.subr.bf16.mxu1 %v8949_v59  ;;  %v429_v39 = vld [vmem:[#allocation2 + $0xb8] sm:$0xff] }
 0x251   :  { %v4243_v18 = vpop.f32.mrb[44].mxu0  ;;  %v4729_v56 = vpop.f32.mrb[44].mxu1  ;;  %v437_v59 = vld [vmem:[#allocation2 + $0xf8] sm:$0xff] }
 0x252   :  { %v10297_v15 = vadd.f32 %v4243_v18, %v10237_v17  ;;  %v10300_v52 = vadd.f32 %v4729_v56, %v10240_v42  ;;  %v4245_v35 = vpop.f32.mrb[45].mxu0  ;;  %v4731_v34 = vpop.f32.mrb[45].mxu1  ;;  %v8958_v17 = vld [vmem:[#allocation10 + $0xfe4] ss:$16 sps:$4 sm:$0xff]   ;;  %v8965_v18 = vld [vmem:[#allocation10 + $0xc28] ss:$16 sps:$4 sm:$0xff]  }
 0x253   :  { %v10303_v58 = vadd.f32 %v4245_v35, %v10243_v37  ;;  %v10306_v0 = vadd.f32 %v4731_v34, %v10246_v32  ;;  %4520 = vmatpush1.bf16.msra.mxu0 %v8944_v54  ;;  %5006 = vmatpush1.bf16.msra.mxu1 %v8947_v48  ;;  %v4733_v5 = vpop.f32.mrb[46].mxu1  ;;  %v4247_v55 = vpop.f32.mrb[46].mxu0  ;;  %v8959_v37 = vld [vmem:[#allocation10 + $0xbe8] ss:$16 sps:$4 sm:$0xff]   ;;  %v8964_v32 = vld [vmem:[#allocation10 + $0xc0c] ss:$16 sps:$4 sm:$0xff]   ;;  %v10310_v54 = vcombine.low %v10280_v44, %v10282_v28 }
 0x254   :  { %4521 = vmatprep.subr.bf16.mxu0 %v8952_v61  ;;  %5007 = vmatprep.subr.bf16.mxu1 %v8955_v50  ;;  %v4734_v42 = vpop.f32.mrb[47].mxu1  ;;  %v4248_v62 = vpop.f32.mrb[47].mxu0  ;;  %v8962_v48 = vld [vmem:[#allocation10 + $0xc08] ss:$16 sps:$4 sm:$0xff]   ;;  %v10312_v61 = vcombine.high %v429_v39, %v437_v59  ;;  %v8967_v50 = vld [vmem:[#allocation10 + $0xc2c] ss:$16 sps:$4 sm:$0xff]   ;;  %v10318_v35 = vcombine.low %v429_v39, %v437_v59 }
 0x255   :  { %v8970_v44 = vld [vmem:[#allocation10 + $0xc4c] ss:$16 sps:$4 sm:$0xff]   ;;  %v445_v28 = vld [vmem:[#allocation2 + $0x138] sm:$0xff] }
 0x256   :  { %v453_v56 = vld [vmem:[#allocation2 + $0x178] sm:$0xff]  ;;  %v8979_v62 = vld [vmem:[#allocation10 + $0xcac] ss:$16 sps:$4 sm:$0xff]  }
 0x257   :  { %4522 = vmatpush1.bf16.msra.mxu0 %v8950_v25  ;;  %5008 = vmatpush1.bf16.msra.mxu1 %v8953_v57  ;;  %v8968_v34 = vld [vmem:[#allocation10 + $0xc48] ss:$16 sps:$4 sm:$0xff]   ;;  %v10320_v25 = vcombine.high %v445_v28, %v453_v56  ;;  %v8973_v57 = vld [vmem:[#allocation10 + $0xc6c] ss:$16 sps:$4 sm:$0xff]  }
 0x258   :  { %4523 = vmatprep.subr.bf16.mxu0 %v8958_v17  ;;  %5009 = vmatprep.subr.bf16.mxu1 %v8961_v46  ;;  %v461_v5 = vld [vmem:[#allocation2 + $0x1b8] sm:$0xff]  ;;  %v10326_v17 = vcombine.low %v445_v28, %v453_v56  ;;  %v8985_v59 = vld [vmem:[#allocation10 + $0xcec] ss:$16 sps:$4 sm:$0xff]  }
 0x259   :  { %v469_v55 = vld [vmem:[#allocation2 + $0x1f8] sm:$0xff] }
 0x25a   :  { %v8974_v46 = vld [vmem:[#allocation10 + $0xc88] ss:$16 sps:$4 sm:$0xff]   ;;  %v10328_v42 = vcombine.high %v461_v5, %v469_v55 }
 0x25b   :  { %4524 = vmatpush1.bf16.msra.mxu0 %v8956_v33  ;;  %5010 = vmatpush1.bf16.msra.mxu1 %v8959_v37  ;;  %v477_v33 = vld [vmem:[#allocation2 + $0x238] sm:$0xff]  ;;  %v10334_v37 = vcombine.low %v461_v5, %v469_v55  ;;  %v9002_v55 = vld [vmem:[#allocation10 + $0xd8c] ss:$16 sps:$4 sm:$0xff]  }
 0x25c   :  { %5060 = vmatprep.subr.bf16.mxu1 %v8964_v32  ;;  %v8980_v32 = vld [vmem:[#allocation10 + $0xcc8] ss:$16 sps:$4 sm:$0xff]   ;;  %v10336_v39 = vcombine.high %v477_v33, %v477_v33 }
 0x25d   :  { %v8991_v28 = vld [vmem:[#allocation10 + $0xd28] ss:$16 sps:$4 sm:$0xff]  }
 0x25e   :  { %4526 = vmatmul.mubr.bf16.vlgmr.msra.gmra.mrb[20].mxu0 %v10310_v54  ;;  %5012 = vmatmul.mubr.bf16.vlgmr.msra.gmra.mrb[0].mxu1 %v10190_v31  ;;  %v8971_v31 = vld [vmem:[#allocation10 + $0xc68] ss:$16 sps:$4 sm:$0xff]  }
 0x25f   :  { %5061 = vmatpush1.bf16.msra.mxu1 %v8962_v48  ;;  %4535 = vmatprep.mubr.bf16.mxu0 %v10312_v61  ;;  %v10342_v48 = vcombine.low %v477_v33, %v477_v33  ;;  %v9068_v56 = vld [vmem:[#allocation13 + $0x34] ss:$24 sps:$4 sm:$0xff]  }
 0x260   :  { %5062 = vmatprep.subr.bf16.mxu1 %v8967_v50  ;;  %5021 = vmatprep.mubr.bf16.mxu1 %v10192_v12  ;;  %v8976_v12 = vld [vmem:[#allocation10 + $0xc8c] ss:$16 sps:$4 sm:$0xff]   ;;  %v8988_v50 = vld [vmem:[#allocation10 + $0xd08] ss:$16 sps:$4 sm:$0xff]  }
 0x261   :  { %v8997_v5 = vld [vmem:[#allocation10 + $0xd68] ss:$16 sps:$4 sm:$0xff]  }
 0x263   :  { %5063 = vmatpush1.bf16.msra.mxu1 %v8965_v18  ;;  %v8993_v18 = vld [vmem:[#allocation10 + $0xd2c] ss:$16 sps:$4 sm:$0xff]  }
 0x264   :  { %5064 = vmatprep.subr.bf16.mxu1 %v8970_v44  ;;  %v9060_v44 = vld [vmem:[#allocation13] ss:$24 sps:$4 sm:$0xff]  }
 0x266   :  { %4536 = vmatmul.mubr.bf16.gmra.mrb[24].mxu0 %v10318_v35  ;;  %5022 = vmatmul.mubr.bf16.gmra.mrb[4].mxu1 %v10198_v21  ;;  %v8977_v21 = vld [vmem:[#allocation10 + $0xca8] ss:$16 sps:$4 sm:$0xff]  }
 0x267   :  { %5065 = vmatpush1.bf16.msra.mxu1 %v8968_v34  ;;  %4545 = vmatprep.mubr.bf16.mxu0 %v10320_v25  ;;  %v9066_v34 = vld [vmem:[#allocation13 + $0x30] ss:$24 sps:$4 sm:$0xff]  }
 0x268   :  { %5066 = vmatprep.subr.bf16.mxu1 %v8973_v57  ;;  %5031 = vmatprep.mubr.bf16.mxu1 %v10200_v43  ;;  %v8982_v43 = vld [vmem:[#allocation10 + $0xccc] ss:$16 sps:$4 sm:$0xff]   ;;  %v9074_v57 = vld [vmem:[#allocation13 + $0x64] ss:$24 sps:$4 sm:$0xff]  }
 0x26b   :  { %5067 = vmatpush1.bf16.msra.mxu1 %v8971_v31  ;;  %v8994_v31 = vld [vmem:[#allocation10 + $0xd48] ss:$16 sps:$4 sm:$0xff]  }
 0x26c   :  { %5068 = vmatprep.subr.bf16.mxu1 %v8976_v12  ;;  %v8999_v12 = vld [vmem:[#allocation10 + $0xd6c] ss:$16 sps:$4 sm:$0xff]  }
 0x26e   :  { %4546 = vmatmul.mubr.bf16.gmra.mrb[28].mxu0 %v10326_v17  ;;  %5032 = vmatmul.mubr.bf16.gmra.mrb[8].mxu1 %v10206_v20  ;;  %v8983_v20 = vld [vmem:[#allocation10 + $0xce8] ss:$16 sps:$4 sm:$0xff]  }
 0x26f   :  { %5069 = vmatpush1.bf16.msra.mxu1 %v8974_v46  ;;  %4555 = vmatprep.mubr.bf16.mxu0 %v10328_v42  ;;  %v9005_v46 = vld [vmem:[#allocation10 + $0xdac] ss:$16 sps:$4 sm:$0xff]  }
 0x270   :  { %5070 = vmatprep.subr.bf16.mxu1 %v8979_v62  ;;  %5041 = vmatprep.mubr.bf16.mxu1 %v10208_v30  ;;  %v8990_v30 = vld [vmem:[#allocation10 + $0xd0c] ss:$16 sps:$4 sm:$0xff]   ;;  %v9003_v62 = vld [vmem:[#allocation10 + $0xda8] ss:$16 sps:$4 sm:$0xff]  }
 0x273   :  { %5071 = vmatpush1.bf16.msra.mxu1 %v8977_v21  ;;  %v9008_v21 = vld [vmem:[#allocation10 + $0xdcc] ss:$16 sps:$4 sm:$0xff]  }
 0x274   :  { %5072 = vmatprep.subr.bf16.mxu1 %v8982_v43 }
 0x276   :  { %4556 = vmatmul.mubr.bf16.gmra.mrb[32].mxu0 %v10334_v37  ;;  %5042 = vmatmul.mubr.bf16.gmra.mrb[12].mxu1 %v10214_v6  ;;  %v9062_v6 = vld [vmem:[#allocation13 + $0x4] ss:$24 sps:$4 sm:$0xff]  }
 0x277   :  { %5073 = vmatpush1.bf16.msra.mxu1 %v8980_v32  ;;  %4565 = vmatprep.mubr.bf16.mxu0 %v10336_v39  ;;  %v9080_v32 = vld [vmem:[#allocation13 + $0x94] ss:$24 sps:$4 sm:$0xff]  }
 0x278   :  { %5074 = vmatprep.subr.bf16.mxu1 %v8985_v59  ;;  %5051 = vmatprep.mubr.bf16.mxu1 %v10216_v40  ;;  %v8996_v40 = vld [vmem:[#allocation10 + $0xd4c] ss:$16 sps:$4 sm:$0xff]  }
 0x279   :  { %6520 = vmatprep.subr.bf16.mxu0 %v9062_v6 }
 0x27a   :  { %6521 = vmatpush1.bf16.msra.mxu0 %v9060_v44 }
 0x27b   :  { %5075 = vmatpush1.bf16.msra.mxu1 %v8983_v20  ;;  %6522 = vmatprep.subr.bf16.mxu0 %v9068_v56 }
 0x27c   :  { %5076 = vmatprep.subr.bf16.mxu1 %v8990_v30 }
 0x27e   :  { %4566 = vmatmul.mubr.bf16.gmra.mrb[60].mxu0 %v10342_v48  ;;  %5052 = vmatmul.mubr.bf16.gmra.mrb[60].mxu1 %v10224_v49  ;;  %v9072_v49 = vld [vmem:[#allocation13 + $0x60] ss:$24 sps:$4 sm:$0xff]  }
 0x27f   :  { %5077 = vmatpush1.bf16.msra.mxu1 %v8988_v50  ;;  %5092 = vmatprep.mubr.bf16.mxu1 %v10230_v38  ;;  %v9000_v38 = vld [vmem:[#allocation10 + $0xd88] ss:$16 sps:$4 sm:$0xff]  }
 0x280   :  { %5078 = vmatprep.subr.bf16.mxu1 %v8993_v18  ;;  %6523 = vmatpush1.bf16.msra.mxu0 %v9066_v34  ;;  %v9078_v18 = vld [vmem:[#allocation13 + $0x90] ss:$24 sps:$4 sm:$0xff]   ;;  %v9086_v34 = vld [vmem:[#allocation13 + $0xc4] ss:$24 sps:$4 sm:$0xff]  }
 0x281   :  { %6524 = vmatprep.subr.bf16.mxu0 %v9074_v57 }
 0x283   :  { %5079 = vmatpush1.bf16.msra.mxu1 %v8991_v28  ;;  %v9006_v28 = vld [vmem:[#allocation10 + $0xdc8] ss:$16 sps:$4 sm:$0xff]  }
 0x284   :  { %5080 = vmatprep.subr.bf16.mxu1 %v8996_v40  ;;  %6525 = vmatpush1.bf16.msra.mxu0 %v9072_v49  ;;  %v9014_v49 = vld [vmem:[#allocation10 + $0xe0c] ss:$16 sps:$4 sm:$0xff]  }
 0x285   :  { %6526 = vmatprep.subr.bf16.mxu0 %v9080_v32  ;;  %v9110_v32 = vld [vmem:[#allocation13 + $0x184] ss:$24 sps:$4 sm:$0xff]  }
 0x287   :  { %5081 = vmatpush1.bf16.msra.mxu1 %v8994_v31  ;;  %v9084_v31 = vld [vmem:[#allocation13 + $0xc0] ss:$24 sps:$4 sm:$0xff]  }
 0x288   :  { %5082 = vmatprep.subr.bf16.mxu1 %v8999_v12  ;;  %6527 = vmatpush1.bf16.msra.mxu0 %v9078_v18  ;;  %v9092_v12 = vld [vmem:[#allocation13 + $0xf4] ss:$24 sps:$4 sm:$0xff]   ;;  %v9108_v18 = vld [vmem:[#allocation13 + $0x180] ss:$24 sps:$4 sm:$0xff]  }
 0x289   :  { %6528 = vmatprep.subr.bf16.mxu0 %v9086_v34  ;;  %v9024_v34 = vld [vmem:[#allocation10 + $0xe88] ss:$16 sps:$4 sm:$0xff]  }
 0x28b   :  { %5083 = vmatpush1.bf16.msra.mxu1 %v8997_v5  ;;  %v9098_v5 = vld [vmem:[#allocation13 + $0x124] ss:$24 sps:$4 sm:$0xff]  }
 0x28c   :  { %5084 = vmatprep.subr.bf16.mxu1 %v9002_v55  ;;  %6529 = vmatpush1.bf16.msra.mxu0 %v9084_v31  ;;  %v9012_v55 = vld [vmem:[#allocation10 + $0xe08] ss:$16 sps:$4 sm:$0xff]   ;;  %v9126_v31 = vld [vmem:[#allocation13 + $0x210] ss:$24 sps:$4 sm:$0xff]  }
 0x28d   :  { %6530 = vmatprep.subr.bf16.mxu0 %v9092_v12  ;;  %v9030_v12 = vld [vmem:[#allocation10 + $0xec8] ss:$16 sps:$4 sm:$0xff]  }
 0x28f   :  { %5085 = vmatpush1.bf16.msra.mxu1 %v9000_v38  ;;  %v9017_v38 = vld [vmem:[#allocation10 + $0xe2c] ss:$16 sps:$4 sm:$0xff]  }
 0x290   :  { %5086 = vmatprep.subr.bf16.mxu1 %v9005_v46  ;;  %v9096_v46 = vld [vmem:[#allocation13 + $0x120] ss:$24 sps:$4 sm:$0xff]  }
 0x291   :  { %v4324_v43 = vpop.f32.mrb[48].mxu0  ;;  %v4810_v33 = vpop.f32.mrb[48].mxu1 }
 0x292   :  { %v10348_v59 = vadd.f32 %v4324_v43, %v10297_v15  ;;  %v10351_v20 = vadd.f32 %v4810_v33, %v10300_v52  ;;  %v4326_v30 = vpop.f32.mrb[49].mxu0  ;;  %v4812_v50 = vpop.f32.mrb[49].mxu1  ;;  %v9011_v15 = vld [vmem:[#allocation10 + $0xdec] ss:$16 sps:$4 sm:$0xff]  }
 0x293   :  { %v10354_v44 = vadd.f32 %v4326_v30, %v10303_v58  ;;  %v10357_v6 = vadd.f32 %v4812_v50, %v10306_v0  ;;  %5087 = vmatpush1.bf16.msra.mxu1 %v9003_v62  ;;  %v4814_v56 = vpop.f32.mrb[50].mxu1  ;;  %v4328_v40 = vpop.f32.mrb[50].mxu0  ;;  %v9009_v58 = vld [vmem:[#allocation10 + $0xde8] ss:$16 sps:$4 sm:$0xff]   ;;  %v9090_v0 = vld [vmem:[#allocation13 + $0xf0] ss:$24 sps:$4 sm:$0xff]  }
 0x294   :  { %5088 = vmatprep.subr.bf16.mxu1 %v9008_v21  ;;  %v4815_v57 = vpop.f32.mrb[51].mxu1  ;;  %v4329_v52 = vpop.f32.mrb[51].mxu0  ;;  %6531 = vmatpush1.bf16.msra.mxu0 %v9090_v0  ;;  %v9104_v62 = vld [vmem:[#allocation13 + $0x154] ss:$24 sps:$4 sm:$0xff]   ;;  %v9020_v43 = vld [vmem:[#allocation10 + $0xe4c] ss:$16 sps:$4 sm:$0xff]  }
 0x295   :  { %6532 = vmatprep.subr.bf16.mxu0 %v9098_v5  ;;  %v9015_v21 = vld [vmem:[#allocation10 + $0xe28] ss:$16 sps:$4 sm:$0xff]   ;;  %v9102_v33 = vld [vmem:[#allocation13 + $0x150] ss:$24 sps:$4 sm:$0xff]   ;;  %v9120_v57 = vld [vmem:[#allocation13 + $0x1e0] ss:$24 sps:$4 sm:$0xff]  }
 0x296   :  { %v9018_v30 = vld [vmem:[#allocation10 + $0xe48] ss:$16 sps:$4 sm:$0xff]   ;;  %v9023_v50 = vld [vmem:[#allocation10 + $0xe6c] ss:$16 sps:$4 sm:$0xff]  }
 0x297   :  { %5089 = vmatpush1.bf16.msra.mxu1 %v9006_v28  ;;  %v9116_v28 = vld [vmem:[#allocation13 + $0x1b4] ss:$24 sps:$4 sm:$0xff]   ;;  %v9114_v56 = vld [vmem:[#allocation13 + $0x1b0] ss:$24 sps:$4 sm:$0xff]   ;;  %v9122_v40 = vld [vmem:[#allocation13 + $0x1e4] ss:$24 sps:$4 sm:$0xff]  }
 0x298   :  { %5090 = vmatprep.subr.bf16.mxu1 %v9011_v15  ;;  %6533 = vmatpush1.bf16.msra.mxu0 %v9096_v46  ;;  %v9029_v15 = vld [vmem:[#allocation10 + $0xeac] ss:$16 sps:$4 sm:$0xff]   ;;  %v9128_v52 = vld [vmem:[#allocation13 + $0x214] ss:$24 sps:$4 sm:$0xff]  }
 0x299   :  { %6534 = vmatprep.subr.bf16.mxu0 %v9104_v62  ;;  %v9132_v0 = vld [vmem:[#allocation13 + $0x240] ss:$24 sps:$4 sm:$0xff]   ;;  %v9140_v5 = vld [vmem:[#allocation13 + $0x274] ss:$24 sps:$4 sm:$0xff]   ;;  %v9146_v62 = vld [vmem:[#allocation13 + $0x2a4] ss:$24 sps:$4 sm:$0xff]  }
 0x29a   :  { %v9041_v46 = vld [vmem:[#allocation10 + $0xf2c] ss:$16 sps:$4 sm:$0xff]  }
 0x29b   :  { %5091 = vmatpush1.bf16.msra.mxu1 %v9009_v58  ;;  %v9035_v58 = vld [vmem:[#allocation10 + $0xeec] ss:$16 sps:$4 sm:$0xff]  }
 0x29c   :  { %5141 = vmatprep.subr.bf16.mxu1 %v9014_v49  ;;  %6535 = vmatpush1.bf16.msra.mxu0 %v9102_v33  ;;  %v9134_v49 = vld [vmem:[#allocation13 + $0x244] ss:$24 sps:$4 sm:$0xff]   ;;  %v9150_v33 = vld [vmem:[#allocation13 + $0x2d0] ss:$24 sps:$4 sm:$0xff]  }
 0x29d   :  { %6536 = vmatprep.subr.bf16.mxu0 %v9110_v32  ;;  %v9042_v32 = vld [vmem:[#allocation10 + $0xf48] ss:$16 sps:$4 sm:$0xff]  }
 0x29e   :  { %5093 = vmatmul.mubr.bf16.vlgmr.msra.gmra.mrb[0].mxu1 %v10250_v24  ;;  %v9021_v24 = vld [vmem:[#allocation10 + $0xe68] ss:$16 sps:$4 sm:$0xff]  }
 0x29f   :  { %5142 = vmatpush1.bf16.msra.mxu1 %v9012_v55  ;;  %5102 = vmatprep.mubr.bf16.mxu1 %v10252_v22  ;;  %v9026_v22 = vld [vmem:[#allocation10 + $0xe8c] ss:$16 sps:$4 sm:$0xff]  }
 0x2a0   :  { %5143 = vmatprep.subr.bf16.mxu1 %v9017_v38  ;;  %6537 = vmatpush1.bf16.msra.mxu0 %v9108_v18  ;;  %v9138_v55 = vld [vmem:[#allocation13 + $0x270] ss:$24 sps:$4 sm:$0xff]   ;;  %v9036_v38 = vld [vmem:[#allocation10 + $0xf08] ss:$16 sps:$4 sm:$0xff]  }
 0x2a1   :  { %6538 = vmatprep.subr.bf16.mxu0 %v9116_v28  ;;  %v9048_v18 = vld [vmem:[#allocation10 + $0xf88] ss:$16 sps:$4 sm:$0xff]  }
 0x2a2   :  { %v9051_v28 = vld [vmem:[#allocation10 + $0xfa8] ss:$16 sps:$4 sm:$0xff]  }
 0x2a3   :  { %5144 = vmatpush1.bf16.msra.mxu1 %v9015_v21  ;;  %v9039_v21 = vld [vmem:[#allocation10 + $0xf28] ss:$16 sps:$4 sm:$0xff]  }
 0x2a4   :  { %5145 = vmatprep.subr.bf16.mxu1 %v9020_v43  ;;  %6539 = vmatpush1.bf16.msra.mxu0 %v9114_v56  ;;  %v9152_v43 = vld [vmem:[#allocation13 + $0x2d4] ss:$24 sps:$4 sm:$0xff]  }
 0x2a5   :  { %6540 = vmatprep.subr.bf16.mxu0 %v9122_v40 }
 0x2a6   :  { %5103 = vmatmul.mubr.bf16.gmra.mrb[4].mxu1 %v10258_v29  ;;  %v9027_v29 = vld [vmem:[#allocation10 + $0xea8] ss:$16 sps:$4 sm:$0xff]  }
 0x2a7   :  { %5146 = vmatpush1.bf16.msra.mxu1 %v9018_v30  ;;  %5112 = vmatprep.mubr.bf16.mxu1 %v10260_v51  ;;  %v9032_v51 = vld [vmem:[#allocation10 + $0xecc] ss:$16 sps:$4 sm:$0xff]  }
 0x2a8   :  { %5147 = vmatprep.subr.bf16.mxu1 %v9023_v50  ;;  %6541 = vmatpush1.bf16.msra.mxu0 %v9120_v57  ;;  %v9047_v30 = vld [vmem:[#allocation10 + $0xf6c] ss:$16 sps:$4 sm:$0xff]   ;;  %v9045_v50 = vld [vmem:[#allocation10 + $0xf68] ss:$16 sps:$4 sm:$0xff]  }
 0x2a9   :  { %6542 = vmatprep.subr.bf16.mxu0 %v9128_v52  ;;  %v9054_v52 = vld [vmem:[#allocation10 + $0xfc8] ss:$16 sps:$4 sm:$0xff]  }
 0x2ab   :  { %5148 = vmatpush1.bf16.msra.mxu1 %v9021_v24  ;;  %v9056_v24 = vld [vmem:[#allocation10 + $0xfcc] ss:$16 sps:$4 sm:$0xff]  }
 0x2ac   :  { %5149 = vmatprep.subr.bf16.mxu1 %v9026_v22  ;;  %6543 = vmatpush1.bf16.msra.mxu0 %v9126_v31 }
 0x2ad   :  { %6544 = vmatprep.subr.bf16.mxu0 %v9134_v49 }
 0x2ae   :  { %5113 = vmatmul.mubr.bf16.gmra.mrb[8].mxu1 %v10266_v19  ;;  %v9033_v19 = vld [vmem:[#allocation10 + $0xee8] ss:$16 sps:$4 sm:$0xff]  }
 0x2af   :  { %5150 = vmatpush1.bf16.msra.mxu1 %v9024_v34  ;;  %5122 = vmatprep.mubr.bf16.mxu1 %v10268_v13  ;;  %v9038_v13 = vld [vmem:[#allocation10 + $0xf0c] ss:$16 sps:$4 sm:$0xff]  }
 0x2b0   :  { %5151 = vmatprep.subr.bf16.mxu1 %v9029_v15  ;;  %6545 = vmatpush1.bf16.msra.mxu0 %v9132_v0  ;;  %v9057_v0 = vld [vmem:[#allocation10 + $0xfe8] ss:$16 sps:$4 sm:$0xff]  }
 0x2b1   :  { %6546 = vmatprep.subr.bf16.mxu0 %v9140_v5  ;;  %v9075_v5 = vld [vmem:[#allocation13 + $0x68] ss:$24 sps:$4 sm:$0xff]  }
 0x2b3   :  { %5152 = vmatpush1.bf16.msra.mxu1 %v9027_v29 }
 0x2b4   :  { %5153 = vmatprep.subr.bf16.mxu1 %v9032_v51  ;;  %6547 = vmatpush1.bf16.msra.mxu0 %v9138_v55  ;;  %v9083_v55 = vld [vmem:[#allocation13 + $0x9c] ss:$24 sps:$4 sm:$0xff]  }
 0x2b5   :  { %6548 = vmatprep.subr.bf16.mxu0 %v9146_v62  ;;  %v9089_v62 = vld [vmem:[#allocation13 + $0xcc] ss:$24 sps:$4 sm:$0xff]  }
 0x2b6   :  { %5123 = vmatmul.mubr.bf16.gmra.mrb[12].mxu1 %v10274_v26  ;;  %v9144_v26 = vld [vmem:[#allocation13 + $0x2a0] ss:$24 sps:$4 sm:$0xff]  }
 0x2b7   :  { %5154 = vmatpush1.bf16.msra.mxu1 %v9030_v12  ;;  %5132 = vmatprep.mubr.bf16.mxu1 %v10276_v11  ;;  %v9044_v11 = vld [vmem:[#allocation10 + $0xf4c] ss:$16 sps:$4 sm:$0xff]  }
 0x2b8   :  { %5155 = vmatprep.subr.bf16.mxu1 %v9035_v58  ;;  %6549 = vmatpush1.bf16.msra.mxu0 %v9144_v26  ;;  %v9059_v58 = vld [vmem:[#allocation10 + $0xfec] ss:$16 sps:$4 sm:$0xff]  }
 0x2b9   :  { %6550 = vmatprep.subr.bf16.mxu0 %v9152_v43  ;;  %v9093_v26 = vld [vmem:[#allocation13 + $0xf8] ss:$24 sps:$4 sm:$0xff]   ;;  %v9113_v43 = vld [vmem:[#allocation13 + $0x18c] ss:$24 sps:$4 sm:$0xff]  }
 0x2bb   :  { %5156 = vmatpush1.bf16.msra.mxu1 %v9033_v19  ;;  %v9063_v19 = vld [vmem:[#allocation13 + $0x8] ss:$24 sps:$4 sm:$0xff]  }
 0x2bc   :  { %5157 = vmatprep.subr.bf16.mxu1 %v9038_v13  ;;  %6551 = vmatpush1.bf16.msra.mxu0 %v9150_v33  ;;  %v9077_v13 = vld [vmem:[#allocation13 + $0x6c] ss:$24 sps:$4 sm:$0xff]   ;;  %v9117_v33 = vld [vmem:[#allocation13 + $0x1b8] ss:$24 sps:$4 sm:$0xff]  }
 0x2be   :  { %5133 = vmatmul.mubr.bf16.gmra.mrb[64].mxu1 %v10286_v4  ;;  %v9050_v4 = vld [vmem:[#allocation10 + $0xf8c] ss:$16 sps:$4 sm:$0xff]  }
 0x2bf   :  { %5158 = vmatpush1.bf16.msra.mxu1 %v9036_v38  ;;  %5173 = vmatprep.mubr.bf16.mxu1 %v10290_v16  ;;  %v9053_v16 = vld [vmem:[#allocation10 + $0xfac] ss:$16 sps:$4 sm:$0xff]  }
 0x2c0   :  { %5159 = vmatprep.subr.bf16.mxu1 %v9041_v46  ;;  %v9081_v38 = vld [vmem:[#allocation13 + $0x98] ss:$24 sps:$4 sm:$0xff]   ;;  %v9158_v46 = vld [vmem:[#allocation13 + $0x304] ss:$24 sps:$4 sm:$0xff]  }
 0x2c1   :  { %6601 = vmatprep.subr.bf16.mxu0 %v9158_v46 }
 0x2c3   :  { %5160 = vmatpush1.bf16.msra.mxu1 %v9039_v21  ;;  %v9107_v21 = vld [vmem:[#allocation13 + $0x15c] ss:$24 sps:$4 sm:$0xff]  }
 0x2c4   :  { %5161 = vmatprep.subr.bf16.mxu1 %v9044_v11  ;;  %v9105_v11 = vld [vmem:[#allocation13 + $0x158] ss:$24 sps:$4 sm:$0xff]  }
 0x2c7   :  { %5162 = vmatpush1.bf16.msra.mxu1 %v9042_v32  ;;  %v9125_v32 = vld [vmem:[#allocation13 + $0x1ec] ss:$24 sps:$4 sm:$0xff]  }
 0x2c8   :  { %5163 = vmatprep.subr.bf16.mxu1 %v9047_v30  ;;  %v9123_v30 = vld [vmem:[#allocation13 + $0x1e8] ss:$24 sps:$4 sm:$0xff]  }
 0x2cb   :  { %5164 = vmatpush1.bf16.msra.mxu1 %v9045_v50  ;;  %v9137_v50 = vld [vmem:[#allocation13 + $0x24c] ss:$24 sps:$4 sm:$0xff]  }
 0x2cc   :  { %5165 = vmatprep.subr.bf16.mxu1 %v9050_v4  ;;  %v9135_v4 = vld [vmem:[#allocation13 + $0x248] ss:$24 sps:$4 sm:$0xff]  }
 0x2cf   :  { %5166 = vmatpush1.bf16.msra.mxu1 %v9048_v18  ;;  %v9143_v18 = vld [vmem:[#allocation13 + $0x27c] ss:$24 sps:$4 sm:$0xff]  }
 0x2d0   :  { %5167 = vmatprep.subr.bf16.mxu1 %v9053_v16  ;;  %v9141_v16 = vld [vmem:[#allocation13 + $0x278] ss:$24 sps:$4 sm:$0xff]  }
 0x2d1   :  { %v4405_v22 = vpop.f32.mrb[52].mxu0  ;;  %v4891_v56 = vpop.f32.mrb[52].mxu1 }
 0x2d2   :  { %v10370_v40 = vadd.f32 %v4405_v22, %v10348_v59  ;;  %v10373_v34 = vadd.f32 %v4891_v56, %v10351_v20  ;;  %v4407_v15 = vpop.f32.mrb[53].mxu0  ;;  %v4893_v57 = vpop.f32.mrb[53].mxu1  ;;  %v9065_v20 = vld [vmem:[#allocation13 + $0xc] ss:$24 sps:$4 sm:$0xff]  }
 0x2d3   :  { %v10376_v29 = vadd.f32 %v4407_v15, %v10354_v44  ;;  %v10379_v51 = vadd.f32 %v4893_v57, %v10357_v6  ;;  %5168 = vmatpush1.bf16.msra.mxu1 %v9051_v28  ;;  %v4895_v31 = vpop.f32.mrb[54].mxu1  ;;  %v4409_v12 = vpop.f32.mrb[54].mxu0  ;;  %v9071_v44 = vld [vmem:[#allocation13 + $0x3c] ss:$24 sps:$4 sm:$0xff]   ;;  %v9069_v6 = vld [vmem:[#allocation13 + $0x38] ss:$24 sps:$4 sm:$0xff]  }
 0x2d4   :  { %5169 = vmatprep.subr.bf16.mxu1 %v9056_v24  ;;  %v4896_v49 = vpop.f32.mrb[55].mxu1  ;;  %v4410_v59 = vpop.f32.mrb[55].mxu0 }
 0x2d5   :  { %v9147_v49 = vld [vmem:[#allocation13 + $0x2a8] ss:$24 sps:$4 sm:$0xff]  }
 0x2d7   :  { %5170 = vmatpush1.bf16.msra.mxu1 %v9054_v52 }
 0x2d8   :  { %5171 = vmatprep.subr.bf16.mxu1 %v9059_v58 }
 0x2db   :  { %5172 = vmatpush1.bf16.msra.mxu1 %v9057_v0 }
 0x2dc   :  { %6682 = vmatprep.subr.bf16.mxu1 %v9065_v20  ;;  %v9153_v20 = vld [vmem:[#allocation13 + $0x2d8] ss:$24 sps:$4 sm:$0xff]  }
 0x2de   :  { %5174 = vmatmul.mubr.bf16.vlgmr.msra.gmra.mrb[0].mxu1 %v10310_v54  ;;  %v9087_v54 = vld [vmem:[#allocation13 + $0xc8] ss:$24 sps:$4 sm:$0xff]  }
 0x2df   :  { %5183 = vmatprep.mubr.bf16.mxu1 %v10312_v61  ;;  %6683 = vmatpush1.bf16.msra.mxu1 %v9063_v19  ;;  %v9095_v61 = vld [vmem:[#allocation13 + $0xfc] ss:$24 sps:$4 sm:$0xff]  }
 0x2e0   :  { %6684 = vmatprep.subr.bf16.mxu1 %v9071_v44  ;;  %v10403_v19 = vld [vmem:[#allocation11] sm:$0xf] }
 0x2e3   :  { %6685 = vmatpush1.bf16.msra.mxu1 %v9069_v6 }
 0x2e4   :  { %6686 = vmatprep.subr.bf16.mxu1 %v9077_v13 }
 0x2e6   :  { %5184 = vmatmul.mubr.bf16.gmra.mrb[4].mxu1 %v10318_v35  ;;  %v9101_v35 = vld [vmem:[#allocation13 + $0x12c] ss:$24 sps:$4 sm:$0xff]  }
 0x2e7   :  { %5193 = vmatprep.mubr.bf16.mxu1 %v10320_v25  ;;  %6687 = vmatpush1.bf16.msra.mxu1 %v9075_v5  ;;  %v9099_v25 = vld [vmem:[#allocation13 + $0x128] ss:$24 sps:$4 sm:$0xff]  }
 0x2e8   :  { %6688 = vmatprep.subr.bf16.mxu1 %v9083_v55 }
 0x2eb   :  { %6689 = vmatpush1.bf16.msra.mxu1 %v9081_v38 }
 0x2ec   :  { %6690 = vmatprep.subr.bf16.mxu1 %v9089_v62 }
 0x2ee   :  { %5194 = vmatmul.mubr.bf16.gmra.mrb[8].mxu1 %v10326_v17  ;;  %v9111_v17 = vld [vmem:[#allocation13 + $0x188] ss:$24 sps:$4 sm:$0xff]  }
 0x2ef   :  { %5203 = vmatprep.mubr.bf16.mxu1 %v10328_v42  ;;  %6691 = vmatpush1.bf16.msra.mxu1 %v9087_v54  ;;  %v9119_v42 = vld [vmem:[#allocation13 + $0x1bc] ss:$24 sps:$4 sm:$0xff]  }
 0x2f0   :  { %6692 = vmatprep.subr.bf16.mxu1 %v9095_v61 }
 0x2f3   :  { %6693 = vmatpush1.bf16.msra.mxu1 %v9093_v26 }
 0x2f4   :  { %6694 = vmatprep.subr.bf16.mxu1 %v9101_v35 }
 0x2f6   :  { %5204 = vmatmul.mubr.bf16.gmra.mrb[12].mxu1 %v10334_v37  ;;  %v9131_v37 = vld [vmem:[#allocation13 + $0x21c] ss:$24 sps:$4 sm:$0xff]  }
 0x2f7   :  { %5213 = vmatprep.mubr.bf16.mxu1 %v10336_v39  ;;  %6695 = vmatpush1.bf16.msra.mxu1 %v9099_v25  ;;  %v9129_v39 = vld [vmem:[#allocation13 + $0x218] ss:$24 sps:$4 sm:$0xff]  }
 0x2f8   :  { %6696 = vmatprep.subr.bf16.mxu1 %v9107_v21 }
 0x2fb   :  { %6697 = vmatpush1.bf16.msra.mxu1 %v9105_v11 }
 0x2fc   :  { %6698 = vmatprep.subr.bf16.mxu1 %v9113_v43 }
 0x2fe   :  { %5214 = vmatmul.mubr.bf16.gmra.mrb[68].mxu1 %v10342_v48  ;;  %v9149_v48 = vld [vmem:[#allocation13 + $0x2ac] ss:$24 sps:$4 sm:$0xff]  }
 0x2ff   :  { %6699 = vmatpush1.bf16.msra.mxu1 %v9111_v17 }
 0x300   :  { %6700 = vmatprep.subr.bf16.mxu1 %v9119_v42 }
 0x303   :  { %6701 = vmatpush1.bf16.msra.mxu1 %v9117_v33 }
 0x304   :  { %6702 = vmatprep.subr.bf16.mxu1 %v9125_v32 }
 0x307   :  { %6703 = vmatpush1.bf16.msra.mxu1 %v9123_v30 }
 0x308   :  { %6704 = vmatprep.subr.bf16.mxu1 %v9131_v37 }
 0x30b   :  { %6705 = vmatpush1.bf16.msra.mxu1 %v9129_v39 }
 0x30c   :  { %6706 = vmatprep.subr.bf16.mxu1 %v9137_v50 }
 0x30f   :  { %6707 = vmatpush1.bf16.msra.mxu1 %v9135_v4 }
 0x310   :  { %6708 = vmatprep.subr.bf16.mxu1 %v9143_v18 }
 0x311   :  { %v4486_v28 = vpop.f32.mrb[56].mxu0  ;;  %v4972_v24 = vpop.f32.mrb[56].mxu1 }
 0x312   :  { %v10391_v22 = vadd.f32 %v4486_v28, %v10370_v40  ;;  %v10394_v56 = vadd.f32 %v4972_v24, %v10373_v34  ;;  %v4488_v15 = vpop.f32.mrb[57].mxu0  ;;  %v4974_v57 = vpop.f32.mrb[57].mxu1  ;;  %v9155_v40 = vld [vmem:[#allocation13 + $0x2dc] ss:$24 sps:$4 sm:$0xff]   ;;  %v9161_v34 = vld [vmem:[#allocation13 + $0x30c] ss:$24 sps:$4 sm:$0xff]  }
 0x313   :  { %v10397_v52 = vadd.f32 %v4488_v15, %v10376_v29  ;;  %v10400_v31 = vadd.f32 %v4974_v57, %v10379_v51  ;;  %v4976_v12 = vpop.f32.mrb[58].mxu1  ;;  %v4490_v58 = vpop.f32.mrb[58].mxu0  ;;  %6709 = vmatpush1.bf16.msra.mxu1 %v9141_v16  ;;  %v5226_v29 = vsub.s32 0, %v9819_v2  ;;  %v5230_v51 = vsub.s32 1, %v9819_v2 }
 0x314   :  { %v4977_v59 = vpop.f32.mrb[59].mxu1  ;;  %v4491_v0 = vpop.f32.mrb[59].mxu0  ;;  %6710 = vmatprep.subr.bf16.mxu1 %v9149_v48  ;;  %v9156_v12 = vld [vmem:[#allocation13 + $0x300] ss:$24 sps:$4 sm:$0xff]  }
 0x315   :  { %v10409_v44 = vrot.slane %v10403_v19, %v5226_v29  ;;  %v10414_v13 = vrot.slane %v10403_v19, %v5230_v51  ;;  %v9159_v58 = vld [vmem:[#allocation13 + $0x308] ss:$24 sps:$4 sm:$0xff]   ;;  %v9164_v59 = vld [vmem:[#allocation13 + $0x334] ss:$24 sps:$4 sm:$0xff]  }
 0x316   :  { %v9167_v0 = vld [vmem:[#allocation13 + $0x33c] ss:$24 sps:$4 sm:$0xff]  }
 0x317   :  { %6711 = vmatpush1.bf16.msra.mxu1 %v9147_v49 }
 0x318   :  { %6712 = vmatprep.subr.bf16.mxu1 %v9155_v40 }
 0x31b   :  { %6713 = vmatpush1.bf16.msra.mxu1 %v9153_v20  ;;  %v9165_v20 = vld [vmem:[#allocation13 + $0x338] ss:$24 sps:$4 sm:$0xff]  }
 0x31c   :  { %6763 = vmatprep.subr.bf16.mxu1 %v9161_v34 }
 0x331   :  { %v4527_v6 = vpop.f32.mrb[20].mxu0 }
 0x332   :  { %v7882_v5 = vadd.f32 %v4527_v6, %v10113_v14  ;;  %v4529_v55 = vpop.f32.mrb[21].mxu0 }
 0x333   :  { %v7884_v38 = vadd.f32 %v4529_v55, %v10118_v27  ;;  %v4531_v46 = vpop.f32.mrb[22].mxu0  ;;  %v9173_v55 = vld [vmem:[#allocation13 + $0x36c] ss:$24 sps:$4 sm:$0xff]  }
 0x334   :  { %v5244_v62 = vadd.f32 %v7882_v5, %v10409_v44  ;;  %v7886_v54 = vadd.f32 %v4531_v46, %v10121_v36  ;;  %v4533_v61 = vpop.f32.mrb[23].mxu0  ;;  %v9170_v5 = vld [vmem:[#allocation13 + $0x364] ss:$24 sps:$4 sm:$0xff]  }
 0x335   :  { %v5245_v26 = vadd.f32 %v7884_v38, %v10414_v13  ;;  %v7888_v35 = vadd.f32 %v4533_v61, %v10124_v45 }
 0x336   :  { %9348 = vtanh.f32 %v5244_v62  ;;  %v5248_v25 = vadd.f32 %v7886_v54, %v10409_v44 }
 0x337   :  { %9350 = vtanh.f32 %v5245_v26  ;;  %v5249_v21 = vadd.f32 %v7888_v35, %v10414_v13 }
 0x338   :  { %9352 = vtanh.f32 %v5248_v25 }
 0x339   :  { %9354 = vtanh.f32 %v5249_v21  ;;  %v4537_v14 = vpop.f32.mrb[24].mxu0 }
 0x33a   :  { %v7890_v27 = vadd.f32 %v4537_v14, %v10137_v10  ;;  %v4539_v11 = vpop.f32.mrb[25].mxu0 }
 0x33b   :  { %v7892_v43 = vadd.f32 %v4539_v11, %v10142_v9  ;;  %v4541_v36 = vpop.f32.mrb[26].mxu0  ;;  %v9168_v11 = vld [vmem:[#allocation13 + $0x360] ss:$24 sps:$4 sm:$0xff]  }
 0x33c   :  { %v5252_v17 = vadd.f32 %v7890_v27, %v10409_v44  ;;  %v7894_v42 = vadd.f32 %v4541_v36, %v10145_v3  ;;  %v4543_v45 = vpop.f32.mrb[27].mxu0 }
 0x33d   :  { %v5253_v33 = vadd.f32 %v7892_v43, %v10414_v13  ;;  %v7896_v32 = vadd.f32 %v4543_v45, %v10148_v41  ;;  %v9171_v43 = vld [vmem:[#allocation13 + $0x368] ss:$24 sps:$4 sm:$0xff]  }
 0x33e   :  { %9356 = vtanh.f32 %v5252_v17  ;;  %v5256_v30 = vadd.f32 %v7894_v42, %v10409_v44  ;;  %v9179_v17 = vld [vmem:[#allocation13 + $0x39c] ss:$24 sps:$4 sm:$0xff]  }
 0x33f   :  { %9358 = vtanh.f32 %v5253_v33  ;;  %v5257_v37 = vadd.f32 %v7896_v32, %v10414_v13  ;;  %v9177_v33 = vld [vmem:[#allocation13 + $0x398] ss:$24 sps:$4 sm:$0xff]  }
 0x340   :  { %v9349_v10 = vpop.eup %9348  ;;  %9360 = vtanh.f32 %v5256_v30 }
 0x341   :  { %v9351_v39 = vpop.eup %9350  ;;  %9362 = vtanh.f32 %v5257_v37  ;;  %v4547_v9 = vpop.f32.mrb[28].mxu0 }
 0x342   :  { %v9353_v50 = vpop.eup %9352  ;;  %v7898_v4 = vadd.f32 %v4547_v9, %v10159_v60  ;;  %v4549_v3 = vpop.f32.mrb[29].mxu0 }
 0x343   :  { %v9355_v18 = vpop.eup %9354  ;;  %v7900_v16 = vadd.f32 %v4549_v3, %v10162_v8  ;;  %v4551_v48 = vpop.f32.mrb[30].mxu0  ;;  %v10434_v41 = vpack.c.bf16 %v9353_v50, %v9349_v10  ;;  %v9182_v10 = vld [vmem:[#allocation13 + $0x3c4] ss:$24 sps:$4 sm:$0xff]  }
 0x344   :  { %v5260_v28 = vadd.f32 %v7898_v4, %v10409_v44  ;;  %v7902_v24 = vadd.f32 %v4551_v48, %v10165_v53  ;;  %v4553_v15 = vpop.f32.mrb[31].mxu0  ;;  %v10438_v57 = vpack.c.bf16 %v9355_v18, %v9351_v39  ;;  %v9185_v39 = vld [vmem:[#allocation13 + $0x3cc] ss:$24 sps:$4 sm:$0xff]  }
 0x345   :  { %v5261_v49 = vadd.f32 %v7900_v16, %v10414_v13  ;;  %v7904_v60 = vadd.f32 %v4553_v15, %v10168_v63  ;;  %v9162_v63 = vld [vmem:[#allocation13 + $0x330] ss:$24 sps:$4 sm:$0xff]  }
 0x346   :  { %9364 = vtanh.f32 %v5260_v28  ;;  %v5264_v8 = vadd.f32 %v7902_v24, %v10409_v44  ;;  %6552 = vmatprep.mubr.bf16.mxu0 %v10438_v57  ;;  %6714 = vmatprep.mubr.bf16.mxu1 %v10438_v57 }
 0x347   :  { %9366 = vtanh.f32 %v5261_v49  ;;  %v5265_v53 = vadd.f32 %v7904_v60, %v10414_v13  ;;  %6553 = vmatmul.mubr.bf16.vlgmr.msra.gmra.mrb[64].mxu0 %v10434_v41  ;;  %6715 = vmatmul.mubr.bf16.vlgmr.msra.gmra.mrb[72].mxu1 %v10434_v41  ;;  %v9183_v60 = vld [vmem:[#allocation13 + $0x3c8] ss:$24 sps:$4 sm:$0xff]  }
 0x348   :  { %v9357_v40 = vpop.eup %9356  ;;  %9368 = vtanh.f32 %v5264_v8  ;;  %6602 = vmatpush1.bf16.msra.mxu0 %v9156_v12  ;;  %6764 = vmatpush1.bf16.msra.mxu1 %v9159_v58  ;;  %v9186_v8 = vld [vmem:[#allocation13 + $0x3f0] ss:$24 sps:$4 sm:$0xff]  }
 0x349   :  { %v9359_v34 = vpop.eup %9358  ;;  %9370 = vtanh.f32 %v5265_v53  ;;  %v4557_v6 = vpop.f32.mrb[32].mxu0  ;;  %6603 = vmatprep.subr.bf16.mxu0 %v9164_v59  ;;  %6765 = vmatprep.subr.bf16.mxu1 %v9167_v0  ;;  %v9189_v53 = vld [vmem:[#allocation13 + $0x3f8] ss:$24 sps:$4 sm:$0xff]  }
 0x34a   :  { %v9361_v38 = vpop.eup %9360  ;;  %v7906_v46 = vadd.f32 %v4557_v6, %v10171_v47  ;;  %v4559_v62 = vpop.f32.mrb[33].mxu0 }
 0x34b   :  { %v9363_v54 = vpop.eup %9362  ;;  %v7908_v61 = vadd.f32 %v4559_v62, %v10174_v7  ;;  %v4561_v26 = vpop.f32.mrb[34].mxu0  ;;  %v10450_v35 = vpack.c.bf16 %v9361_v38, %v9357_v40  ;;  %v9176_v7 = vld [vmem:[#allocation13 + $0x394] ss:$24 sps:$4 sm:$0xff]   ;;  %v9194_v40 = vld [vmem:[#allocation13 + $0x424] ss:$24 sps:$4 sm:$0xff]  }
 0x34c   :  { %v5268_v25 = vadd.f32 %v7906_v46, %v10409_v44  ;;  %v7910_v21 = vadd.f32 %v4561_v26, %v10177_v23  ;;  %v4563_v14 = vpop.f32.mrb[35].mxu0  ;;  %v10454_v27 = vpack.c.bf16 %v9363_v54, %v9359_v34  ;;  %6604 = vmatpush1.bf16.msra.mxu0 %v9162_v63  ;;  %6766 = vmatpush1.bf16.msra.mxu1 %v9165_v20  ;;  %v9197_v63 = vld [vmem:[#allocation13 + $0x42c] ss:$24 sps:$4 sm:$0xff]   ;;  %v9195_v38 = vld [vmem:[#allocation13 + $0x428] ss:$24 sps:$4 sm:$0xff]  }
 0x34d   :  { %v5269_v47 = vadd.f32 %v7908_v61, %v10414_v13  ;;  %v7912_v36 = vadd.f32 %v4563_v14, %v10180_v1  ;;  %6605 = vmatprep.subr.bf16.mxu0 %v9170_v5  ;;  %6767 = vmatprep.subr.bf16.mxu1 %v9173_v55  ;;  %v9174_v1 = vld [vmem:[#allocation13 + $0x390] ss:$24 sps:$4 sm:$0xff]   ;;  %v9192_v55 = vld [vmem:[#allocation13 + $0x420] ss:$24 sps:$4 sm:$0xff]   ;;  %v9200_v46 = vld [vmem:[#allocation13 + $0x454] ss:$24 sps:$4 sm:$0xff]  }
 0x34e   :  { %9372 = vtanh.f32 %v5268_v25  ;;  %v5272_v42 = vadd.f32 %v7910_v21, %v10409_v44  ;;  %6562 = vmatprep.mubr.bf16.mxu0 %v10454_v27  ;;  %6724 = vmatprep.mubr.bf16.mxu1 %v10454_v27  ;;  %v9203_v62 = vld [vmem:[#allocation13 + $0x45c] ss:$24 sps:$4 sm:$0xff]   ;;  %v9198_v61 = vld [vmem:[#allocation13 + $0x450] ss:$24 sps:$4 sm:$0xff]  }
 0x34f   :  { %9374 = vtanh.f32 %v5269_v47  ;;  %v5273_v23 = vadd.f32 %v7912_v36, %v10414_v13  ;;  %6563 = vmatmul.mubr.bf16.gmra.mrb[68].mxu0 %v10450_v35  ;;  %6725 = vmatmul.mubr.bf16.gmra.mrb[76].mxu1 %v10450_v35  ;;  %v9201_v26 = vld [vmem:[#allocation13 + $0x458] ss:$24 sps:$4 sm:$0xff]   ;;  %v9206_v14 = vld [vmem:[#allocation13 + $0x484] ss:$24 sps:$4 sm:$0xff]   ;;  %v9207_v36 = vld [vmem:[#allocation13 + $0x488] ss:$24 sps:$4 sm:$0xff]  }
 0x350   :  { %v9365_v45 = vpop.eup %9364  ;;  %9376 = vtanh.f32 %v5272_v42  ;;  %6606 = vmatpush1.bf16.msra.mxu0 %v9168_v11  ;;  %6768 = vmatpush1.bf16.msra.mxu1 %v9171_v43  ;;  %v9209_v11 = vld [vmem:[#allocation13 + $0x48c] ss:$24 sps:$4 sm:$0xff]   ;;  %v9204_v47 = vld [vmem:[#allocation13 + $0x480] ss:$24 sps:$4 sm:$0xff]   ;;  %v9210_v42 = vld [vmem:[#allocation13 + $0x4b0] ss:$24 sps:$4 sm:$0xff]  }
 0x351   :  { %v9367_v32 = vpop.eup %9366  ;;  %9378 = vtanh.f32 %v5273_v23  ;;  %v4567_v30 = vpop.f32.mrb[60].mxu0  ;;  %6607 = vmatprep.subr.bf16.mxu0 %v9176_v7  ;;  %6769 = vmatprep.subr.bf16.mxu1 %v9179_v17  ;;  %v9212_v7 = vld [vmem:[#allocation13 + $0x4b4] ss:$24 sps:$4 sm:$0xff]   ;;  %v9213_v23 = vld [vmem:[#allocation13 + $0x4b8] ss:$24 sps:$4 sm:$0xff]  }
 0x352   :  { %v5053_v37 = vpop.f32.mrb[60].mxu1  ;;  %v9369_v9 = vpop.eup %9368  ;;  %v4568_v50 = vadd.f32 %v4567_v30, %v10391_v22  ;;  %v9215_v17 = vld [vmem:[#allocation13 + $0x4bc] ss:$24 sps:$4 sm:$0xff]  }
 0x353   :  { %v10466_v4 = vadd.f32 %v5053_v37, %v10394_v56  ;;  %v4569_v3 = vpop.f32.mrb[61].mxu0  ;;  %v5055_v18 = vpop.f32.mrb[61].mxu1  ;;  %v10472_v24 = vpack.c.bf16 %v9369_v9, %v9365_v45  ;;  %v9180_v56 = vld [vmem:[#allocation13 + $0x3c0] ss:$24 sps:$4 sm:$0xff]   ;;  %v9218_v45 = vld [vmem:[#allocation13 + $0x4e4] ss:$24 sps:$4 sm:$0xff]  }
 0x354   :  { %v9371_v16 = vpop.eup %9370  ;;  %v4570_v48 = vadd.f32 %v4569_v3, %v10397_v52  ;;  %v10470_v28 = vadd.f32 %v5055_v18, %v10400_v31  ;;  %v5057_v15 = vpop.f32.mrb[62].mxu1  ;;  %v5276_v58 = vadd.f32 %v10409_v44, %v4568_v50  ;;  %6608 = vmatpush1.bf16.msra.mxu0 %v9174_v1  ;;  %6770 = vmatpush1.bf16.msra.mxu1 %v9177_v33  ;;  %v9188_v52 = vld [vmem:[#allocation13 + $0x3f4] ss:$24 sps:$4 sm:$0xff]   ;;  %v9216_v33 = vld [vmem:[#allocation13 + $0x4e0] ss:$24 sps:$4 sm:$0xff]  }
 0x355   :  { %v4571_v12 = vpop.f32.mrb[62].mxu0  ;;  %v10475_v49 = vpack.c.bf16 %v9371_v16, %v9367_v32  ;;  %v5058_v22 = vpop.f32.mrb[63].mxu1  ;;  %6609 = vmatprep.subr.bf16.mxu0 %v9182_v10  ;;  %6771 = vmatprep.subr.bf16.mxu1 %v9185_v39  ;;  %v9191_v31 = vld [vmem:[#allocation13 + $0x3fc] ss:$24 sps:$4 sm:$0xff]   ;;  %v9221_v1 = vld [vmem:[#allocation13 + $0x4ec] ss:$24 sps:$4 sm:$0xff]  }
 0x356   :  { %v4572_v59 = vpop.f32.mrb[63].mxu0  ;;  %v5277_v0 = vadd.f32 %v10414_v13, %v4570_v48  ;;  %v9219_v32 = vld [vmem:[#allocation13 + $0x4e8] ss:$24 sps:$4 sm:$0xff]   ;;  %v9224_v30 = vld [vmem:[#allocation13 + $0x514] ss:$24 sps:$4 sm:$0xff]  }
 0x357   :  { %6572 = vmatprep.mubr.bf16.mxu0 %v10475_v49  ;;  %6734 = vmatprep.mubr.bf16.mxu1 %v10475_v49  ;;  %v9227_v37 = vld [vmem:[#allocation13 + $0x51c] ss:$24 sps:$4 sm:$0xff]   ;;  %v9222_v10 = vld [vmem:[#allocation13 + $0x510] ss:$24 sps:$4 sm:$0xff]   ;;  %v9233_v50 = vld [vmem:[#allocation13 + $0x54c] ss:$24 sps:$4 sm:$0xff]  }
 0x358   :  { %9380 = vtanh.f32 %v5277_v0  ;;  %6573 = vmatmul.mubr.bf16.gmra.mrb[72].mxu0 %v10472_v24  ;;  %6735 = vmatmul.mubr.bf16.gmra.mrb[80].mxu1 %v10472_v24  ;;  %v9373_v44 = vpop.eup %9372  ;;  %v9225_v39 = vld [vmem:[#allocation13 + $0x518] ss:$24 sps:$4 sm:$0xff]   ;;  %v9230_v9 = vld [vmem:[#allocation13 + $0x544] ss:$24 sps:$4 sm:$0xff]   ;;  %v9231_v18 = vld [vmem:[#allocation13 + $0x548] ss:$24 sps:$4 sm:$0xff]  }
 0x359   :  { %9382 = vtanh.f32 %v5276_v58  ;;  %6610 = vmatpush1.bf16.msra.mxu0 %v9180_v56  ;;  %6772 = vmatpush1.bf16.msra.mxu1 %v9183_v60  ;;  %v9375_v13 = vpop.eup %9374  ;;  %v9228_v3 = vld [vmem:[#allocation13 + $0x540] ss:$24 sps:$4 sm:$0xff]   ;;  %v9236_v16 = vld [vmem:[#allocation13 + $0x574] ss:$24 sps:$4 sm:$0xff]   ;;  %v9234_v15 = vld [vmem:[#allocation13 + $0x570] ss:$24 sps:$4 sm:$0xff]  }
 0x35a   :  { %6611 = vmatprep.subr.bf16.mxu0 %v9188_v52  ;;  %6773 = vmatprep.subr.bf16.mxu1 %v9191_v31  ;;  %v9377_v20 = vpop.eup %9376  ;;  %v9239_v48 = vld [vmem:[#allocation13 + $0x57c] ss:$24 sps:$4 sm:$0xff]   ;;  %v9237_v12 = vld [vmem:[#allocation13 + $0x578] ss:$24 sps:$4 sm:$0xff]   ;;  %v9245_v22 = vld [vmem:[#allocation13 + $0x5ac] ss:$24 sps:$4 sm:$0xff]  }
 0x35b   :  { %v9379_v34 = vpop.eup %9378  ;;  %v10482_v6 = vpack.c.bf16 %v9377_v20, %v9373_v44  ;;  %v9242_v58 = vld [vmem:[#allocation13 + $0x5a4] ss:$24 sps:$4 sm:$0xff]   ;;  %v9240_v56 = vld [vmem:[#allocation13 + $0x5a0] ss:$24 sps:$4 sm:$0xff]   ;;  %v9248_v59 = vld [vmem:[#allocation13 + $0x5d4] ss:$24 sps:$4 sm:$0xff]  }
 0x35c   :  { %v10484_v5 = vpack.c.bf16 %v9379_v34, %v9375_v13  ;;  %v9243_v60 = vld [vmem:[#allocation13 + $0x5a8] ss:$24 sps:$4 sm:$0xff]   ;;  %v9251_v0 = vld [vmem:[#allocation13 + $0x5dc] ss:$24 sps:$4 sm:$0xff]   ;;  %v9249_v31 = vld [vmem:[#allocation13 + $0x5d8] ss:$24 sps:$4 sm:$0xff]  }
 0x35d   :  { %6612 = vmatpush1.bf16.msra.mxu0 %v9186_v8  ;;  %6774 = vmatpush1.bf16.msra.mxu1 %v9189_v53  ;;  %v9246_v52 = vld [vmem:[#allocation13 + $0x5d0] ss:$24 sps:$4 sm:$0xff]   ;;  %v9254_v44 = vld [vmem:[#allocation13 + $0x14] ss:$24 sps:$4 sm:$0xff]   ;;  %v5234_v34 = vsub.s32 2, %v9819_v2 }
 0x35e   :  { %6613 = vmatprep.subr.bf16.mxu0 %v9194_v40  ;;  %6775 = vmatprep.subr.bf16.mxu1 %v9197_v63 }
 0x35f   :  { %6582 = vmatprep.mubr.bf16.mxu0 %v10484_v5  ;;  %6744 = vmatprep.mubr.bf16.mxu1 %v10484_v5 }
 0x360   :  { %6583 = vmatmul.mubr.bf16.gmra.mrb[76].mxu0 %v10482_v6  ;;  %6745 = vmatmul.mubr.bf16.gmra.mrb[84].mxu1 %v10482_v6 }
 0x361   :  { %6614 = vmatpush1.bf16.msra.mxu0 %v9192_v55  ;;  %6776 = vmatpush1.bf16.msra.mxu1 %v9195_v38  ;;  %v5238_v55 = vsub.s32 3, %v9819_v2  ;;  %v10509_v38 = vrot.slane %v10403_v19, %v5234_v34 }
 0x362   :  { %v9381_v54 = vpop.eup %9380  ;;  %6615 = vmatprep.subr.bf16.mxu0 %v9200_v46  ;;  %6777 = vmatprep.subr.bf16.mxu1 %v9203_v62 }
 0x363   :  { %v9383_v25 = vpop.eup %9382  ;;  %v10490_v21 = vpack.c.bf16 %v9381_v54, %v9381_v54 }
 0x364   :  { %v10494_v43 = vpack.c.bf16 %v9383_v25, %v9383_v25 }
 0x365   :  { %6592 = vmatprep.mubr.bf16.mxu0 %v10490_v21  ;;  %6754 = vmatprep.mubr.bf16.mxu1 %v10490_v21 }
 0x366   :  { %6616 = vmatpush1.bf16.msra.mxu0 %v9198_v61  ;;  %6778 = vmatpush1.bf16.msra.mxu1 %v9201_v26 }
 0x367   :  { %6617 = vmatprep.subr.bf16.mxu0 %v9206_v14  ;;  %6779 = vmatprep.subr.bf16.mxu1 %v9209_v11 }
 0x368   :  { %6593 = vmatmul.mubr.bf16.gmra.mrb[80].mxu0 %v10494_v43  ;;  %6755 = vmatmul.mubr.bf16.gmra.mrb[88].mxu1 %v10494_v43 }
 0x36a   :  { %6618 = vmatpush1.bf16.msra.mxu0 %v9204_v47  ;;  %6780 = vmatpush1.bf16.msra.mxu1 %v9207_v36 }
 0x36b   :  { %6619 = vmatprep.subr.bf16.mxu0 %v9212_v7  ;;  %6781 = vmatprep.subr.bf16.mxu1 %v9215_v17 }
 0x36e   :  { %6620 = vmatpush1.bf16.msra.mxu0 %v9210_v42  ;;  %6782 = vmatpush1.bf16.msra.mxu1 %v9213_v23 }
 0x36f   :  { %6621 = vmatprep.subr.bf16.mxu0 %v9218_v45  ;;  %6783 = vmatprep.subr.bf16.mxu1 %v9221_v1 }
 0x372   :  { %6622 = vmatpush1.bf16.msra.mxu0 %v9216_v33  ;;  %6784 = vmatpush1.bf16.msra.mxu1 %v9219_v32 }
 0x373   :  { %6623 = vmatprep.subr.bf16.mxu0 %v9224_v30  ;;  %6785 = vmatprep.subr.bf16.mxu1 %v9227_v37 }
 0x376   :  { %6624 = vmatpush1.bf16.msra.mxu0 %v9222_v10  ;;  %6786 = vmatpush1.bf16.msra.mxu1 %v9225_v39 }
 0x377   :  { %6625 = vmatprep.subr.bf16.mxu0 %v9230_v9  ;;  %6787 = vmatprep.subr.bf16.mxu1 %v9233_v50  ;;  %v9252_v50 = vld [vmem:[#allocation13 + $0x10] ss:$24 sps:$4 sm:$0xff]  }
 0x37a   :  { %6626 = vmatpush1.bf16.msra.mxu0 %v9228_v3  ;;  %6788 = vmatpush1.bf16.msra.mxu1 %v9231_v18 }
 0x37b   :  { %6627 = vmatprep.subr.bf16.mxu0 %v9236_v16  ;;  %6789 = vmatprep.subr.bf16.mxu1 %v9239_v48  ;;  %v9257_v16 = vld [vmem:[#allocation13 + $0x44] ss:$24 sps:$4 sm:$0xff]  }
 0x37e   :  { %6628 = vmatpush1.bf16.msra.mxu0 %v9234_v15  ;;  %6790 = vmatpush1.bf16.msra.mxu1 %v9237_v12 }
 0x37f   :  { %6629 = vmatprep.subr.bf16.mxu0 %v9242_v58  ;;  %6791 = vmatprep.subr.bf16.mxu1 %v9245_v22  ;;  %v9255_v22 = vld [vmem:[#allocation13 + $0x40] ss:$24 sps:$4 sm:$0xff]  }
 0x382   :  { %6630 = vmatpush1.bf16.msra.mxu0 %v9240_v56  ;;  %6792 = vmatpush1.bf16.msra.mxu1 %v9243_v60  ;;  %v9260_v60 = vld [vmem:[#allocation13 + $0x74] ss:$24 sps:$4 sm:$0xff]  }
 0x383   :  { %6631 = vmatprep.subr.bf16.mxu0 %v9248_v59  ;;  %6793 = vmatprep.subr.bf16.mxu1 %v9251_v0 }
 0x386   :  { %6632 = vmatpush1.bf16.msra.mxu0 %v9246_v52  ;;  %6794 = vmatpush1.bf16.msra.mxu1 %v9249_v31 }
 0x387   :  { %6844 = vmatprep.subr.bf16.mxu0 %v9254_v44 }
 0x391   :  { %v5134_v8 = vpop.f32.mrb[64].mxu1 }
 0x392   :  { %v10499_v53 = vadd.f32 %v5134_v8, %v10466_v4  ;;  %v5136_v13 = vpop.f32.mrb[65].mxu1  ;;  %v10514_v4 = vrot.slane %v10403_v19, %v5238_v55 }
 0x393   :  { %v10502_v40 = vadd.f32 %v5136_v13, %v10470_v28  ;;  %v5138_v63 = vpop.f32.mrb[66].mxu1 }
 0x394   :  { %v5139_v20 = vpop.f32.mrb[67].mxu1  ;;  %v9258_v63 = vld [vmem:[#allocation13 + $0x70] ss:$24 sps:$4 sm:$0xff]  }
 0x3b1   :  { %v5175_v46 = vpop.f32.mrb[0].mxu1 }
 0x3b2   :  { %v5246_v28 = vadd.f32 %v10509_v38, %v5175_v46  ;;  %v5177_v62 = vpop.f32.mrb[1].mxu1 }
 0x3b3   :  { %v5247_v54 = vadd.f32 %v10514_v4, %v5177_v62  ;;  %v5179_v61 = vpop.f32.mrb[2].mxu1 }
 0x3b4   :  { %9384 = vtanh.f32 %v5246_v28  ;;  %v5250_v26 = vadd.f32 %v10509_v38, %v5179_v61  ;;  %v5181_v25 = vpop.f32.mrb[3].mxu1  ;;  %v9263_v28 = vld [vmem:[#allocation13 + $0xa4] ss:$24 sps:$4 sm:$0xff]  }
 0x3b5   :  { %9386 = vtanh.f32 %v5247_v54  ;;  %v5251_v14 = vadd.f32 %v10514_v4, %v5181_v25  ;;  %v9261_v25 = vld [vmem:[#allocation13 + $0xa0] ss:$24 sps:$4 sm:$0xff]  }
 0x3b6   :  { %9388 = vtanh.f32 %v5250_v26 }
 0x3b7   :  { %9390 = vtanh.f32 %v5251_v14 }
 0x3b9   :  { %v5185_v11 = vpop.f32.mrb[4].mxu1 }
 0x3ba   :  { %v5254_v19 = vadd.f32 %v10509_v38, %v5185_v11  ;;  %v5187_v47 = vpop.f32.mrb[5].mxu1  ;;  %v9266_v11 = vld [vmem:[#allocation13 + $0xd4] ss:$24 sps:$4 sm:$0xff]  }
 0x3bb   :  { %v5255_v36 = vadd.f32 %v10514_v4, %v5187_v47  ;;  %v5189_v7 = vpop.f32.mrb[6].mxu1 }
 0x3bc   :  { %9392 = vtanh.f32 %v5254_v19  ;;  %v5258_v17 = vadd.f32 %v10509_v38, %v5189_v7  ;;  %v5191_v42 = vpop.f32.mrb[7].mxu1 }
 0x3bd   :  { %9394 = vtanh.f32 %v5255_v36  ;;  %v5259_v23 = vadd.f32 %v10514_v4, %v5191_v42 }
 0x3be   :  { %v9385_v45 = vpop.eup %9384  ;;  %9396 = vtanh.f32 %v5258_v17 }
 0x3bf   :  { %v9387_v1 = vpop.eup %9386  ;;  %9398 = vtanh.f32 %v5259_v23 }
 0x3c0   :  { %v9389_v33 = vpop.eup %9388 }
 0x3c1   :  { %v9391_v32 = vpop.eup %9390  ;;  %v5195_v30 = vpop.f32.mrb[8].mxu1  ;;  %v10524_v37 = vpack.c.bf16 %v9389_v33, %v9385_v45  ;;  %v9264_v45 = vld [vmem:[#allocation13 + $0xd0] ss:$24 sps:$4 sm:$0xff]   ;;  %v9269_v33 = vld [vmem:[#allocation13 + $0x104] ss:$24 sps:$4 sm:$0xff]  }
 0x3c2   :  { %v5262_v10 = vadd.f32 %v10509_v38, %v5195_v30  ;;  %v5197_v39 = vpop.f32.mrb[9].mxu1  ;;  %v10527_v9 = vpack.c.bf16 %v9391_v32, %v9387_v1 }
 0x3c3   :  { %v5263_v3 = vadd.f32 %v10514_v4, %v5197_v39  ;;  %v5199_v18 = vpop.f32.mrb[10].mxu1 }
 0x3c4   :  { %9400 = vtanh.f32 %v5262_v10  ;;  %v5266_v48 = vadd.f32 %v10509_v38, %v5199_v18  ;;  %v5201_v15 = vpop.f32.mrb[11].mxu1  ;;  %6633 = vmatprep.mubr.bf16.mxu0 %v10527_v9  ;;  %6795 = vmatprep.mubr.bf16.mxu1 %v10527_v9 }
 0x3c5   :  { %9402 = vtanh.f32 %v5263_v3  ;;  %v5267_v12 = vadd.f32 %v10514_v4, %v5201_v15  ;;  %6634 = vmatmul.mubr.bf16.vlgmr.msra.gmra.mrb[64].mxu0 %v10524_v37  ;;  %6796 = vmatmul.mubr.bf16.vlgmr.msra.gmra.mrb[72].mxu1 %v10524_v37  ;;  %v9272_v3 = vld [vmem:[#allocation13 + $0x134] ss:$24 sps:$4 sm:$0xff]   ;;  %v9275_v15 = vld [vmem:[#allocation13 + $0x164] ss:$24 sps:$4 sm:$0xff]  }
 0x3c6   :  { %v9393_v58 = vpop.eup %9392  ;;  %9404 = vtanh.f32 %v5266_v48  ;;  %6845 = vmatpush1.bf16.msra.mxu0 %v9252_v50 }
 0x3c7   :  { %v9395_v56 = vpop.eup %9394  ;;  %9406 = vtanh.f32 %v5267_v12  ;;  %6846 = vmatprep.subr.bf16.mxu0 %v9257_v16  ;;  %v9273_v12 = vld [vmem:[#allocation13 + $0x160] ss:$24 sps:$4 sm:$0xff]  }
 0x3c8   :  { %v9397_v59 = vpop.eup %9396 }
 0x3c9   :  { %v9399_v0 = vpop.eup %9398  ;;  %v5205_v52 = vpop.f32.mrb[12].mxu1  ;;  %v10536_v31 = vpack.c.bf16 %v9397_v59, %v9393_v58  ;;  %v9278_v58 = vld [vmem:[#allocation13 + $0x194] ss:$24 sps:$4 sm:$0xff]   ;;  %v9276_v59 = vld [vmem:[#allocation13 + $0x190] ss:$24 sps:$4 sm:$0xff]  }
 0x3ca   :  { %v5270_v44 = vadd.f32 %v10509_v38, %v5205_v52  ;;  %6847 = vmatpush1.bf16.msra.mxu0 %v9255_v22  ;;  %v5207_v8 = vpop.f32.mrb[13].mxu1  ;;  %v10539_v13 = vpack.c.bf16 %v9399_v0, %v9395_v56  ;;  %v9281_v52 = vld [vmem:[#allocation13 + $0x1c4] ss:$24 sps:$4 sm:$0xff]  }
 0x3cb   :  { %v5271_v20 = vadd.f32 %v10514_v4, %v5207_v8  ;;  %v5209_v46 = vpop.f32.mrb[14].mxu1  ;;  %6848 = vmatprep.subr.bf16.mxu0 %v9260_v60  ;;  %v9284_v8 = vld [vmem:[#allocation13 + $0x1f4] ss:$24 sps:$4 sm:$0xff]  }
 0x3cc   :  { %9408 = vtanh.f32 %v5270_v44  ;;  %v5274_v62 = vadd.f32 %v10509_v38, %v5209_v46  ;;  %v5211_v54 = vpop.f32.mrb[15].mxu1  ;;  %6643 = vmatprep.mubr.bf16.mxu0 %v10539_v13  ;;  %6805 = vmatprep.mubr.bf16.mxu1 %v10539_v13  ;;  %v9279_v44 = vld [vmem:[#allocation13 + $0x1c0] ss:$24 sps:$4 sm:$0xff]  }
 0x3cd   :  { %9410 = vtanh.f32 %v5271_v20  ;;  %v5275_v61 = vadd.f32 %v10514_v4, %v5211_v54  ;;  %6644 = vmatmul.mubr.bf16.gmra.mrb[68].mxu0 %v10536_v31  ;;  %6806 = vmatmul.mubr.bf16.gmra.mrb[76].mxu1 %v10536_v31  ;;  %v9287_v20 = vld [vmem:[#allocation13 + $0x224] ss:$24 sps:$4 sm:$0xff]   ;;  %v9285_v46 = vld [vmem:[#allocation13 + $0x220] ss:$24 sps:$4 sm:$0xff]  }
 0x3ce   :  { %v9401_v26 = vpop.eup %9400  ;;  %9412 = vtanh.f32 %v5274_v62  ;;  %6849 = vmatpush1.bf16.msra.mxu0 %v9258_v63  ;;  %v9282_v63 = vld [vmem:[#allocation13 + $0x1f0] ss:$24 sps:$4 sm:$0xff]   ;;  %v9293_v54 = vld [vmem:[#allocation13 + $0x284] ss:$24 sps:$4 sm:$0xff]  }
 0x3cf   :  { %v9403_v14 = vpop.eup %9402  ;;  %9414 = vtanh.f32 %v5275_v61  ;;  %6850 = vmatprep.subr.bf16.mxu0 %v9263_v28  ;;  %v9290_v28 = vld [vmem:[#allocation13 + $0x254] ss:$24 sps:$4 sm:$0xff]   ;;  %v9288_v62 = vld [vmem:[#allocation13 + $0x250] ss:$24 sps:$4 sm:$0xff]   ;;  %v9291_v61 = vld [vmem:[#allocation13 + $0x280] ss:$24 sps:$4 sm:$0xff]  }
 0x3d0   :  { %v9405_v19 = vpop.eup %9404 }
 0x3d1   :  { %v9407_v47 = vpop.eup %9406  ;;  %v5215_v36 = vpop.f32.mrb[68].mxu1  ;;  %v10548_v7 = vpack.c.bf16 %v9405_v19, %v9401_v26  ;;  %v9296_v26 = vld [vmem:[#allocation13 + $0x2b4] ss:$24 sps:$4 sm:$0xff]   ;;  %v9300_v19 = vld [vmem:[#allocation13 + $0x310] ss:$24 sps:$4 sm:$0xff]  }
 0x3d2   :  { %v5216_v17 = vadd.f32 %v5215_v36, %v10499_v53  ;;  %6851 = vmatpush1.bf16.msra.mxu0 %v9261_v25  ;;  %v5217_v42 = vpop.f32.mrb[69].mxu1  ;;  %v10551_v23 = vpack.c.bf16 %v9407_v47, %v9403_v14  ;;  %v9299_v25 = vld [vmem:[#allocation13 + $0x2e4] ss:$24 sps:$4 sm:$0xff]   ;;  %v9297_v14 = vld [vmem:[#allocation13 + $0x2e0] ss:$24 sps:$4 sm:$0xff]  }
 0x3d3   :  { %v5218_v1 = vadd.f32 %v5217_v42, %v10502_v40  ;;  %6852 = vmatprep.subr.bf16.mxu0 %v9266_v11  ;;  %v5219_v32 = vpop.f32.mrb[70].mxu1  ;;  %v9267_v40 = vld [vmem:[#allocation13 + $0x100] ss:$24 sps:$4 sm:$0xff]   ;;  %v9302_v11 = vld [vmem:[#allocation13 + $0x314] ss:$24 sps:$4 sm:$0xff]  }
 0x3d4   :  { %v5278_v30 = vadd.f32 %v10509_v38, %v5216_v17  ;;  %6653 = vmatprep.mubr.bf16.mxu0 %v10551_v23  ;;  %6815 = vmatprep.mubr.bf16.mxu1 %v10551_v23  ;;  %v5220_v10 = vpop.f32.mrb[71].mxu1  ;;  %v9305_v47 = vld [vmem:[#allocation13 + $0x344] ss:$24 sps:$4 sm:$0xff]   ;;  %v9303_v36 = vld [vmem:[#allocation13 + $0x340] ss:$24 sps:$4 sm:$0xff]  }
 0x3d5   :  { %v5279_v39 = vadd.f32 %v10514_v4, %v5218_v1  ;;  %6654 = vmatmul.mubr.bf16.gmra.mrb[72].mxu0 %v10548_v7  ;;  %6816 = vmatmul.mubr.bf16.gmra.mrb[80].mxu1 %v10548_v7  ;;  %v9270_v4 = vld [vmem:[#allocation13 + $0x130] ss:$24 sps:$4 sm:$0xff]   ;;  %v9308_v17 = vld [vmem:[#allocation13 + $0x374] ss:$24 sps:$4 sm:$0xff]   ;;  %v9309_v1 = vld [vmem:[#allocation13 + $0x3a0] ss:$24 sps:$4 sm:$0xff]  }
 0x3d6   :  { %v9409_v53 = vpop.eup %9408  ;;  %9416 = vtanh.f32 %v5278_v30  ;;  %6853 = vmatpush1.bf16.msra.mxu0 %v9264_v45  ;;  %v9306_v42 = vld [vmem:[#allocation13 + $0x370] ss:$24 sps:$4 sm:$0xff]   ;;  %v9311_v45 = vld [vmem:[#allocation13 + $0x3a4] ss:$24 sps:$4 sm:$0xff]   ;;  %v9315_v32 = vld [vmem:[#allocation13 + $0x400] ss:$24 sps:$4 sm:$0xff]  }
 0x3d7   :  { %v9411_v50 = vpop.eup %9410  ;;  %9418 = vtanh.f32 %v5279_v39  ;;  %6854 = vmatprep.subr.bf16.mxu0 %v9269_v33  ;;  %v9314_v33 = vld [vmem:[#allocation13 + $0x3d4] ss:$24 sps:$4 sm:$0xff]   ;;  %v9321_v10 = vld [vmem:[#allocation13 + $0x460] ss:$24 sps:$4 sm:$0xff]  }
 0x3d8   :  { %v9413_v38 = vpop.eup %9412  ;;  %v9320_v30 = vld [vmem:[#allocation13 + $0x434] ss:$24 sps:$4 sm:$0xff]  }
 0x3d9   :  { %v9415_v18 = vpop.eup %9414  ;;  %v10560_v16 = vpack.c.bf16 %v9413_v38, %v9409_v53  ;;  %v9326_v39 = vld [vmem:[#allocation13 + $0x494] ss:$24 sps:$4 sm:$0xff]   ;;  %v9327_v53 = vld [vmem:[#allocation13 + $0x4c0] ss:$24 sps:$4 sm:$0xff]   ;;  %v9336_v38 = vld [vmem:[#allocation13 + $0x550] ss:$24 sps:$4 sm:$0xff]  }
 0x3da   :  { %6855 = vmatpush1.bf16.msra.mxu0 %v9267_v40  ;;  %v10562_v48 = vpack.c.bf16 %v9415_v18, %v9411_v50  ;;  %v9332_v40 = vld [vmem:[#allocation13 + $0x4f4] ss:$24 sps:$4 sm:$0xff]   ;;  %v9333_v50 = vld [vmem:[#allocation13 + $0x520] ss:$24 sps:$4 sm:$0xff]   ;;  %v9341_v18 = vld [vmem:[#allocation13 + $0x584] ss:$24 sps:$4 sm:$0xff]  }
 0x3db   :  { %6856 = vmatprep.subr.bf16.mxu0 %v9272_v3  ;;  %v9338_v3 = vld [vmem:[#allocation13 + $0x554] ss:$24 sps:$4 sm:$0xff]  }
 0x3dc   :  { %6663 = vmatprep.mubr.bf16.mxu0 %v10562_v48  ;;  %6825 = vmatprep.mubr.bf16.mxu1 %v10562_v48 }
 0x3dd   :  { %6664 = vmatmul.mubr.bf16.gmra.mrb[76].mxu0 %v10560_v16  ;;  %6826 = vmatmul.mubr.bf16.gmra.mrb[84].mxu1 %v10560_v16 }
 0x3de   :  { %6857 = vmatpush1.bf16.msra.mxu0 %v9270_v4  ;;  %v9344_v4 = vld [vmem:[#allocation13 + $0x5b4] ss:$24 sps:$4 sm:$0xff]  }
 0x3df   :  { %6858 = vmatprep.subr.bf16.mxu0 %v9275_v15  ;;  %v9347_v15 = vld [vmem:[#allocation13 + $0x5e4] ss:$24 sps:$4 sm:$0xff]  }
 0x3e0   :  { %v9417_v22 = vpop.eup %9416 }
 0x3e1   :  { %v9419_v56 = vpop.eup %9418  ;;  %v10570_v0 = vpack.c.bf16 %v9417_v22, %v9417_v22 }
 0x3e2   :  { %6859 = vmatpush1.bf16.msra.mxu0 %v9273_v12  ;;  %v10568_v60 = vpack.c.bf16 %v9419_v56, %v9419_v56  ;;  %v9345_v12 = vld [vmem:[#allocation13 + $0x5e0] ss:$24 sps:$4 sm:$0xff]  }
 0x3e3   :  { %6860 = vmatprep.subr.bf16.mxu0 %v9278_v58  ;;  %v10596_v58 = vld [vmem:[#allocation14] sm:$0x3f] }
 0x3e4   :  { %6673 = vmatprep.mubr.bf16.mxu0 %v10568_v60  ;;  %6835 = vmatprep.mubr.bf16.mxu1 %v10568_v60 }
 0x3e5   :  { %6674 = vmatmul.mubr.bf16.gmra.mrb[80].mxu0 %v10570_v0  ;;  %6836 = vmatmul.mubr.bf16.gmra.mrb[88].mxu1 %v10570_v0 }
 0x3e6   :  { %6861 = vmatpush1.bf16.msra.mxu0 %v9276_v59  ;;  %6876 = vmatprep.mubr.bf16.mxu0 %v10438_v57  ;;  %v9294_v57 = vld [vmem:[#allocation13 + $0x2b0] ss:$24 sps:$4 sm:$0xff]  }
 0x3e7   :  { %6862 = vmatprep.subr.bf16.mxu0 %v9281_v52 }
 0x3ea   :  { %6863 = vmatpush1.bf16.msra.mxu0 %v9279_v44 }
 0x3eb   :  { %6864 = vmatprep.subr.bf16.mxu0 %v9284_v8 }
 0x3ee   :  { %6865 = vmatpush1.bf16.msra.mxu0 %v9282_v63 }
 0x3ef   :  { %6866 = vmatprep.subr.bf16.mxu0 %v9287_v20 }
 0x3f2   :  { %6867 = vmatpush1.bf16.msra.mxu0 %v9285_v46 }
 0x3f3   :  { %6868 = vmatprep.subr.bf16.mxu0 %v9290_v28 }
 0x3f6   :  { %6869 = vmatpush1.bf16.msra.mxu0 %v9288_v62 }
 0x3f7   :  { %6870 = vmatprep.subr.bf16.mxu0 %v9293_v54 }
 0x3fa   :  { %6871 = vmatpush1.bf16.msra.mxu0 %v9291_v61 }
 0x3fb   :  { %6872 = vmatprep.subr.bf16.mxu0 %v9296_v26 }
 0x3fe   :  { %6873 = vmatpush1.bf16.msra.mxu0 %v9294_v57 }
 0x3ff   :  { %6874 = vmatprep.subr.bf16.mxu0 %v9299_v25 }
 0x402   :  { %6875 = vmatpush1.bf16.msra.mxu0 %v9297_v14 }
 0x403   :  { %6925 = vmatprep.subr.bf16.mxu0 %v9302_v11 }
 0x405   :  { %6877 = vmatmul.mubr.bf16.vlgmr.msra.gmra.mrb[84].mxu0 %v10434_v41  ;;  %v9312_v41 = vld [vmem:[#allocation13 + $0x3d0] ss:$24 sps:$4 sm:$0xff]  }
 0x406   :  { %6886 = vmatprep.mubr.bf16.mxu0 %v10454_v27  ;;  %6926 = vmatpush1.bf16.msra.mxu0 %v9300_v19  ;;  %v9317_v27 = vld [vmem:[#allocation13 + $0x404] ss:$24 sps:$4 sm:$0xff]  }
 0x407   :  { %6927 = vmatprep.subr.bf16.mxu0 %v9305_v47 }
 0x40a   :  { %6928 = vmatpush1.bf16.msra.mxu0 %v9303_v36 }
 0x40b   :  { %6929 = vmatprep.subr.bf16.mxu0 %v9308_v17 }
 0x40d   :  { %6887 = vmatmul.mubr.bf16.gmra.mrb[88].mxu0 %v10450_v35  ;;  %v9318_v35 = vld [vmem:[#allocation13 + $0x430] ss:$24 sps:$4 sm:$0xff]  }
 0x40e   :  { %6896 = vmatprep.mubr.bf16.mxu0 %v10475_v49  ;;  %6930 = vmatpush1.bf16.msra.mxu0 %v9306_v42  ;;  %v9323_v49 = vld [vmem:[#allocation13 + $0x464] ss:$24 sps:$4 sm:$0xff]  }
 0x40f   :  { %6931 = vmatprep.subr.bf16.mxu0 %v9311_v45 }
 0x412   :  { %6932 = vmatpush1.bf16.msra.mxu0 %v9309_v1 }
 0x413   :  { %6933 = vmatprep.subr.bf16.mxu0 %v9314_v33 }
 0x415   :  { %6897 = vmatmul.mubr.bf16.gmra.mrb[92].mxu0 %v10472_v24  ;;  %v9324_v24 = vld [vmem:[#allocation13 + $0x490] ss:$24 sps:$4 sm:$0xff]  }
 0x416   :  { %6906 = vmatprep.mubr.bf16.mxu0 %v10484_v5  ;;  %6934 = vmatpush1.bf16.msra.mxu0 %v9312_v41  ;;  %v9329_v5 = vld [vmem:[#allocation13 + $0x4c4] ss:$24 sps:$4 sm:$0xff]  }
 0x417   :  { %6935 = vmatprep.subr.bf16.mxu0 %v9317_v27 }
 0x41a   :  { %6936 = vmatpush1.bf16.msra.mxu0 %v9315_v32 }
 0x41b   :  { %6937 = vmatprep.subr.bf16.mxu0 %v9320_v30 }
 0x41d   :  { %6907 = vmatmul.mubr.bf16.gmra.mrb[96].mxu0 %v10482_v6  ;;  %v9330_v6 = vld [vmem:[#allocation13 + $0x4f0] ss:$24 sps:$4 sm:$0xff]  }
 0x41e   :  { %6916 = vmatprep.mubr.bf16.mxu0 %v10490_v21  ;;  %6938 = vmatpush1.bf16.msra.mxu0 %v9318_v35  ;;  %v9335_v21 = vld [vmem:[#allocation13 + $0x524] ss:$24 sps:$4 sm:$0xff]  }
 0x41f   :  { %6939 = vmatprep.subr.bf16.mxu0 %v9323_v49 }
 0x422   :  { %6940 = vmatpush1.bf16.msra.mxu0 %v9321_v10 }
 0x423   :  { %6941 = vmatprep.subr.bf16.mxu0 %v9326_v39 }
 0x425   :  { %6917 = vmatmul.mubr.bf16.gmra.mrb[100].mxu0 %v10494_v43  ;;  %v9339_v43 = vld [vmem:[#allocation13 + $0x580] ss:$24 sps:$4 sm:$0xff]  }
 0x426   :  { %6942 = vmatpush1.bf16.msra.mxu0 %v9324_v24  ;;  %6957 = vmatprep.mubr.bf16.mxu0 %v10527_v9  ;;  %v9342_v9 = vld [vmem:[#allocation13 + $0x5b0] ss:$24 sps:$4 sm:$0xff]  }
 0x427   :  { %6943 = vmatprep.subr.bf16.mxu0 %v9329_v5 }
 0x42a   :  { %6944 = vmatpush1.bf16.msra.mxu0 %v9327_v53 }
 0x42b   :  { %6945 = vmatprep.subr.bf16.mxu0 %v9332_v40 }
 0x42e   :  { %6946 = vmatpush1.bf16.msra.mxu0 %v9330_v6 }
 0x42f   :  { %6947 = vmatprep.subr.bf16.mxu0 %v9335_v21 }
 0x432   :  { %6948 = vmatpush1.bf16.msra.mxu0 %v9333_v50 }
 0x433   :  { %6949 = vmatprep.subr.bf16.mxu0 %v9338_v3 }
 0x436   :  { %6950 = vmatpush1.bf16.msra.mxu0 %v9336_v38 }
 0x437   :  { %6951 = vmatprep.subr.bf16.mxu0 %v9341_v18 }
 0x43a   :  { %6952 = vmatpush1.bf16.msra.mxu0 %v9339_v43 }
 0x43b   :  { %6953 = vmatprep.subr.bf16.mxu0 %v9344_v4 }
 0x43e   :  { %6954 = vmatpush1.bf16.msra.mxu0 %v9342_v9 }
 0x43f   :  { %6955 = vmatprep.subr.bf16.mxu0 %v9347_v15 }
 0x442   :  { %6956 = vmatpush1.bf16.msra.mxu0 %v9345_v12 }
 0x445   :  { %6958 = vmatmul.mubr.bf16.vlgmr.msra.gmra.mrb[84].mxu0 %v10524_v37  ;;  %v10601_v37 = vrot.slane %v10596_v58, %v5226_v29 }
 0x446   :  { %6967 = vmatprep.mubr.bf16.mxu0 %v10539_v13  ;;  %v10611_v13 = vrot.slane %v10596_v58, %v5230_v51 }
 0x44d   :  { %6968 = vmatmul.mubr.bf16.gmra.mrb[88].mxu0 %v10536_v31  ;;  %v10606_v31 = vrot.slane %v10596_v58, %v5234_v34 }
 0x44e   :  { %6977 = vmatprep.mubr.bf16.mxu0 %v10551_v23 }
 0x455   :  { %6978 = vmatmul.mubr.bf16.gmra.mrb[92].mxu0 %v10548_v7  ;;  %v10616_v7 = vrot.slane %v10596_v58, %v5238_v55 }
 0x456   :  { %6987 = vmatprep.mubr.bf16.mxu0 %v10562_v48 }
 0x45d   :  { %6988 = vmatmul.mubr.bf16.gmra.mrb[96].mxu0 %v10560_v16 }
 0x45e   :  { %6997 = vmatprep.mubr.bf16.mxu0 %v10568_v60 }
 0x465   :  { %6998 = vmatmul.mubr.bf16.gmra.mrb[100].mxu0 %v10570_v0 }
 0x498   :  { %v6635_v23 = vpop.f32.mrb[64].mxu0  ;;  %v6797_v16 = vpop.f32.mrb[72].mxu1 }
 0x499   :  { %v7913_v29 = vadd.f32 %v6635_v23, %v10601_v37  ;;  %v7931_v48 = vadd.f32 %v6797_v16, %v10606_v31  ;;  %v6637_v22 = vpop.f32.mrb[65].mxu0  ;;  %v6799_v56 = vpop.f32.mrb[73].mxu1 }
 0x49a   :  { %v7914_v34 = vadd.f32 %v6637_v22, %v10611_v13  ;;  %v7932_v60 = vadd.f32 %v6799_v56, %v10616_v7  ;;  %v6639_v59 = vpop.f32.mrb[66].mxu0  ;;  %v6801_v51 = vpop.f32.mrb[74].mxu1 }
 0x49b   :  { %7006 = vst [vmem:[#allocation16] sm:$0xff] %v7913_v29  ;;  %7008 = vst [vmem:[#allocation16 + $0x10] sm:$0xff] %v7931_v48  ;;  %v7915_v0 = vadd.f32 %v6639_v59, %v10601_v37  ;;  %v7933_v55 = vadd.f32 %v6801_v51, %v10606_v31  ;;  %v6641_v52 = vpop.f32.mrb[67].mxu0  ;;  %v6803_v44 = vpop.f32.mrb[75].mxu1 }
 0x49c   :  { %7007 = vst [vmem:[#allocation16 + $0x8] sm:$0xff] %v7914_v34  ;;  %7009 = vst [vmem:[#allocation16 + $0x18] sm:$0xff] %v7932_v60  ;;  %v7916_v8 = vadd.f32 %v6641_v52, %v10611_v13  ;;  %v7934_v63 = vadd.f32 %v6803_v44, %v10616_v7 }
 0x49d   :  { %7012 = vst [vmem:[#allocation16 + $0x30] sm:$0xff] %v7915_v0  ;;  %7014 = vst [vmem:[#allocation16 + $0x40] sm:$0xff] %v7933_v55 }
 0x49e   :  { %7013 = vst [vmem:[#allocation16 + $0x38] sm:$0xff] %v7916_v8  ;;  %7015 = vst [vmem:[#allocation16 + $0x48] sm:$0xff] %v7934_v63 }
 0x4a0   :  { %v6645_v20 = vpop.f32.mrb[68].mxu0  ;;  %v6807_v46 = vpop.f32.mrb[76].mxu1 }
 0x4a1   :  { %v7917_v28 = vadd.f32 %v6645_v20, %v10601_v37  ;;  %v7935_v62 = vadd.f32 %v6807_v46, %v10606_v31  ;;  %v6647_v54 = vpop.f32.mrb[69].mxu0  ;;  %v6809_v61 = vpop.f32.mrb[77].mxu1 }
 0x4a2   :  { %v7918_v26 = vadd.f32 %v6647_v54, %v10611_v13  ;;  %v7936_v57 = vadd.f32 %v6809_v61, %v10616_v7  ;;  %v6649_v25 = vpop.f32.mrb[70].mxu0  ;;  %v6811_v14 = vpop.f32.mrb[78].mxu1 }
 0x4a3   :  { %7018 = vst [vmem:[#allocation16 + $0x60] sm:$0xff] %v7917_v28  ;;  %7020 = vst [vmem:[#allocation16 + $0x70] sm:$0xff] %v7935_v62  ;;  %v7919_v11 = vadd.f32 %v6649_v25, %v10601_v37  ;;  %v7937_v19 = vadd.f32 %v6811_v14, %v10606_v31  ;;  %v6651_v47 = vpop.f32.mrb[71].mxu0  ;;  %v6813_v36 = vpop.f32.mrb[79].mxu1  ;;  %v5548_v28 = vsub.s32 4, %v9819_v2 }
 0x4a4   :  { %7019 = vst [vmem:[#allocation16 + $0x68] sm:$0xff] %v7918_v26  ;;  %7021 = vst [vmem:[#allocation16 + $0x78] sm:$0xff] %v7936_v57  ;;  %v7920_v17 = vadd.f32 %v6651_v47, %v10611_v13  ;;  %v7938_v42 = vadd.f32 %v6813_v36, %v10616_v7 }
 0x4a5   :  { %7024 = vst [vmem:[#allocation16 + $0x90] sm:$0xff] %v7919_v11  ;;  %7026 = vst [vmem:[#allocation16 + $0xa0] sm:$0xff] %v7937_v19 }
 0x4a6   :  { %7025 = vst [vmem:[#allocation16 + $0x98] sm:$0xff] %v7920_v17  ;;  %7027 = vst [vmem:[#allocation16 + $0xa8] sm:$0xff] %v7938_v42 }
 0x4a8   :  { %v6655_v45 = vpop.f32.mrb[72].mxu0  ;;  %v6817_v1 = vpop.f32.mrb[80].mxu1 }
 0x4a9   :  { %v7921_v33 = vadd.f32 %v6655_v45, %v10601_v37  ;;  %v7939_v41 = vadd.f32 %v6817_v1, %v10606_v31  ;;  %v6657_v27 = vpop.f32.mrb[73].mxu0  ;;  %v6819_v32 = vpop.f32.mrb[81].mxu1 }
 0x4aa   :  { %v7922_v30 = vadd.f32 %v6657_v27, %v10611_v13  ;;  %v7940_v35 = vadd.f32 %v6819_v32, %v10616_v7  ;;  %v6659_v49 = vpop.f32.mrb[74].mxu0  ;;  %v6821_v10 = vpop.f32.mrb[82].mxu1 }
 0x4ab   :  { %7030 = vst [vmem:[#allocation16 + $0xc0] sm:$0xff] %v7921_v33  ;;  %7032 = vst [vmem:[#allocation16 + $0xd0] sm:$0xff] %v7939_v41  ;;  %v7923_v39 = vadd.f32 %v6659_v49, %v10601_v37  ;;  %v7941_v24 = vadd.f32 %v6821_v10, %v10606_v31  ;;  %v6661_v5 = vpop.f32.mrb[75].mxu0  ;;  %v6823_v53 = vpop.f32.mrb[83].mxu1 }
 0x4ac   :  { %7031 = vst [vmem:[#allocation16 + $0xc8] sm:$0xff] %v7922_v30  ;;  %7033 = vst [vmem:[#allocation16 + $0xd8] sm:$0xff] %v7940_v35  ;;  %v7924_v40 = vadd.f32 %v6661_v5, %v10611_v13  ;;  %v7942_v6 = vadd.f32 %v6823_v53, %v10616_v7 }
 0x4ad   :  { %7036 = vst [vmem:[#allocation16 + $0xf0] sm:$0xff] %v7923_v39  ;;  %7038 = vst [vmem:[#allocation16 + $0x100] sm:$0xff] %v7941_v24 }
 0x4ae   :  { %7037 = vst [vmem:[#allocation16 + $0xf8] sm:$0xff] %v7924_v40  ;;  %7039 = vst [vmem:[#allocation16 + $0x108] sm:$0xff] %v7942_v6 }
 0x4b0   :  { %v6665_v21 = vpop.f32.mrb[76].mxu0  ;;  %v6827_v50 = vpop.f32.mrb[84].mxu1 }
 0x4b1   :  { %v7925_v3 = vadd.f32 %v6665_v21, %v10601_v37  ;;  %v7943_v38 = vadd.f32 %v6827_v50, %v10606_v31  ;;  %v6667_v18 = vpop.f32.mrb[77].mxu0  ;;  %v6829_v43 = vpop.f32.mrb[85].mxu1 }
 0x4b2   :  { %v7926_v4 = vadd.f32 %v6667_v18, %v10611_v13  ;;  %v7944_v9 = vadd.f32 %v6829_v43, %v10616_v7  ;;  %v6669_v15 = vpop.f32.mrb[78].mxu0  ;;  %v6831_v12 = vpop.f32.mrb[86].mxu1 }
 0x4b3   :  { %7042 = vst [vmem:[#allocation16 + $0x120] sm:$0xff] %v7925_v3  ;;  %7044 = vst [vmem:[#allocation16 + $0x130] sm:$0xff] %v7943_v38  ;;  %v7927_v23 = vadd.f32 %v6669_v15, %v10601_v37  ;;  %v7945_v16 = vadd.f32 %v6831_v12, %v10606_v31  ;;  %v6671_v29 = vpop.f32.mrb[79].mxu0  ;;  %v6833_v48 = vpop.f32.mrb[87].mxu1 }
 0x4b4   :  { %7043 = vst [vmem:[#allocation16 + $0x128] sm:$0xff] %v7926_v4  ;;  %7045 = vst [vmem:[#allocation16 + $0x138] sm:$0xff] %v7944_v9  ;;  %v7928_v22 = vadd.f32 %v6671_v29, %v10611_v13  ;;  %v7946_v56 = vadd.f32 %v6833_v48, %v10616_v7 }
 0x4b5   :  { %7048 = vst [vmem:[#allocation16 + $0x150] sm:$0xff] %v7927_v23  ;;  %7050 = vst [vmem:[#allocation16 + $0x160] sm:$0xff] %v7945_v16 }
 0x4b6   :  { %7049 = vst [vmem:[#allocation16 + $0x158] sm:$0xff] %v7928_v22  ;;  %7051 = vst [vmem:[#allocation16 + $0x168] sm:$0xff] %v7946_v56 }
 0x4b8   :  { %v6675_v34 = vpop.f32.mrb[80].mxu0  ;;  %v6837_v60 = vpop.f32.mrb[88].mxu1 }
 0x4b9   :  { %v7929_v59 = vadd.f32 %v6675_v34, %v10601_v37  ;;  %v7947_v51 = vadd.f32 %v6837_v60, %v10606_v31  ;;  %v6677_v0 = vpop.f32.mrb[81].mxu0  ;;  %v6839_v55 = vpop.f32.mrb[89].mxu1  ;;  %v5552_v37 = vsub.s32 5, %v9819_v2  ;;  %v5549_v31 = vrot.slane %v10596_v58, %v5548_v28 }
 0x4ba   :  { %v7930_v52 = vadd.f32 %v6677_v0, %v10611_v13  ;;  %v7948_v44 = vadd.f32 %v6839_v55, %v10616_v7  ;;  %v6679_v8 = vpop.f32.mrb[82].mxu0  ;;  %v6841_v63 = vpop.f32.mrb[90].mxu1 }
 0x4bb   :  { %7054 = vst [vmem:[#allocation16 + $0x180] sm:$0xff] %v7929_v59  ;;  %7056 = vst [vmem:[#allocation16 + $0x190] sm:$0xff] %v7947_v51  ;;  %v6680_v20 = vpop.f32.mrb[83].mxu0  ;;  %v6842_v46 = vpop.f32.mrb[91].mxu1  ;;  %v5553_v62 = vrot.slane %v10596_v58, %v5552_v37 }
 0x4bc   :  { %7055 = vst [vmem:[#allocation16 + $0x188] sm:$0xff] %v7930_v52  ;;  %7057 = vst [vmem:[#allocation16 + $0x198] sm:$0xff] %v7948_v44 }
 0x518   :  { %v6959_v54 = vpop.f32.mrb[84].mxu0 }
 0x519   :  { %v7949_v13 = vadd.f32 %v6959_v54, %v5549_v31  ;;  %v6961_v61 = vpop.f32.mrb[85].mxu0 }
 0x51a   :  { %v7950_v7 = vadd.f32 %v6961_v61, %v5553_v62  ;;  %v6963_v26 = vpop.f32.mrb[86].mxu0 }
 0x51b   :  { %7010 = vst [vmem:[#allocation16 + $0x20] sm:$0xff] %v7949_v13  ;;  %v7951_v57 = vadd.f32 %v6963_v26, %v5549_v31  ;;  %v6965_v25 = vpop.f32.mrb[87].mxu0 }
 0x51c   :  { %7011 = vst [vmem:[#allocation16 + $0x28] sm:$0xff] %v7950_v7  ;;  %v7952_v14 = vadd.f32 %v6965_v25, %v5553_v62 }
 0x51d   :  { %7016 = vst [vmem:[#allocation16 + $0x50] sm:$0xff] %v7951_v57 }
 0x51e   :  { %7017 = vst [vmem:[#allocation16 + $0x58] sm:$0xff] %v7952_v14 }
 0x520   :  { %v6969_v11 = vpop.f32.mrb[88].mxu0 }
 0x521   :  { %v7953_v19 = vadd.f32 %v6969_v11, %v5549_v31  ;;  %v6971_v47 = vpop.f32.mrb[89].mxu0 }
 0x522   :  { %v7954_v2 = vadd.f32 %v6971_v47, %v5553_v62  ;;  %v6973_v36 = vpop.f32.mrb[90].mxu0 }
 0x523   :  { %7022 = vst [vmem:[#allocation16 + $0x80] sm:$0xff] %v7953_v19  ;;  %v7955_v17 = vadd.f32 %v6973_v36, %v5549_v31  ;;  %v6975_v58 = vpop.f32.mrb[91].mxu0 }
 0x524   :  { %7023 = vst [vmem:[#allocation16 + $0x88] sm:$0xff] %v7954_v2  ;;  %v7956_v42 = vadd.f32 %v6975_v58, %v5553_v62 }
 0x525   :  { %7028 = vst [vmem:[#allocation16 + $0xb0] sm:$0xff] %v7955_v17 }
 0x526   :  { %7029 = vst [vmem:[#allocation16 + $0xb8] sm:$0xff] %v7956_v42 }
 0x528   :  { %v6979_v45 = vpop.f32.mrb[92].mxu0 }
 0x529   :  { %v7957_v1 = vadd.f32 %v6979_v45, %v5549_v31  ;;  %v6981_v33 = vpop.f32.mrb[93].mxu0 }
 0x52a   :  { %v7958_v41 = vadd.f32 %v6981_v33, %v5553_v62  ;;  %v6983_v27 = vpop.f32.mrb[94].mxu0 }
 0x52b   :  { %7034 = vst [vmem:[#allocation16 + $0xe0] sm:$0xff] %v7957_v1  ;;  %v7959_v32 = vadd.f32 %v6983_v27, %v5549_v31  ;;  %v6985_v30 = vpop.f32.mrb[95].mxu0 }
 0x52c   :  { %7035 = vst [vmem:[#allocation16 + $0xe8] sm:$0xff] %v7958_v41  ;;  %v7960_v35 = vadd.f32 %v6985_v30, %v5553_v62 }
 0x52d   :  { %7040 = vst [vmem:[#allocation16 + $0x110] sm:$0xff] %v7959_v32 }
 0x52e   :  { %7041 = vst [vmem:[#allocation16 + $0x118] sm:$0xff] %v7960_v35 }
 0x530   :  { %v6989_v49 = vpop.f32.mrb[96].mxu0 }
 0x531   :  { %v7961_v10 = vadd.f32 %v6989_v49, %v5549_v31  ;;  %v6991_v39 = vpop.f32.mrb[97].mxu0 }
 0x532   :  { %v7962_v24 = vadd.f32 %v6991_v39, %v5553_v62  ;;  %v6993_v5 = vpop.f32.mrb[98].mxu0 }
 0x533   :  { %7046 = vst [vmem:[#allocation16 + $0x140] sm:$0xff] %v7961_v10  ;;  %v7963_v53 = vadd.f32 %v6993_v5, %v5549_v31  ;;  %v6995_v40 = vpop.f32.mrb[99].mxu0 }
 0x534   :  { %7047 = vst [vmem:[#allocation16 + $0x148] sm:$0xff] %v7962_v24  ;;  %v7964_v6 = vadd.f32 %v6995_v40, %v5553_v62 }
 0x535   :  { %7052 = vst [vmem:[#allocation16 + $0x170] sm:$0xff] %v7963_v53 }
 0x536   :  { %7053 = vst [vmem:[#allocation16 + $0x178] sm:$0xff] %v7964_v6 }
 0x538   :  { %v6999_v21 = vpop.f32.mrb[100].mxu0 }
 0x539   :  { %v7965_v50 = vadd.f32 %v6999_v21, %v5549_v31  ;;  %v7001_v3 = vpop.f32.mrb[101].mxu0 }
 0x53a   :  { %v7966_v38 = vadd.f32 %v7001_v3, %v5553_v62  ;;  %v7003_v18 = vpop.f32.mrb[102].mxu0 }
 0x53b   :  { %7058 = vst [vmem:[#allocation16 + $0x1a0] sm:$0xff] %v7965_v50  ;;  %v7004_v43 = vpop.f32.mrb[103].mxu0 }
 0x53c   :  { %7059 = vst [vmem:[#allocation16 + $0x1a8] sm:$0xff] %v7966_v38 }
 0x53d   :  { %9607 = shalt.err (!%p9604_p12)
}
 0x53e   :  { %s9608_s15 = scalar_lea.hbm %s10678_s8, 6912 }
 0x53f   :  { %p9609_p13 = scmp.ne.s32.totalorder %s10678_s8, %s9608_s15  ;;  %p9612_p0 = scmp.lt.u32.totalorder %s9608_s15, %s10678_s8 }
 0x541   :  { %p9614_p1 = pnand %p9612_p0, %p9609_p13 }
 0x543   :  { %9617 = shalt.err (!%p9614_p1)
}
 0x544   :  { %s9647_s3 = smov 768   ;;  %s9648_s30 = smov 48  }
 0x545   :  { %7071 = dma.vmem_to_hbm [thread:$0]  %s7066_s11, 6912, %s10678_s8, [#allocation4], %s9647_s3, %s9647_s3, %s9648_s30  }
 0x546   :  { %9628 = dma.done.wait [#allocation4], 6912  }
 0x547   :  { %9629 = vsyncadd [#allocation4], 4294960384 }
 0x548   :  { %7075 = vsyncpa [#allocation3], 1 }
 0x549   :  { %7076 = vsyncpa [#allocation6], 1 }
 0x54a   :  { %7077 = vsyncpa [#allocation9], 1 }
 0x54b   :  { %7078 = vsyncpa [#allocation12], 1 }
 0x54c   :  { %7079 = vsyncpa [#allocation15], 1 }
 0x54d   :  { %7080 = vsyncpa [#allocation4], 1 }

</bundles_post_ra>
